<compile_context>
chip_gen: v5e
topology: v5e:2x2
jax: 0.10.0
libtpu: 0.0.40
codegen_flags: <defaults>
</compile_context>

<pallas_src>
import functools

import jax
import jax.numpy as jnp
from jax.experimental import pallas as pl
from jax.experimental.pallas import tpu as pltpu

EPS = 1e-5
LANE = 128
DEFAULT_TM = 256
# Re-derive per generation if tiles grow (v7x physical VMEM is 64 MiB).
VMEM_LIMIT = 64 * 1024 * 1024


def _round_up(x, m):
    return (x + m - 1) // m * m


def _pad2d(a, rows, cols):
    r, c = a.shape
    return jnp.pad(a, ((0, rows - r), (0, cols - c)))


# ----------------------------- kernel helpers ------------------------------

def _bn_accum(y, s_ref, ss_ref):
    s_ref[...] += jnp.sum(y, axis=0, keepdims=True)
    ss_ref[...] += jnp.sum(y * y, axis=0, keepdims=True)


def _bn_finalize(s_ref, ss_ref, g_ref, b_ref, scale_ref, shift_ref, inv_m):
    mean = s_ref[...] * inv_m
    var = jnp.maximum(ss_ref[...] * inv_m - mean * mean, 0.0)
    scale = g_ref[...] * jax.lax.rsqrt(var + EPS)      # rsqrt -> EUP slot
    scale_ref[...] = scale
    shift_ref[...] = b_ref[...] - mean * scale


# ------------------------------ Pallas kernels ------------------------------

def _mm_bn_kernel(a_ref, w_ref, g_ref, b_ref, o_ref,
                  s_ref, ss_ref, scale_ref, shift_ref, *, inv_m, relu):
    """Two-phase  out = [ReLU]( BN_batchstats(a @ w) )  over M tiles."""
    p, i = pl.program_id(0), pl.program_id(1)
    y = jnp.dot(a_ref[...], w_ref[...], preferred_element_type=jnp.float32)

    @pl.when((p == 0) & (i == 0))
    def _():
        s_ref[...] = jnp.zeros_like(s_ref)
        ss_ref[...] = jnp.zeros_like(ss_ref)

    @pl.when(p == 0)
    def _():
        _bn_accum(y, s_ref, ss_ref)

    @pl.when((p == 1) & (i == 0))
    def _():
        _bn_finalize(s_ref, ss_ref, g_ref, b_ref, scale_ref, shift_ref, inv_m)

    @pl.when(p == 1)
    def _():
        out = y * scale_ref[...] + shift_ref[...]
        if relu:
            out = jnp.maximum(out, 0.0)
        o_ref[...] = out.astype(o_ref.dtype)


def _mm_bn_res_kernel(a_ref, w_ref, g_ref, b_ref, r_ref, o_ref,
                      s_ref, ss_ref, scale_ref, shift_ref, *, inv_m, relu):
    """out = [ReLU]( BN_batchstats(a @ w) + residual )."""
    p, i = pl.program_id(0), pl.program_id(1)
    y = jnp.dot(a_ref[...], w_ref[...], preferred_element_type=jnp.float32)

    @pl.when((p == 0) & (i == 0))
    def _():
        s_ref[...] = jnp.zeros_like(s_ref)
        ss_ref[...] = jnp.zeros_like(ss_ref)

    @pl.when(p == 0)
    def _():
        _bn_accum(y, s_ref, ss_ref)

    @pl.when((p == 1) & (i == 0))
    def _():
        _bn_finalize(s_ref, ss_ref, g_ref, b_ref, scale_ref, shift_ref, inv_m)

    @pl.when(p == 1)
    def _():
        out = y * scale_ref[...] + shift_ref[...] + r_ref[...].astype(jnp.float32)
        if relu:
            out = jnp.maximum(out, 0.0)
        o_ref[...] = out.astype(o_ref.dtype)


def _mm_bn_ds_kernel(a_ref, w_ref, g_ref, b_ref,
                     ad_ref, wd_ref, gd_ref, bd_ref, o_ref,
                     s_ref, ss_ref, scale_ref, shift_ref,
                     sd_ref, ssd_ref, scaled_ref, shiftd_ref, *, inv_m, relu):
    """out = [ReLU]( BN(a @ w) + BN(ad @ wd) )  -- conv3 + downsample fused."""
    p, i = pl.program_id(0), pl.program_id(1)
    y = jnp.dot(a_ref[...], w_ref[...], preferred_element_type=jnp.float32)
    yd = jnp.dot(ad_ref[...], wd_ref[...], preferred_element_type=jnp.float32)

    @pl.when((p == 0) & (i == 0))
    def _():
        s_ref[...] = jnp.zeros_like(s_ref)
        ss_ref[...] = jnp.zeros_like(ss_ref)
        sd_ref[...] = jnp.zeros_like(sd_ref)
        ssd_ref[...] = jnp.zeros_like(ssd_ref)

    @pl.when(p == 0)
    def _():
        _bn_accum(y, s_ref, ss_ref)
        _bn_accum(yd, sd_ref, ssd_ref)

    @pl.when((p == 1) & (i == 0))
    def _():
        _bn_finalize(s_ref, ss_ref, g_ref, b_ref, scale_ref, shift_ref, inv_m)
        _bn_finalize(sd_ref, ssd_ref, gd_ref, bd_ref, scaled_ref, shiftd_ref, inv_m)

    @pl.when(p == 1)
    def _():
        out = (y * scale_ref[...] + shift_ref[...]
               + yd * scaled_ref[...] + shiftd_ref[...])
        if relu:
            out = jnp.maximum(out, 0.0)
        o_ref[...] = out.astype(o_ref.dtype)


def _conv3x3_bn_kernel(x_ref, w_ref, g_ref, b_ref, mask_ref, o_ref,
                       s_ref, ss_ref, scale_ref, shift_ref,
                       *, tap_specs, l_acc, inv_m):
    """3x3 conv (one image per grid step) as 9 shifted in-VMEM matmuls
    + full-batch BatchNorm + ReLU, same two-phase scheme as the 1x1 kernels."""
    p, n = pl.program_id(0), pl.program_id(1)
    co = w_ref.shape[-1]

    y = jnp.zeros((l_acc, co), jnp.float32)
    for t, (ph, start) in enumerate(tap_specs):            # static 9-tap loop
        patch = x_ref[ph, 0, pl.ds(start, l_acc), :]        # (l_acc, Cin_pad) bf16
        y = y + jnp.dot(patch, w_ref[t], preferred_element_type=jnp.float32)

    @pl.when((p == 0) & (n == 0))
    def _():
        s_ref[...] = jnp.zeros_like(s_ref)
        ss_ref[...] = jnp.zeros_like(ss_ref)

    @pl.when(p == 0)
    def _():
        # mask excludes the row-flattening overrun columns from the statistics.
        yv = y * mask_ref[...]
        s_ref[...] += jnp.sum(yv, axis=0, keepdims=True)
        ss_ref[...] += jnp.sum(yv * y, axis=0, keepdims=True)

    @pl.when((p == 1) & (n == 0))
    def _():
        _bn_finalize(s_ref, ss_ref, g_ref, b_ref, scale_ref, shift_ref, inv_m)

    @pl.when(p == 1)
    def _():
        out = jnp.maximum(y * scale_ref[...] + shift_ref[...], 0.0)
        o_ref[0] = out.astype(o_ref.dtype)


# ------------------------------ host wrappers -------------------------------

def fused_matmul_bn(a, w, gamma, beta, *, relu=True, residual=None, down=None,
                    out_dtype=jnp.float32, keep_channel_pad=False,
                    tile_m=DEFAULT_TM):
    """Fused (a @ w) -> BatchNorm(batch stats) [+ residual | + BN(ad @ wd)]
    [-> ReLU] as one two-phase pallas_call (phase 0: stats, phase 1: apply)."""
    M, K = a.shape
    N = w.shape[1]
    Kp, Np = _round_up(K, LANE), _round_up(N, LANE)
    TM = min(tile_m, _round_up(M, 8))
    Mp = _round_up(M, TM)
    n_tiles = Mp // TM
    inv_m = 1.0 / M

    a_p = _pad2d(a, Mp, Kp).astype(jnp.bfloat16)
    w_p = _pad2d(w, Kp, Np).astype(jnp.bfloat16)
    g_p = _pad2d(gamma.reshape(1, -1).astype(jnp.float32), 1, Np)
    b_p = _pad2d(beta.reshape(1, -1).astype(jnp.float32), 1, Np)

    a_spec = pl.BlockSpec((TM, Kp), lambda p, i: (i, 0))
    w_spec = pl.BlockSpec((Kp, Np), lambda p, i: (0, 0))       # weight resident
    v_spec = pl.BlockSpec((1, Np), lambda p, i: (0, 0))
    # Output (and residual) block index is pinned to 0 during the stats phase,
    # so no HBM write-back / fetch happens until the apply phase.
    o_spec = pl.BlockSpec((TM, Np), lambda p, i: (p * i, 0))

    inputs = [a_p, w_p, g_p, b_p]
    in_specs = [a_spec, w_spec, v_spec, v_spec]
    scratch = [pltpu.VMEM((1, Np), jnp.float32) for _ in range(4)]
    flops = 2 * 2 * Mp * Kp * Np
    bytes_accessed = (2 * a_p.size * 2 + w_p.size * 2
                      + Mp * Np * jnp.dtype(out_dtype).itemsize)

    if down is not None:
        ad, wd, gd, bd = down
        Kdp = _round_up(ad.shape[1], LANE)
        inputs += [_pad2d(ad, Mp, Kdp).astype(jnp.bfloat16),
                   _pad2d(wd, Kdp, Np).astype(jnp.bfloat16),
                   _pad2d(gd.reshape(1, -1).astype(jnp.float32), 1, Np),
                   _pad2d(bd.reshape(1, -1).astype(jnp.float32), 1, Np)]
        in_specs += [pl.BlockSpec((TM, Kdp), lambda p, i: (i, 0)),
                     pl.BlockSpec((Kdp, Np), lambda p, i: (0, 0)),
                     v_spec, v_spec]
        scratch += [pltpu.VMEM((1, Np), jnp.float32) for _ in range(4)]
        kernel = functools.partial(_mm_bn_ds_kernel, inv_m=inv_m, relu=relu)
        flops += 2 * 2 * Mp * Kdp * Np
        bytes_accessed += 2 * Mp * Kdp * 2 + Kdp * Np * 2
    elif residual is not None:
        inputs.append(_pad2d(residual.astype(jnp.float32), Mp, Np))
        in_specs.append(pl.BlockSpec((TM, Np), lambda p, i: (p * i, 0)))
        kernel = functools.partial(_mm_bn_res_kernel, inv_m=inv_m, relu=relu)
        bytes_accessed += Mp * Np * 4
    else:
        kernel = functools.partial(_mm_bn_kernel, inv_m=inv_m, relu=relu)

    out = pl.pallas_call(
        kernel,
        out_shape=jax.ShapeDtypeStruct((Mp, Np), out_dtype),
        grid=(2, n_tiles),
        in_specs=in_specs,
        out_specs=o_spec,
        scratch_shapes=scratch,
        compiler_params=pltpu.CompilerParams(
            # Both axes are sequential: cross-tile BN statistics require all of
            # phase 0 to complete before phase 1.
            dimension_semantics=("arbitrary", "arbitrary"),
            vmem_limit_bytes=VMEM_LIMIT),
        cost_estimate=pl.CostEstimate(flops=flops, transcendentals=0,
                                      bytes_accessed=bytes_accessed),
    )(*inputs)

    out = out[:M]
    return out if keep_channel_pad else out[:, :N]


def conv3x3_bn_relu(x_nhwc, w9, gamma, beta, *, stride):
    """Fused 3x3 conv (padding=1, given stride) + BatchNorm(batch stats) + ReLU.

    x_nhwc : (N, H, W, Cx) channel-padded activation (extra channels are zero).
    w9     : (9, Cin, Cout) 3x3 weights in (kh, kw)-major tap order, Cin <= Cx.
    Returns ((N*Ho*Wo, Cout_padded) bf16 activation, Ho, Wo).
    """
    N, H, W, Cx = x_nhwc.shape
    s = int(stride)
    Cin, Cout = w9.shape[1], w9.shape[2]
    Cop = _round_up(Cout, LANE)

    Ho = (H - 1) // s + 1
    Wo = (W - 1) // s + 1
    Hp = _round_up(H + 2, s)
    Wp = _round_up(W + 2, s)
    xpad = jnp.pad(x_nhwc, ((0, 0), (1, Hp - H - 1), (1, Wp - W - 1), (0, 0)))
    Hph, Wph = Hp // s, Wp // s
    P = s * s
    if s == 1:
        phases = xpad[None]
    else:  # stride-phase split (space-to-depth): ~1x HBM traffic, no im2col.
        phases = (xpad.reshape(N, Hph, s, Wph, s, Cx)
                  .transpose(2, 4, 0, 1, 3, 5)
                  .reshape(P, N, Hph, Wph, Cx))
    flat = phases.reshape(P, N, Hph * Wph, Cx).astype(jnp.bfloat16)

    l_acc = Ho * Wph
    tap_specs = tuple(((dh % s) * s + (dw % s), (dh // s) * Wph + (dw // s))
                      for dh in range(3) for dw in range(3))
    Lflat = _round_up(max(max(st for _, st in tap_specs) + l_acc, Hph * Wph), 8)
    flat = jnp.pad(flat, ((0, 0), (0, 0), (0, Lflat - Hph * Wph), (0, 0)))

    w_p = jnp.pad(w9, ((0, 0), (0, Cx - Cin), (0, Cop - Cout))).astype(jnp.bfloat16)
    g_p = _pad2d(gamma.reshape(1, -1).astype(jnp.float32), 1, Cop)
    b_p = _pad2d(beta.reshape(1, -1).astype(jnp.float32), 1, Cop)

    # Valid-column mask over the row-flattened accumulator (cols >= Wo are the
    # flattening overrun: excluded from the BN stats and sliced off below).
    mask = jnp.tile(jnp.concatenate([jnp.ones((Wo,), jnp.float32),
                                     jnp.zeros((Wph - Wo,), jnp.float32)]), Ho)
    mask = mask.reshape(l_acc, 1)

    inv_m = 1.0 / (N * Ho * Wo)
    kernel = functools.partial(_conv3x3_bn_kernel, tap_specs=tap_specs,
                               l_acc=l_acc, inv_m=inv_m)

    flops = 2 * 9 * 2 * N * l_acc * Cx * Cop
    bytes_accessed = 2 * flat.size * 2 + w_p.size * 2 + N * l_acc * Cop * 2

    out = pl.pallas_call(
        kernel,
        out_shape=jax.ShapeDtypeStruct((N, l_acc, Cop), jnp.bfloat16),
        grid=(2, N),
        in_specs=[
            pl.BlockSpec((P, 1, Lflat, Cx), lambda p, n: (0, n, 0, 0)),
            pl.BlockSpec((9, Cx, Cop), lambda p, n: (0, 0, 0)),
            pl.BlockSpec((1, Cop), lambda p, n: (0, 0)),
            pl.BlockSpec((1, Cop), lambda p, n: (0, 0)),
            pl.BlockSpec((l_acc, 1), lambda p, n: (0, 0)),
        ],
        out_specs=pl.BlockSpec((1, l_acc, Cop), lambda p, n: (p * n, 0, 0)),
        scratch_shapes=[pltpu.VMEM((1, Cop), jnp.float32) for _ in range(4)],
        compiler_params=pltpu.CompilerParams(
            dimension_semantics=("arbitrary", "arbitrary"),
            vmem_limit_bytes=VMEM_LIMIT),
        cost_estimate=pl.CostEstimate(flops=flops, transcendentals=0,
                                      bytes_accessed=bytes_accessed),
    )(flat, w_p, g_p, b_p, mask)

    o = out.reshape(N, Ho, Wph, Cop)[:, :, :Wo, :].reshape(N * Ho * Wo, Cop)
    return o, Ho, Wo


# ------------------------------- forward glue -------------------------------

def bottleneck_forward(x_nchw, p, stride):
    """Pallas-backed forward of the PyTorch Bottleneck block (NCHW in/out)."""
    x = jnp.transpose(x_nchw, (0, 2, 3, 1)).astype(jnp.float32)  # NCHW -> NHWC
    N, H, W, Cin = x.shape
    Cp = p["w1"].shape[1]
    Cout = p["w3"].shape[1]

    # conv1 (1x1) + bn1 + relu  ->  bf16, channel-padded to a multiple of 128.
    o1 = fused_matmul_bn(x.reshape(N * H * W, Cin), p["w1"], p["g1"], p["b1"],
                         relu=True, out_dtype=jnp.bfloat16, keep_channel_pad=True)
    o1 = o1.reshape(N, H, W, -1)

    # conv2 (3x3, stride, pad=1) + bn2 + relu -- 9 shifted in-kernel matmuls.
    o2, Ho, Wo = conv3x3_bn_relu(o1, p["w2"].reshape(9, Cp, Cp),
                                 p["g2"], p["b2"], stride=stride)

    # conv3 (1x1) + bn3 + residual + relu.
    if stride != 1 or Cin != Cout:
        # Fuse the strided 1x1 downsample conv+bn with conv3 in one kernel.
        xs = x[:, ::stride, ::stride, :].reshape(N * Ho * Wo, Cin)
        o3 = fused_matmul_bn(o2, p["w3"], p["g3"], p["b3"], relu=True,
                             down=(xs, p["wd"], p["gd"], p["bd"]),
                             out_dtype=jnp.float32)
    else:
        res = x.reshape(N * H * W, Cin)
        o3 = fused_matmul_bn(o2, p["w3"], p["g3"], p["b3"], relu=True,
                             residual=res, out_dtype=jnp.float32)

    out = o3.reshape(N, Ho, Wo, Cout)
    return jnp.transpose(out, (0, 3, 1, 2))  # NHWC -> NCHW


# ------------------------ pure-JAX reference (check) ------------------------

def im2col_3x3(x, stride):
    N, H, W, C = x.shape
    xp = jnp.pad(x, ((0, 0), (1, 1), (1, 1), (0, 0)))
    Ho = (H - 1) // stride + 1
    Wo = (W - 1) // stride + 1
    patches = []
    for dh in range(3):
        for dw in range(3):
            patches.append(
                xp[:, dh:dh + stride * (Ho - 1) + 1:stride,
                      dw:dw + stride * (Wo - 1) + 1:stride, :])
    cols = jnp.concatenate(patches, axis=-1)
    return cols.reshape(N * Ho * Wo, 9 * C), Ho, Wo


def _bf16_round(v):
    # The Pallas kernels feed the MXU with bf16 operands (f32 accumulation);
    # the reference mirrors that rounding.
    return v.astype(jnp.bfloat16).astype(jnp.float32)


def _ref_mm(a, w):
    return jnp.dot(_bf16_round(a), _bf16_round(w))


def _ref_bn(y, g, b):
    mean = jnp.mean(y, axis=0, keepdims=True)
    var = jnp.mean((y - mean) ** 2, axis=0, keepdims=True)
    return (y - mean) / jnp.sqrt(var + EPS) * g.reshape(1, -1) + b.reshape(1, -1)


def ref_forward(x_nchw, p, stride):
    x = jnp.transpose(x_nchw, (0, 2, 3, 1)).astype(jnp.float32)
    N, H, W, Cin = x.shape
    Cp = p["w1"].shape[1]
    Cout = p["w3"].shape[1]
    o1 = jax.nn.relu(_ref_bn(_ref_mm(x.reshape(-1, Cin), p["w1"]), p["g1"], p["b1"]))
    o1 = o1.reshape(N, H, W, Cp)
    cols, Ho, Wo = im2col_3x3(o1, stride)
    o2 = jax.nn.relu(_ref_bn(_ref_mm(cols, p["w2"]), p["g2"], p["b2"]))
    if stride != 1 or Cin != Cout:
        xs = x[:, ::stride, ::stride, :].reshape(-1, Cin)
        res = _ref_bn(_ref_mm(xs, p["wd"]), p["gd"], p["bd"])
    else:
        res = x.reshape(-1, Cin)
    o3 = jax.nn.relu(_ref_bn(_ref_mm(o2, p["w3"]), p["g3"], p["b3"]) + res)
    return jnp.transpose(o3.reshape(N, Ho, Wo, Cout), (0, 3, 1, 2))


# ------------------------------- parameters ---------------------------------

def init_params(key, in_planes, planes, pr_channels):
    cout = 4 * planes  # expansion = 4
    ks = jax.random.split(key, 12)

    def conv_w(k, fan_in, fan_out):
        return jax.random.normal(k, (fan_in, fan_out), jnp.float32) * (2.0 / fan_in) ** 0.5

    def bn_params(kg, kb, c):
        g = 1.0 + 0.1 * jax.random.normal(kg, (c,), jnp.float32)
        b = 0.1 * jax.random.normal(kb, (c,), jnp.float32)
        return g, b

    p = {}
    p["w1"] = conv_w(ks[0], in_planes, pr_channels)            # 1x1: (Cin, Cp)
    p["g1"], p["b1"] = bn_params(ks[1], ks[2], pr_channels)
    p["w2"] = conv_w(ks[3], 9 * pr_channels, pr_channels)      # 3x3: (9*Cp, Cp), (kh,kw,C) order
    p["g2"], p["b2"] = bn_params(ks[4], ks[5], pr_channels)
    p["w3"] = conv_w(ks[6], pr_channels, cout)                 # 1x1: (Cp, 4*planes)
    p["g3"], p["b3"] = bn_params(ks[7], ks[8], cout)
    p["wd"] = conv_w(ks[9], in_planes, cout)                   # downsample 1x1
    p["gd"], p["bd"] = bn_params(ks[10], ks[11], cout)
    return p


# ---------------------------------- main -------------------------------------

def _run_case(key, *, n, in_planes, planes, pr_channels, stride, hw):
    kx, kp = jax.random.split(key)
    x = jax.random.normal(kx, (n, in_planes, hw, hw), jnp.float32)  # NCHW
    params = init_params(kp, in_planes, planes, pr_channels)

    fwd = jax.jit(functools.partial(bottleneck_forward, stride=stride))
    out = jax.block_until_ready(fwd(x, params))
    ref = jax.block_until_ready(ref_forward(x, params, stride))

    ho = (hw - 1) // stride + 1
    assert out.shape == (n, 4 * planes, ho, ho), out.shape
    err = float(jnp.max(jnp.abs(out - ref)))
    assert err < 2e-2, f"max abs err {err}"


if __name__ == "__main__":
    key = jax.random.PRNGKey(0)
    k1, k2 = jax.random.split(key)
    # Bottleneck(in_planes=4, planes=4, food=[8], index=0, stride=2):
    # strided, downsample branch active (conv3 + downsample fused kernel).
    _run_case(k1, n=2, in_planes=4, planes=4, pr_channels=8, stride=2, hw=16)
    # Identity-residual configuration (stride=1, in_planes == 4*planes).
    _run_case(k2, n=2, in_planes=16, planes=4, pr_channels=8, stride=1, hw=8)
    print("KERNEL_OK")
</pallas_src>

<mosaic_0001>
module attributes {stable_mosaic.version = 11 : i64} {
  func.func @_mm_bn_kernel(%arg0: i32, %arg1: i32, %arg2: memref<256x128xbf16, #tpu.memory_space<vmem>>, %arg3: memref<128x128xbf16, #tpu.memory_space<vmem>>, %arg4: memref<1x128xf32, #tpu.memory_space<vmem>>, %arg5: memref<1x128xf32, #tpu.memory_space<vmem>>, %arg6: memref<256x128xbf16, #tpu.memory_space<vmem>>, %arg7: memref<1x128xf32, #tpu.memory_space<vmem>>, %arg8: memref<1x128xf32, #tpu.memory_space<vmem>>, %arg9: memref<1x128xf32, #tpu.memory_space<vmem>>, %arg10: memref<1x128xf32, #tpu.memory_space<vmem>>) attributes {dimension_semantics = [#tpu.dimension_semantics<arbitrary>, #tpu.dimension_semantics<arbitrary>], iteration_bounds = array<i64: 2, 2>, scalar_prefetch = 0 : i64, scratch_operands = 4 : i64, tpu.core_type = #tpu.core_type<tc>, window_params = [{transform_indices = @transform_0, window_bounds = array<i64: 256, 128>}, {pipeline_mode = #tpu.pipeline_mode<synchronous>, transform_indices = @transform_1, window_bounds = array<i64: 128, 128>}, {pipeline_mode = #tpu.pipeline_mode<synchronous>, transform_indices = @transform_2, window_bounds = array<i64: 1, 128>}, {pipeline_mode = #tpu.pipeline_mode<synchronous>, transform_indices = @transform_3, window_bounds = array<i64: 1, 128>}, {transform_indices = @transform_4, window_bounds = array<i64: 256, 128>}]} {
    %c0 = arith.constant 0 : index
    %c0_0 = arith.constant 0 : index
    %0 = vector.load %arg2[%c0, %c0_0] : memref<256x128xbf16, #tpu.memory_space<vmem>>, vector<256x128xbf16>
    %c0_1 = arith.constant 0 : index
    %c0_2 = arith.constant 0 : index
    %1 = vector.load %arg3[%c0_1, %c0_2] : memref<128x128xbf16, #tpu.memory_space<vmem>>, vector<128x128xbf16>
    %cst = arith.constant dense<0.000000e+00> : vector<256x128xf32>
    %2 = tpu.matmul %0, %1, %cst {dimension_numbers = #tpu.dot_dimension_numbers<[1], [0], [0], [1], [0, 0, 1, 1], [], []>} : vector<256x128xbf16>, vector<128x128xbf16>, vector<256x128xf32> -> vector<256x128xf32>
    %c0_i32 = arith.constant 0 : i32
    %3 = arith.cmpi eq, %arg0, %c0_i32 : i32
    %c0_i32_3 = arith.constant 0 : i32
    %4 = arith.cmpi eq, %arg1, %c0_i32_3 : i32
    %5 = arith.andi %3, %4 : i1
    %6 = arith.extui %5 : i1 to i32
    %c0_i32_4 = arith.constant 0 : i32
    %7 = arith.cmpi ne, %6, %c0_i32_4 : i32
    scf.if %7 {
      %cst_11 = arith.constant 0.000000e+00 : f32
      %19 = vector.broadcast %cst_11 : f32 to vector<1x128xf32>
      %c0_12 = arith.constant 0 : index
      %c0_13 = arith.constant 0 : index
      %20 = vector.load %arg7[%c0_12, %c0_13] : memref<1x128xf32, #tpu.memory_space<vmem>>, vector<1x128xf32>
      tpu.vector_store %arg7[%c0_12, %c0_13], %19 {strides = array<i32>} : memref<1x128xf32, #tpu.memory_space<vmem>>, vector<1x128xf32>,
      %cst_14 = arith.constant 0.000000e+00 : f32
      %21 = vector.broadcast %cst_14 : f32 to vector<1x128xf32>
      %c0_15 = arith.constant 0 : index
      %c0_16 = arith.constant 0 : index
      %22 = vector.load %arg8[%c0_15, %c0_16] : memref<1x128xf32, #tpu.memory_space<vmem>>, vector<1x128xf32>
      tpu.vector_store %arg8[%c0_15, %c0_16], %21 {strides = array<i32>} : memref<1x128xf32, #tpu.memory_space<vmem>>, vector<1x128xf32>,
    } else {
    }
    %c0_i32_5 = arith.constant 0 : i32
    %8 = arith.cmpi eq, %arg0, %c0_i32_5 : i32
    %9 = arith.extui %8 : i1 to i32
    %c0_i32_6 = arith.constant 0 : i32
    %10 = arith.cmpi ne, %9, %c0_i32_6 : i32
    scf.if %10 {
      %c0_11 = arith.constant 0 : index
      %c0_12 = arith.constant 0 : index
      %19 = vector.load %arg7[%c0_11, %c0_12] : memref<1x128xf32, #tpu.memory_space<vmem>>, vector<1x128xf32>
      %cst_13 = arith.constant dense<0.000000e+00> : vector<128xf32>
      %20 = vector.multi_reduction <add>, %2, %cst_13 [0] : vector<256x128xf32> to vector<128xf32>
      %21 = vector.shape_cast %20 : vector<128xf32> to vector<1x128xf32>
      %22 = arith.addf %19, %21 : vector<1x128xf32>
      %c0_14 = arith.constant 0 : index
      %c0_15 = arith.constant 0 : index
      %23 = vector.load %arg7[%c0_14, %c0_15] : memref<1x128xf32, #tpu.memory_space<vmem>>, vector<1x128xf32>
      tpu.vector_store %arg7[%c0_14, %c0_15], %22 {strides = array<i32>} : memref<1x128xf32, #tpu.memory_space<vmem>>, vector<1x128xf32>,
      %c0_16 = arith.constant 0 : index
      %c0_17 = arith.constant 0 : index
      %24 = vector.load %arg8[%c0_16, %c0_17] : memref<1x128xf32, #tpu.memory_space<vmem>>, vector<1x128xf32>
      %25 = arith.mulf %2, %2 : vector<256x128xf32>
      %cst_18 = arith.constant dense<0.000000e+00> : vector<128xf32>
      %26 = vector.multi_reduction <add>, %25, %cst_18 [0] : vector<256x128xf32> to vector<128xf32>
      %27 = vector.shape_cast %26 : vector<128xf32> to vector<1x128xf32>
      %28 = arith.addf %24, %27 : vector<1x128xf32>
      %c0_19 = arith.constant 0 : index
      %c0_20 = arith.constant 0 : index
      %29 = vector.load %arg8[%c0_19, %c0_20] : memref<1x128xf32, #tpu.memory_space<vmem>>, vector<1x128xf32>
      tpu.vector_store %arg8[%c0_19, %c0_20], %28 {strides = array<i32>} : memref<1x128xf32, #tpu.memory_space<vmem>>, vector<1x128xf32>,
    } else {
    }
    %c1_i32 = arith.constant 1 : i32
    %11 = arith.cmpi eq, %arg0, %c1_i32 : i32
    %c0_i32_7 = arith.constant 0 : i32
    %12 = arith.cmpi eq, %arg1, %c0_i32_7 : i32
    %13 = arith.andi %11, %12 : i1
    %14 = arith.extui %13 : i1 to i32
    %c0_i32_8 = arith.constant 0 : i32
    %15 = arith.cmpi ne, %14, %c0_i32_8 : i32
    scf.if %15 {
      %c0_11 = arith.constant 0 : index
      %c0_12 = arith.constant 0 : index
      %19 = vector.load %arg7[%c0_11, %c0_12] : memref<1x128xf32, #tpu.memory_space<vmem>>, vector<1x128xf32>
      %cst_13 = arith.constant 0.001953125 : f32
      %20 = vector.broadcast %cst_13 : f32 to vector<1x128xf32>
      %21 = arith.mulf %19, %20 : vector<1x128xf32>
      %c0_14 = arith.constant 0 : index
      %c0_15 = arith.constant 0 : index
      %22 = vector.load %arg8[%c0_14, %c0_15] : memref<1x128xf32, #tpu.memory_space<vmem>>, vector<1x128xf32>
      %cst_16 = arith.constant 0.001953125 : f32
      %23 = vector.broadcast %cst_16 : f32 to vector<1x128xf32>
      %24 = arith.mulf %22, %23 : vector<1x128xf32>
      %25 = arith.mulf %21, %21 : vector<1x128xf32>
      %26 = arith.subf %24, %25 : vector<1x128xf32>
      %cst_17 = arith.constant 0.000000e+00 : f32
      %27 = vector.broadcast %cst_17 : f32 to vector<1x128xf32>
      %28 = arith.maximumf %26, %27 : vector<1x128xf32>
      %c0_18 = arith.constant 0 : index
      %c0_19 = arith.constant 0 : index
      %29 = vector.load %arg4[%c0_18, %c0_19] : memref<1x128xf32, #tpu.memory_space<vmem>>, vector<1x128xf32>
      %cst_20 = arith.constant 9.99999974E-6 : f32
      %30 = vector.broadcast %cst_20 : f32 to vector<1x128xf32>
      %31 = arith.addf %28, %30 : vector<1x128xf32>
      %32 = math.rsqrt %31 : vector<1x128xf32>
      %33 = arith.mulf %29, %32 : vector<1x128xf32>
      %c0_21 = arith.constant 0 : index
      %c0_22 = arith.constant 0 : index
      %34 = vector.load %arg9[%c0_21, %c0_22] : memref<1x128xf32, #tpu.memory_space<vmem>>, vector<1x128xf32>
      tpu.vector_store %arg9[%c0_21, %c0_22], %33 {strides = array<i32>} : memref<1x128xf32, #tpu.memory_space<vmem>>, vector<1x128xf32>,
      %c0_23 = arith.constant 0 : index
      %c0_24 = arith.constant 0 : index
      %35 = vector.load %arg5[%c0_23, %c0_24] : memref<1x128xf32, #tpu.memory_space<vmem>>, vector<1x128xf32>
      %36 = arith.mulf %21, %33 : vector<1x128xf32>
      %37 = arith.subf %35, %36 : vector<1x128xf32>
      %c0_25 = arith.constant 0 : index
      %c0_26 = arith.constant 0 : index
      %38 = vector.load %arg10[%c0_25, %c0_26] : memref<1x128xf32, #tpu.memory_space<vmem>>, vector<1x128xf32>
      tpu.vector_store %arg10[%c0_25, %c0_26], %37 {strides = array<i32>} : memref<1x128xf32, #tpu.memory_space<vmem>>, vector<1x128xf32>,
    } else {
    }
    %c1_i32_9 = arith.constant 1 : i32
    %16 = arith.cmpi eq, %arg0, %c1_i32_9 : i32
    %17 = arith.extui %16 : i1 to i32
    %c0_i32_10 = arith.constant 0 : i32
    %18 = arith.cmpi ne, %17, %c0_i32_10 : i32
    scf.if %18 {
      %c0_11 = arith.constant 0 : index
      %c0_12 = arith.constant 0 : index
      %19 = vector.load %arg9[%c0_11, %c0_12] : memref<1x128xf32, #tpu.memory_space<vmem>>, vector<1x128xf32>
      %20 = vector.broadcast %19 : vector<1x128xf32> to vector<256x128xf32>
      %21 = arith.mulf %2, %20 : vector<256x128xf32>
      %c0_13 = arith.constant 0 : index
      %c0_14 = arith.constant 0 : index
      %22 = vector.load %arg10[%c0_13, %c0_14] : memref<1x128xf32, #tpu.memory_space<vmem>>, vector<1x128xf32>
      %23 = vector.broadcast %22 : vector<1x128xf32> to vector<256x128xf32>
      %24 = arith.addf %21, %23 : vector<256x128xf32>
      %cst_15 = arith.constant 0.000000e+00 : f32
      %25 = vector.broadcast %cst_15 : f32 to vector<256x128xf32>
      %26 = arith.maximumf %24, %25 : vector<256x128xf32>
      %27 = arith.truncf %26 : vector<256x128xf32> to vector<256x128xbf16>
      %c0_16 = arith.constant 0 : index
      %c0_17 = arith.constant 0 : index
      %28 = vector.load %arg6[%c0_16, %c0_17] : memref<256x128xbf16, #tpu.memory_space<vmem>>, vector<256x128xbf16>
      tpu.vector_store %arg6[%c0_16, %c0_17], %27 {strides = array<i32>} : memref<256x128xbf16, #tpu.memory_space<vmem>>, vector<256x128xbf16>,
    } else {
    }
    return
  }
  func.func @transform_0(%arg0: i32, %arg1: i32) -> (i32, i32) {
    %c0_i32 = arith.constant 0 : i32
    %c0_i32_0 = arith.constant 0 : i32
    return %arg1, %c0_i32 : i32, i32
  }
  func.func @transform_1(%arg0: i32, %arg1: i32) -> (i32, i32) {
    %c0_i32 = arith.constant 0 : i32
    %c0_i32_0 = arith.constant 0 : i32
    %c0_i32_1 = arith.constant 0 : i32
    return %c0_i32, %c0_i32_0 : i32, i32
  }
  func.func @transform_2(%arg0: i32, %arg1: i32) -> (i32, i32) {
    %c0_i32 = arith.constant 0 : i32
    %c0_i32_0 = arith.constant 0 : i32
    %c0_i32_1 = arith.constant 0 : i32
    return %c0_i32, %c0_i32_0 : i32, i32
  }
  func.func @transform_3(%arg0: i32, %arg1: i32) -> (i32, i32) {
    %c0_i32 = arith.constant 0 : i32
    %c0_i32_0 = arith.constant 0 : i32
    %c0_i32_1 = arith.constant 0 : i32
    return %c0_i32, %c0_i32_0 : i32, i32
  }
  func.func @transform_4(%arg0: i32, %arg1: i32) -> (i32, i32) {
    %0 = arith.muli %arg0, %arg1 : i32
    %c0_i32 = arith.constant 0 : i32
    %c0_i32_0 = arith.constant 0 : i32
    return %0, %c0_i32 : i32, i32
  }
}

module attributes {stable_mosaic.version = 11 : i64} {
  func.func @_conv3x3_bn_kernel(%arg0: i32, %arg1: i32, %arg2: memref<4x1x88x128xbf16, #tpu.memory_space<vmem>>, %arg3: memref<9x128x128xbf16, #tpu.memory_space<vmem>>, %arg4: memref<1x128xf32, #tpu.memory_space<vmem>>, %arg5: memref<1x128xf32, #tpu.memory_space<vmem>>, %arg6: memref<72x1xf32, #tpu.memory_space<vmem>>, %arg7: memref<1x72x128xbf16, #tpu.memory_space<vmem>>, %arg8: memref<1x128xf32, #tpu.memory_space<vmem>>, %arg9: memref<1x128xf32, #tpu.memory_space<vmem>>, %arg10: memref<1x128xf32, #tpu.memory_space<vmem>>, %arg11: memref<1x128xf32, #tpu.memory_space<vmem>>) attributes {dimension_semantics = [#tpu.dimension_semantics<arbitrary>, #tpu.dimension_semantics<arbitrary>], iteration_bounds = array<i64: 2, 2>, scalar_prefetch = 0 : i64, scratch_operands = 4 : i64, tpu.core_type = #tpu.core_type<tc>, window_params = [{transform_indices = @transform_0, window_bounds = array<i64: 4, 1, 88, 128>}, {pipeline_mode = #tpu.pipeline_mode<synchronous>, transform_indices = @transform_1, window_bounds = array<i64: 9, 128, 128>}, {pipeline_mode = #tpu.pipeline_mode<synchronous>, transform_indices = @transform_2, window_bounds = array<i64: 1, 128>}, {pipeline_mode = #tpu.pipeline_mode<synchronous>, transform_indices = @transform_3, window_bounds = array<i64: 1, 128>}, {pipeline_mode = #tpu.pipeline_mode<synchronous>, transform_indices = @transform_4, window_bounds = array<i64: 72, 1>}, {transform_indices = @transform_5, window_bounds = array<i64: 1, 72, 128>}]} {
    %cst = arith.constant 0.000000e+00 : f32
    %0 = vector.broadcast %cst : f32 to vector<72x128xf32>
    %c0 = arith.constant 0 : index
    %c0_0 = arith.constant 0 : index
    %c0_1 = arith.constant 0 : index
    %c0_2 = arith.constant 0 : index
    %1 = vector.load %arg2[%c0, %c0_0, %c0_1, %c0_2] : memref<4x1x88x128xbf16, #tpu.memory_space<vmem>>, vector<1x1x72x128xbf16>
    %2 = vector.shape_cast %1 : vector<1x1x72x128xbf16> to vector<72x128xbf16>
    %c0_3 = arith.constant 0 : index
    %c0_4 = arith.constant 0 : index
    %c0_5 = arith.constant 0 : index
    %3 = vector.load %arg3[%c0_3, %c0_4, %c0_5] : memref<9x128x128xbf16, #tpu.memory_space<vmem>>, vector<1x128x128xbf16>
    %4 = vector.shape_cast %3 : vector<1x128x128xbf16> to vector<128x128xbf16>
    %cst_6 = arith.constant dense<0.000000e+00> : vector<72x128xf32>
    %5 = tpu.matmul %2, %4, %cst_6 {dimension_numbers = #tpu.dot_dimension_numbers<[1], [0], [0], [1], [0, 0, 1, 1], [], []>} : vector<72x128xbf16>, vector<128x128xbf16>, vector<72x128xf32> -> vector<72x128xf32>
    %6 = arith.addf %0, %5 : vector<72x128xf32>
    %c1 = arith.constant 1 : index
    %c0_7 = arith.constant 0 : index
    %c0_8 = arith.constant 0 : index
    %c0_9 = arith.constant 0 : index
    %7 = vector.load %arg2[%c1, %c0_7, %c0_8, %c0_9] : memref<4x1x88x128xbf16, #tpu.memory_space<vmem>>, vector<1x1x72x128xbf16>
    %8 = vector.shape_cast %7 : vector<1x1x72x128xbf16> to vector<72x128xbf16>
    %c1_10 = arith.constant 1 : index
    %c0_11 = arith.constant 0 : index
    %c0_12 = arith.constant 0 : index
    %9 = vector.load %arg3[%c1_10, %c0_11, %c0_12] : memref<9x128x128xbf16, #tpu.memory_space<vmem>>, vector<1x128x128xbf16>
    %10 = vector.shape_cast %9 : vector<1x128x128xbf16> to vector<128x128xbf16>
    %cst_13 = arith.constant dense<0.000000e+00> : vector<72x128xf32>
    %11 = tpu.matmul %8, %10, %cst_13 {dimension_numbers = #tpu.dot_dimension_numbers<[1], [0], [0], [1], [0, 0, 1, 1], [], []>} : vector<72x128xbf16>, vector<128x128xbf16>, vector<72x128xf32> -> vector<72x128xf32>
    %12 = arith.addf %6, %11 : vector<72x128xf32>
    %c0_14 = arith.constant 0 : index
    %c0_15 = arith.constant 0 : index
    %c1_16 = arith.constant 1 : index
    %c0_17 = arith.constant 0 : index
    %13 = vector.load %arg2[%c0_14, %c0_15, %c1_16, %c0_17] : memref<4x1x88x128xbf16, #tpu.memory_space<vmem>>, vector<1x1x72x128xbf16>
    %14 = vector.shape_cast %13 : vector<1x1x72x128xbf16> to vector<72x128xbf16>
    %c2 = arith.constant 2 : index
    %c0_18 = arith.constant 0 : index
    %c0_19 = arith.constant 0 : index
    %15 = vector.load %arg3[%c2, %c0_18, %c0_19] : memref<9x128x128xbf16, #tpu.memory_space<vmem>>, vector<1x128x128xbf16>
    %16 = vector.shape_cast %15 : vector<1x128x128xbf16> to vector<128x128xbf16>
    %cst_20 = arith.constant dense<0.000000e+00> : vector<72x128xf32>
    %17 = tpu.matmul %14, %16, %cst_20 {dimension_numbers = #tpu.dot_dimension_numbers<[1], [0], [0], [1], [0, 0, 1, 1], [], []>} : vector<72x128xbf16>, vector<128x128xbf16>, vector<72x128xf32> -> vector<72x128xf32>
    %18 = arith.addf %12, %17 : vector<72x128xf32>
    %c2_21 = arith.constant 2 : index
    %c0_22 = arith.constant 0 : index
    %c0_23 = arith.constant 0 : index
    %c0_24 = arith.constant 0 : index
    %19 = vector.load %arg2[%c2_21, %c0_22, %c0_23, %c0_24] : memref<4x1x88x128xbf16, #tpu.memory_space<vmem>>, vector<1x1x72x128xbf16>
    %20 = vector.shape_cast %19 : vector<1x1x72x128xbf16> to vector<72x128xbf16>
    %c3 = arith.constant 3 : index
    %c0_25 = arith.constant 0 : index
    %c0_26 = arith.constant 0 : index
    %21 = vector.load %arg3[%c3, %c0_25, %c0_26] : memref<9x128x128xbf16, #tpu.memory_space<vmem>>, vector<1x128x128xbf16>
    %22 = vector.shape_cast %21 : vector<1x128x128xbf16> to vector<128x128xbf16>
    %cst_27 = arith.constant dense<0.000000e+00> : vector<72x128xf32>
    %23 = tpu.matmul %20, %22, %cst_27 {dimension_numbers = #tpu.dot_dimension_numbers<[1], [0], [0], [1], [0, 0, 1, 1], [], []>} : vector<72x128xbf16>, vector<128x128xbf16>, vector<72x128xf32> -> vector<72x128xf32>
    %24 = arith.addf %18, %23 : vector<72x128xf32>
    %c3_28 = arith.constant 3 : index
    %c0_29 = arith.constant 0 : index
    %c0_30 = arith.constant 0 : index
    %c0_31 = arith.constant 0 : index
    %25 = vector.load %arg2[%c3_28, %c0_29, %c0_30, %c0_31] : memref<4x1x88x128xbf16, #tpu.memory_space<vmem>>, vector<1x1x72x128xbf16>
    %26 = vector.shape_cast %25 : vector<1x1x72x128xbf16> to vector<72x128xbf16>
    %c4 = arith.constant 4 : index
    %c0_32 = arith.constant 0 : index
    %c0_33 = arith.constant 0 : index
    %27 = vector.load %arg3[%c4, %c0_32, %c0_33] : memref<9x128x128xbf16, #tpu.memory_space<vmem>>, vector<1x128x128xbf16>
    %28 = vector.shape_cast %27 : vector<1x128x128xbf16> to vector<128x128xbf16>
    %cst_34 = arith.constant dense<0.000000e+00> : vector<72x128xf32>
    %29 = tpu.matmul %26, %28, %cst_34 {dimension_numbers = #tpu.dot_dimension_numbers<[1], [0], [0], [1], [0, 0, 1, 1], [], []>} : vector<72x128xbf16>, vector<128x128xbf16>, vector<72x128xf32> -> vector<72x128xf32>
    %30 = arith.addf %24, %29 : vector<72x128xf32>
    %c2_35 = arith.constant 2 : index
    %c0_36 = arith.constant 0 : index
    %c1_37 = arith.constant 1 : index
    %c0_38 = arith.constant 0 : index
    %31 = vector.load %arg2[%c2_35, %c0_36, %c1_37, %c0_38] : memref<4x1x88x128xbf16, #tpu.memory_space<vmem>>, vector<1x1x72x128xbf16>
    %32 = vector.shape_cast %31 : vector<1x1x72x128xbf16> to vector<72x128xbf16>
    %c5 = arith.constant 5 : index
    %c0_39 = arith.constant 0 : index
    %c0_40 = arith.constant 0 : index
    %33 = vector.load %arg3[%c5, %c0_39, %c0_40] : memref<9x128x128xbf16, #tpu.memory_space<vmem>>, vector<1x128x128xbf16>
    %34 = vector.shape_cast %33 : vector<1x128x128xbf16> to vector<128x128xbf16>
    %cst_41 = arith.constant dense<0.000000e+00> : vector<72x128xf32>
    %35 = tpu.matmul %32, %34, %cst_41 {dimension_numbers = #tpu.dot_dimension_numbers<[1], [0], [0], [1], [0, 0, 1, 1], [], []>} : vector<72x128xbf16>, vector<128x128xbf16>, vector<72x128xf32> -> vector<72x128xf32>
    %36 = arith.addf %30, %35 : vector<72x128xf32>
    %c0_42 = arith.constant 0 : index
    %c0_43 = arith.constant 0 : index
    %c9 = arith.constant 9 : index
    %c0_44 = arith.constant 0 : index
    %37 = vector.load %arg2[%c0_42, %c0_43, %c9, %c0_44] : memref<4x1x88x128xbf16, #tpu.memory_space<vmem>>, vector<1x1x72x128xbf16>
    %38 = vector.shape_cast %37 : vector<1x1x72x128xbf16> to vector<72x128xbf16>
    %c6 = arith.constant 6 : index
    %c0_45 = arith.constant 0 : index
    %c0_46 = arith.constant 0 : index
    %39 = vector.load %arg3[%c6, %c0_45, %c0_46] : memref<9x128x128xbf16, #tpu.memory_space<vmem>>, vector<1x128x128xbf16>
    %40 = vector.shape_cast %39 : vector<1x128x128xbf16> to vector<128x128xbf16>
    %cst_47 = arith.constant dense<0.000000e+00> : vector<72x128xf32>
    %41 = tpu.matmul %38, %40, %cst_47 {dimension_numbers = #tpu.dot_dimension_numbers<[1], [0], [0], [1], [0, 0, 1, 1], [], []>} : vector<72x128xbf16>, vector<128x128xbf16>, vector<72x128xf32> -> vector<72x128xf32>
    %42 = arith.addf %36, %41 : vector<72x128xf32>
    %c1_48 = arith.constant 1 : index
    %c0_49 = arith.constant 0 : index
    %c9_50 = arith.constant 9 : index
    %c0_51 = arith.constant 0 : index
    %43 = vector.load %arg2[%c1_48, %c0_49, %c9_50, %c0_51] : memref<4x1x88x128xbf16, #tpu.memory_space<vmem>>, vector<1x1x72x128xbf16>
    %44 = vector.shape_cast %43 : vector<1x1x72x128xbf16> to vector<72x128xbf16>
    %c7 = arith.constant 7 : index
    %c0_52 = arith.constant 0 : index
    %c0_53 = arith.constant 0 : index
    %45 = vector.load %arg3[%c7, %c0_52, %c0_53] : memref<9x128x128xbf16, #tpu.memory_space<vmem>>, vector<1x128x128xbf16>
    %46 = vector.shape_cast %45 : vector<1x128x128xbf16> to vector<128x128xbf16>
    %cst_54 = arith.constant dense<0.000000e+00> : vector<72x128xf32>
    %47 = tpu.matmul %44, %46, %cst_54 {dimension_numbers = #tpu.dot_dimension_numbers<[1], [0], [0], [1], [0, 0, 1, 1], [], []>} : vector<72x128xbf16>, vector<128x128xbf16>, vector<72x128xf32> -> vector<72x128xf32>
    %48 = arith.addf %42, %47 : vector<72x128xf32>
    %c0_55 = arith.constant 0 : index
    %c0_56 = arith.constant 0 : index
    %c10 = arith.constant 10 : index
    %c0_57 = arith.constant 0 : index
    %49 = vector.load %arg2[%c0_55, %c0_56, %c10, %c0_57] : memref<4x1x88x128xbf16, #tpu.memory_space<vmem>>, vector<1x1x72x128xbf16>
    %50 = vector.shape_cast %49 : vector<1x1x72x128xbf16> to vector<72x128xbf16>
    %c8 = arith.constant 8 : index
    %c0_58 = arith.constant 0 : index
    %c0_59 = arith.constant 0 : index
    %51 = vector.load %arg3[%c8, %c0_58, %c0_59] : memref<9x128x128xbf16, #tpu.memory_space<vmem>>, vector<1x128x128xbf16>
    %52 = vector.shape_cast %51 : vector<1x128x128xbf16> to vector<128x128xbf16>
    %cst_60 = arith.constant dense<0.000000e+00> : vector<72x128xf32>
    %53 = tpu.matmul %50, %52, %cst_60 {dimension_numbers = #tpu.dot_dimension_numbers<[1], [0], [0], [1], [0, 0, 1, 1], [], []>} : vector<72x128xbf16>, vector<128x128xbf16>, vector<72x128xf32> -> vector<72x128xf32>
    %54 = arith.addf %48, %53 : vector<72x128xf32>
    %c0_i32 = arith.constant 0 : i32
    %55 = arith.cmpi eq, %arg0, %c0_i32 : i32
    %c0_i32_61 = arith.constant 0 : i32
    %56 = arith.cmpi eq, %arg1, %c0_i32_61 : i32
    %57 = arith.andi %55, %56 : i1
    %58 = arith.extui %57 : i1 to i32
    %c0_i32_62 = arith.constant 0 : i32
    %59 = arith.cmpi ne, %58, %c0_i32_62 : i32
    scf.if %59 {
      %cst_69 = arith.constant 0.000000e+00 : f32
      %71 = vector.broadcast %cst_69 : f32 to vector<1x128xf32>
      %c0_70 = arith.constant 0 : index
      %c0_71 = arith.constant 0 : index
      %72 = vector.load %arg8[%c0_70, %c0_71] : memref<1x128xf32, #tpu.memory_space<vmem>>, vector<1x128xf32>
      tpu.vector_store %arg8[%c0_70, %c0_71], %71 {strides = array<i32>} : memref<1x128xf32, #tpu.memory_space<vmem>>, vector<1x128xf32>,
      %cst_72 = arith.constant 0.000000e+00 : f32
      %73 = vector.broadcast %cst_72 : f32 to vector<1x128xf32>
      %c0_73 = arith.constant 0 : index
      %c0_74 = arith.constant 0 : index
      %74 = vector.load %arg9[%c0_73, %c0_74] : memref<1x128xf32, #tpu.memory_space<vmem>>, vector<1x128xf32>
      tpu.vector_store %arg9[%c0_73, %c0_74], %73 {strides = array<i32>} : memref<1x128xf32, #tpu.memory_space<vmem>>, vector<1x128xf32>,
    } else {
    }
    %c0_i32_63 = arith.constant 0 : i32
    %60 = arith.cmpi eq, %arg0, %c0_i32_63 : i32
    %61 = arith.extui %60 : i1 to i32
    %c0_i32_64 = arith.constant 0 : i32
    %62 = arith.cmpi ne, %61, %c0_i32_64 : i32
    scf.if %62 {
      %c0_69 = arith.constant 0 : index
      %c0_70 = arith.constant 0 : index
      %71 = vector.load %arg6[%c0_69, %c0_70] : memref<72x1xf32, #tpu.memory_space<vmem>>, vector<72x1xf32>
      %72 = vector.broadcast %71 : vector<72x1xf32> to vector<72x128xf32>
      %73 = arith.mulf %54, %72 : vector<72x128xf32>
      %c0_71 = arith.constant 0 : index
      %c0_72 = arith.constant 0 : index
      %74 = vector.load %arg8[%c0_71, %c0_72] : memref<1x128xf32, #tpu.memory_space<vmem>>, vector<1x128xf32>
      %cst_73 = arith.constant dense<0.000000e+00> : vector<128xf32>
      %75 = vector.multi_reduction <add>, %73, %cst_73 [0] : vector<72x128xf32> to vector<128xf32>
      %76 = vector.shape_cast %75 : vector<128xf32> to vector<1x128xf32>
      %77 = arith.addf %74, %76 : vector<1x128xf32>
      %c0_74 = arith.constant 0 : index
      %c0_75 = arith.constant 0 : index
      %78 = vector.load %arg8[%c0_74, %c0_75] : memref<1x128xf32, #tpu.memory_space<vmem>>, vector<1x128xf32>
      tpu.vector_store %arg8[%c0_74, %c0_75], %77 {strides = array<i32>} : memref<1x128xf32, #tpu.memory_space<vmem>>, vector<1x128xf32>,
      %c0_76 = arith.constant 0 : index
      %c0_77 = arith.constant 0 : index
      %79 = vector.load %arg9[%c0_76, %c0_77] : memref<1x128xf32, #tpu.memory_space<vmem>>, vector<1x128xf32>
      %80 = arith.mulf %73, %54 : vector<72x128xf32>
      %cst_78 = arith.constant dense<0.000000e+00> : vector<128xf32>
      %81 = vector.multi_reduction <add>, %80, %cst_78 [0] : vector<72x128xf32> to vector<128xf32>
      %82 = vector.shape_cast %81 : vector<128xf32> to vector<1x128xf32>
      %83 = arith.addf %79, %82 : vector<1x128xf32>
      %c0_79 = arith.constant 0 : index
      %c0_80 = arith.constant 0 : index
      %84 = vector.load %arg9[%c0_79, %c0_80] : memref<1x128xf32, #tpu.memory_space<vmem>>, vector<1x128xf32>
      tpu.vector_store %arg9[%c0_79, %c0_80], %83 {strides = array<i32>} : memref<1x128xf32, #tpu.memory_space<vmem>>, vector<1x128xf32>,
    } else {
    }
    %c1_i32 = arith.constant 1 : i32
    %63 = arith.cmpi eq, %arg0, %c1_i32 : i32
    %c0_i32_65 = arith.constant 0 : i32
    %64 = arith.cmpi eq, %arg1, %c0_i32_65 : i32
    %65 = arith.andi %63, %64 : i1
    %66 = arith.extui %65 : i1 to i32
    %c0_i32_66 = arith.constant 0 : i32
    %67 = arith.cmpi ne, %66, %c0_i32_66 : i32
    scf.if %67 {
      %c0_69 = arith.constant 0 : index
      %c0_70 = arith.constant 0 : index
      %71 = vector.load %arg8[%c0_69, %c0_70] : memref<1x128xf32, #tpu.memory_space<vmem>>, vector<1x128xf32>
      %cst_71 = arith.constant 7.812500e-03 : f32
      %72 = vector.broadcast %cst_71 : f32 to vector<1x128xf32>
      %73 = arith.mulf %71, %72 : vector<1x128xf32>
      %c0_72 = arith.constant 0 : index
      %c0_73 = arith.constant 0 : index
      %74 = vector.load %arg9[%c0_72, %c0_73] : memref<1x128xf32, #tpu.memory_space<vmem>>, vector<1x128xf32>
      %cst_74 = arith.constant 7.812500e-03 : f32
      %75 = vector.broadcast %cst_74 : f32 to vector<1x128xf32>
      %76 = arith.mulf %74, %75 : vector<1x128xf32>
      %77 = arith.mulf %73, %73 : vector<1x128xf32>
      %78 = arith.subf %76, %77 : vector<1x128xf32>
      %cst_75 = arith.constant 0.000000e+00 : f32
      %79 = vector.broadcast %cst_75 : f32 to vector<1x128xf32>
      %80 = arith.maximumf %78, %79 : vector<1x128xf32>
      %c0_76 = arith.constant 0 : index
      %c0_77 = arith.constant 0 : index
      %81 = vector.load %arg4[%c0_76, %c0_77] : memref<1x128xf32, #tpu.memory_space<vmem>>, vector<1x128xf32>
      %cst_78 = arith.constant 9.99999974E-6 : f32
      %82 = vector.broadcast %cst_78 : f32 to vector<1x128xf32>
      %83 = arith.addf %80, %82 : vector<1x128xf32>
      %84 = math.rsqrt %83 : vector<1x128xf32>
      %85 = arith.mulf %81, %84 : vector<1x128xf32>
      %c0_79 = arith.constant 0 : index
      %c0_80 = arith.constant 0 : index
      %86 = vector.load %arg10[%c0_79, %c0_80] : memref<1x128xf32, #tpu.memory_space<vmem>>, vector<1x128xf32>
      tpu.vector_store %arg10[%c0_79, %c0_80], %85 {strides = array<i32>} : memref<1x128xf32, #tpu.memory_space<vmem>>, vector<1x128xf32>,
      %c0_81 = arith.constant 0 : index
      %c0_82 = arith.constant 0 : index
      %87 = vector.load %arg5[%c0_81, %c0_82] : memref<1x128xf32, #tpu.memory_space<vmem>>, vector<1x128xf32>
      %88 = arith.mulf %73, %85 : vector<1x128xf32>
      %89 = arith.subf %87, %88 : vector<1x128xf32>
      %c0_83 = arith.constant 0 : index
      %c0_84 = arith.constant 0 : index
      %90 = vector.load %arg11[%c0_83, %c0_84] : memref<1x128xf32, #tpu.memory_space<vmem>>, vector<1x128xf32>
      tpu.vector_store %arg11[%c0_83, %c0_84], %89 {strides = array<i32>} : memref<1x128xf32, #tpu.memory_space<vmem>>, vector<1x128xf32>,
    } else {
    }
    %c1_i32_67 = arith.constant 1 : i32
    %68 = arith.cmpi eq, %arg0, %c1_i32_67 : i32
    %69 = arith.extui %68 : i1 to i32
    %c0_i32_68 = arith.constant 0 : i32
    %70 = arith.cmpi ne, %69, %c0_i32_68 : i32
    scf.if %70 {
      %c0_69 = arith.constant 0 : index
      %c0_70 = arith.constant 0 : index
      %71 = vector.load %arg10[%c0_69, %c0_70] : memref<1x128xf32, #tpu.memory_space<vmem>>, vector<1x128xf32>
      %72 = vector.broadcast %71 : vector<1x128xf32> to vector<72x128xf32>
      %73 = arith.mulf %54, %72 : vector<72x128xf32>
      %c0_71 = arith.constant 0 : index
      %c0_72 = arith.constant 0 : index
      %74 = vector.load %arg11[%c0_71, %c0_72] : memref<1x128xf32, #tpu.memory_space<vmem>>, vector<1x128xf32>
      %75 = vector.broadcast %74 : vector<1x128xf32> to vector<72x128xf32>
      %76 = arith.addf %73, %75 : vector<72x128xf32>
      %cst_73 = arith.constant 0.000000e+00 : f32
      %77 = vector.broadcast %cst_73 : f32 to vector<72x128xf32>
      %78 = arith.maximumf %76, %77 : vector<72x128xf32>
      %79 = arith.truncf %78 : vector<72x128xf32> to vector<72x128xbf16>
      %c0_74 = arith.constant 0 : index
      %c0_75 = arith.constant 0 : index
      %c0_76 = arith.constant 0 : index
      %80 = vector.load %arg7[%c0_74, %c0_75, %c0_76] : memref<1x72x128xbf16, #tpu.memory_space<vmem>>, vector<1x72x128xbf16>
      %81 = vector.shape_cast %80 : vector<1x72x128xbf16> to vector<72x128xbf16>
      %82 = vector.shape_cast %79 : vector<72x128xbf16> to vector<1x72x128xbf16>
      tpu.vector_store %arg7[%c0_74, %c0_75, %c0_76], %82 {strides = array<i32>} : memref<1x72x128xbf16, #tpu.memory_space<vmem>>, vector<1x72x128xbf16>,
    } else {
    }
    return
  }
  func.func @transform_0(%arg0: i32, %arg1: i32) -> (i32, i32, i32, i32) {
    %c0_i32 = arith.constant 0 : i32
    %c0_i32_0 = arith.constant 0 : i32
    %c0_i32_1 = arith.constant 0 : i32
    %c0_i32_2 = arith.constant 0 : i32
    return %c0_i32, %arg1, %c0_i32_0, %c0_i32_1 : i32, i32, i32, i32
  }
  func.func @transform_1(%arg0: i32, %arg1: i32) -> (i32, i32, i32) {
    %c0_i32 = arith.constant 0 : i32
    %c0_i32_0 = arith.constant 0 : i32
    %c0_i32_1 = arith.constant 0 : i32
    %c0_i32_2 = arith.constant 0 : i32
    return %c0_i32, %c0_i32_0, %c0_i32_1 : i32, i32, i32
  }
  func.func @transform_2(%arg0: i32, %arg1: i32) -> (i32, i32) {
    %c0_i32 = arith.constant 0 : i32
    %c0_i32_0 = arith.constant 0 : i32
    %c0_i32_1 = arith.constant 0 : i32
    return %c0_i32, %c0_i32_0 : i32, i32
  }
  func.func @transform_3(%arg0: i32, %arg1: i32) -> (i32, i32) {
    %c0_i32 = arith.constant 0 : i32
    %c0_i32_0 = arith.constant 0 : i32
    %c0_i32_1 = arith.constant 0 : i32
    return %c0_i32, %c0_i32_0 : i32, i32
  }
  func.func @transform_4(%arg0: i32, %arg1: i32) -> (i32, i32) {
    %c0_i32 = arith.constant 0 : i32
    %c0_i32_0 = arith.constant 0 : i32
    %c0_i32_1 = arith.constant 0 : i32
    return %c0_i32, %c0_i32_0 : i32, i32
  }
  func.func @transform_5(%arg0: i32, %arg1: i32) -> (i32, i32, i32) {
    %0 = arith.muli %arg0, %arg1 : i32
    %c0_i32 = arith.constant 0 : i32
    %c0_i32_0 = arith.constant 0 : i32
    %c0_i32_1 = arith.constant 0 : i32
    return %0, %c0_i32, %c0_i32_0 : i32, i32, i32
  }
}

module attributes {stable_mosaic.version = 11 : i64} {
  func.func @_mm_bn_ds_kernel(%arg0: i32, %arg1: i32, %arg2: memref<128x128xbf16, #tpu.memory_space<vmem>>, %arg3: memref<128x128xbf16, #tpu.memory_space<vmem>>, %arg4: memref<1x128xf32, #tpu.memory_space<vmem>>, %arg5: memref<1x128xf32, #tpu.memory_space<vmem>>, %arg6: memref<128x128xbf16, #tpu.memory_space<vmem>>, %arg7: memref<128x128xbf16, #tpu.memory_space<vmem>>, %arg8: memref<1x128xf32, #tpu.memory_space<vmem>>, %arg9: memref<1x128xf32, #tpu.memory_space<vmem>>, %arg10: memref<128x128xf32, #tpu.memory_space<vmem>>, %arg11: memref<1x128xf32, #tpu.memory_space<vmem>>, %arg12: memref<1x128xf32, #tpu.memory_space<vmem>>, %arg13: memref<1x128xf32, #tpu.memory_space<vmem>>, %arg14: memref<1x128xf32, #tpu.memory_space<vmem>>, %arg15: memref<1x128xf32, #tpu.memory_space<vmem>>, %arg16: memref<1x128xf32, #tpu.memory_space<vmem>>, %arg17: memref<1x128xf32, #tpu.memory_space<vmem>>, %arg18: memref<1x128xf32, #tpu.memory_space<vmem>>) attributes {dimension_semantics = [#tpu.dimension_semantics<arbitrary>, #tpu.dimension_semantics<arbitrary>], iteration_bounds = array<i64: 2, 1>, scalar_prefetch = 0 : i64, scratch_operands = 8 : i64, tpu.core_type = #tpu.core_type<tc>, window_params = [{transform_indices = @transform_0, window_bounds = array<i64: 128, 128>}, {pipeline_mode = #tpu.pipeline_mode<synchronous>, transform_indices = @transform_1, window_bounds = array<i64: 128, 128>}, {pipeline_mode = #tpu.pipeline_mode<synchronous>, transform_indices = @transform_2, window_bounds = array<i64: 1, 128>}, {pipeline_mode = #tpu.pipeline_mode<synchronous>, transform_indices = @transform_3, window_bounds = array<i64: 1, 128>}, {transform_indices = @transform_4, window_bounds = array<i64: 128, 128>}, {pipeline_mode = #tpu.pipeline_mode<synchronous>, transform_indices = @transform_5, window_bounds = array<i64: 128, 128>}, {pipeline_mode = #tpu.pipeline_mode<synchronous>, transform_indices = @transform_6, window_bounds = array<i64: 1, 128>}, {pipeline_mode = #tpu.pipeline_mode<synchronous>, transform_indices = @transform_7, window_bounds = array<i64: 1, 128>}, {transform_indices = @transform_8, window_bounds = array<i64: 128, 128>}]} {
    %c0 = arith.constant 0 : index
    %c0_0 = arith.constant 0 : index
    %0 = vector.load %arg2[%c0, %c0_0] : memref<128x128xbf16, #tpu.memory_space<vmem>>, vector<128x128xbf16>
    %c0_1 = arith.constant 0 : index
    %c0_2 = arith.constant 0 : index
    %1 = vector.load %arg3[%c0_1, %c0_2] : memref<128x128xbf16, #tpu.memory_space<vmem>>, vector<128x128xbf16>
    %cst = arith.constant dense<0.000000e+00> : vector<128x128xf32>
    %2 = tpu.matmul %0, %1, %cst {dimension_numbers = #tpu.dot_dimension_numbers<[1], [0], [0], [1], [0, 0, 1, 1], [], []>} : vector<128x128xbf16>, vector<128x128xbf16>, vector<128x128xf32> -> vector<128x128xf32>
    %c0_3 = arith.constant 0 : index
    %c0_4 = arith.constant 0 : index
    %3 = vector.load %arg6[%c0_3, %c0_4] : memref<128x128xbf16, #tpu.memory_space<vmem>>, vector<128x128xbf16>
    %c0_5 = arith.constant 0 : index
    %c0_6 = arith.constant 0 : index
    %4 = vector.load %arg7[%c0_5, %c0_6] : memref<128x128xbf16, #tpu.memory_space<vmem>>, vector<128x128xbf16>
    %cst_7 = arith.constant dense<0.000000e+00> : vector<128x128xf32>
    %5 = tpu.matmul %3, %4, %cst_7 {dimension_numbers = #tpu.dot_dimension_numbers<[1], [0], [0], [1], [0, 0, 1, 1], [], []>} : vector<128x128xbf16>, vector<128x128xbf16>, vector<128x128xf32> -> vector<128x128xf32>
    %c0_i32 = arith.constant 0 : i32
    %6 = arith.cmpi eq, %arg0, %c0_i32 : i32
    %c0_i32_8 = arith.constant 0 : i32
    %7 = arith.cmpi eq, %arg1, %c0_i32_8 : i32
    %8 = arith.andi %6, %7 : i1
    %9 = arith.extui %8 : i1 to i32
    %c0_i32_9 = arith.constant 0 : i32
    %10 = arith.cmpi ne, %9, %c0_i32_9 : i32
    scf.if %10 {
      %cst_16 = arith.constant 0.000000e+00 : f32
      %22 = vector.broadcast %cst_16 : f32 to vector<1x128xf32>
      %c0_17 = arith.constant 0 : index
      %c0_18 = arith.constant 0 : index
      %23 = vector.load %arg11[%c0_17, %c0_18] : memref<1x128xf32, #tpu.memory_space<vmem>>, vector<1x128xf32>
      tpu.vector_store %arg11[%c0_17, %c0_18], %22 {strides = array<i32>} : memref<1x128xf32, #tpu.memory_space<vmem>>, vector<1x128xf32>,
      %cst_19 = arith.constant 0.000000e+00 : f32
      %24 = vector.broadcast %cst_19 : f32 to vector<1x128xf32>
      %c0_20 = arith.constant 0 : index
      %c0_21 = arith.constant 0 : index
      %25 = vector.load %arg12[%c0_20, %c0_21] : memref<1x128xf32, #tpu.memory_space<vmem>>, vector<1x128xf32>
      tpu.vector_store %arg12[%c0_20, %c0_21], %24 {strides = array<i32>} : memref<1x128xf32, #tpu.memory_space<vmem>>, vector<1x128xf32>,
      %cst_22 = arith.constant 0.000000e+00 : f32
      %26 = vector.broadcast %cst_22 : f32 to vector<1x128xf32>
      %c0_23 = arith.constant 0 : index
      %c0_24 = arith.constant 0 : index
      %27 = vector.load %arg15[%c0_23, %c0_24] : memref<1x128xf32, #tpu.memory_space<vmem>>, vector<1x128xf32>
      tpu.vector_store %arg15[%c0_23, %c0_24], %26 {strides = array<i32>} : memref<1x128xf32, #tpu.memory_space<vmem>>, vector<1x128xf32>,
      %cst_25 = arith.constant 0.000000e+00 : f32
      %28 = vector.broadcast %cst_25 : f32 to vector<1x128xf32>
      %c0_26 = arith.constant 0 : index
      %c0_27 = arith.constant 0 : index
      %29 = vector.load %arg16[%c0_26, %c0_27] : memref<1x128xf32, #tpu.memory_space<vmem>>, vector<1x128xf32>
      tpu.vector_store %arg16[%c0_26, %c0_27], %28 {strides = array<i32>} : memref<1x128xf32, #tpu.memory_space<vmem>>, vector<1x128xf32>,
    } else {
    }
    %c0_i32_10 = arith.constant 0 : i32
    %11 = arith.cmpi eq, %arg0, %c0_i32_10 : i32
    %12 = arith.extui %11 : i1 to i32
    %c0_i32_11 = arith.constant 0 : i32
    %13 = arith.cmpi ne, %12, %c0_i32_11 : i32
    scf.if %13 {
      %c0_16 = arith.constant 0 : index
      %c0_17 = arith.constant 0 : index
      %22 = vector.load %arg11[%c0_16, %c0_17] : memref<1x128xf32, #tpu.memory_space<vmem>>, vector<1x128xf32>
      %cst_18 = arith.constant dense<0.000000e+00> : vector<128xf32>
      %23 = vector.multi_reduction <add>, %2, %cst_18 [0] : vector<128x128xf32> to vector<128xf32>
      %24 = vector.shape_cast %23 : vector<128xf32> to vector<1x128xf32>
      %25 = arith.addf %22, %24 : vector<1x128xf32>
      %c0_19 = arith.constant 0 : index
      %c0_20 = arith.constant 0 : index
      %26 = vector.load %arg11[%c0_19, %c0_20] : memref<1x128xf32, #tpu.memory_space<vmem>>, vector<1x128xf32>
      tpu.vector_store %arg11[%c0_19, %c0_20], %25 {strides = array<i32>} : memref<1x128xf32, #tpu.memory_space<vmem>>, vector<1x128xf32>,
      %c0_21 = arith.constant 0 : index
      %c0_22 = arith.constant 0 : index
      %27 = vector.load %arg12[%c0_21, %c0_22] : memref<1x128xf32, #tpu.memory_space<vmem>>, vector<1x128xf32>
      %28 = arith.mulf %2, %2 : vector<128x128xf32>
      %cst_23 = arith.constant dense<0.000000e+00> : vector<128xf32>
      %29 = vector.multi_reduction <add>, %28, %cst_23 [0] : vector<128x128xf32> to vector<128xf32>
      %30 = vector.shape_cast %29 : vector<128xf32> to vector<1x128xf32>
      %31 = arith.addf %27, %30 : vector<1x128xf32>
      %c0_24 = arith.constant 0 : index
      %c0_25 = arith.constant 0 : index
      %32 = vector.load %arg12[%c0_24, %c0_25] : memref<1x128xf32, #tpu.memory_space<vmem>>, vector<1x128xf32>
      tpu.vector_store %arg12[%c0_24, %c0_25], %31 {strides = array<i32>} : memref<1x128xf32, #tpu.memory_space<vmem>>, vector<1x128xf32>,
      %c0_26 = arith.constant 0 : index
      %c0_27 = arith.constant 0 : index
      %33 = vector.load %arg15[%c0_26, %c0_27] : memref<1x128xf32, #tpu.memory_space<vmem>>, vector<1x128xf32>
      %cst_28 = arith.constant dense<0.000000e+00> : vector<128xf32>
      %34 = vector.multi_reduction <add>, %5, %cst_28 [0] : vector<128x128xf32> to vector<128xf32>
      %35 = vector.shape_cast %34 : vector<128xf32> to vector<1x128xf32>
      %36 = arith.addf %33, %35 : vector<1x128xf32>
      %c0_29 = arith.constant 0 : index
      %c0_30 = arith.constant 0 : index
      %37 = vector.load %arg15[%c0_29, %c0_30] : memref<1x128xf32, #tpu.memory_space<vmem>>, vector<1x128xf32>
      tpu.vector_store %arg15[%c0_29, %c0_30], %36 {strides = array<i32>} : memref<1x128xf32, #tpu.memory_space<vmem>>, vector<1x128xf32>,
      %c0_31 = arith.constant 0 : index
      %c0_32 = arith.constant 0 : index
      %38 = vector.load %arg16[%c0_31, %c0_32] : memref<1x128xf32, #tpu.memory_space<vmem>>, vector<1x128xf32>
      %39 = arith.mulf %5, %5 : vector<128x128xf32>
      %cst_33 = arith.constant dense<0.000000e+00> : vector<128xf32>
      %40 = vector.multi_reduction <add>, %39, %cst_33 [0] : vector<128x128xf32> to vector<128xf32>
      %41 = vector.shape_cast %40 : vector<128xf32> to vector<1x128xf32>
      %42 = arith.addf %38, %41 : vector<1x128xf32>
      %c0_34 = arith.constant 0 : index
      %c0_35 = arith.constant 0 : index
      %43 = vector.load %arg16[%c0_34, %c0_35] : memref<1x128xf32, #tpu.memory_space<vmem>>, vector<1x128xf32>
      tpu.vector_store %arg16[%c0_34, %c0_35], %42 {strides = array<i32>} : memref<1x128xf32, #tpu.memory_space<vmem>>, vector<1x128xf32>,
    } else {
    }
    %c1_i32 = arith.constant 1 : i32
    %14 = arith.cmpi eq, %arg0, %c1_i32 : i32
    %c0_i32_12 = arith.constant 0 : i32
    %15 = arith.cmpi eq, %arg1, %c0_i32_12 : i32
    %16 = arith.andi %14, %15 : i1
    %17 = arith.extui %16 : i1 to i32
    %c0_i32_13 = arith.constant 0 : i32
    %18 = arith.cmpi ne, %17, %c0_i32_13 : i32
    scf.if %18 {
      %c0_16 = arith.constant 0 : index
      %c0_17 = arith.constant 0 : index
      %22 = vector.load %arg11[%c0_16, %c0_17] : memref<1x128xf32, #tpu.memory_space<vmem>>, vector<1x128xf32>
      %cst_18 = arith.constant 7.812500e-03 : f32
      %23 = vector.broadcast %cst_18 : f32 to vector<1x128xf32>
      %24 = arith.mulf %22, %23 : vector<1x128xf32>
      %c0_19 = arith.constant 0 : index
      %c0_20 = arith.constant 0 : index
      %25 = vector.load %arg12[%c0_19, %c0_20] : memref<1x128xf32, #tpu.memory_space<vmem>>, vector<1x128xf32>
      %cst_21 = arith.constant 7.812500e-03 : f32
      %26 = vector.broadcast %cst_21 : f32 to vector<1x128xf32>
      %27 = arith.mulf %25, %26 : vector<1x128xf32>
      %28 = arith.mulf %24, %24 : vector<1x128xf32>
      %29 = arith.subf %27, %28 : vector<1x128xf32>
      %cst_22 = arith.constant 0.000000e+00 : f32
      %30 = vector.broadcast %cst_22 : f32 to vector<1x128xf32>
      %31 = arith.maximumf %29, %30 : vector<1x128xf32>
      %c0_23 = arith.constant 0 : index
      %c0_24 = arith.constant 0 : index
      %32 = vector.load %arg4[%c0_23, %c0_24] : memref<1x128xf32, #tpu.memory_space<vmem>>, vector<1x128xf32>
      %cst_25 = arith.constant 9.99999974E-6 : f32
      %33 = vector.broadcast %cst_25 : f32 to vector<1x128xf32>
      %34 = arith.addf %31, %33 : vector<1x128xf32>
      %35 = math.rsqrt %34 : vector<1x128xf32>
      %36 = arith.mulf %32, %35 : vector<1x128xf32>
      %c0_26 = arith.constant 0 : index
      %c0_27 = arith.constant 0 : index
      %37 = vector.load %arg13[%c0_26, %c0_27] : memref<1x128xf32, #tpu.memory_space<vmem>>, vector<1x128xf32>
      tpu.vector_store %arg13[%c0_26, %c0_27], %36 {strides = array<i32>} : memref<1x128xf32, #tpu.memory_space<vmem>>, vector<1x128xf32>,
      %c0_28 = arith.constant 0 : index
      %c0_29 = arith.constant 0 : index
      %38 = vector.load %arg5[%c0_28, %c0_29] : memref<1x128xf32, #tpu.memory_space<vmem>>, vector<1x128xf32>
      %39 = arith.mulf %24, %36 : vector<1x128xf32>
      %40 = arith.subf %38, %39 : vector<1x128xf32>
      %c0_30 = arith.constant 0 : index
      %c0_31 = arith.constant 0 : index
      %41 = vector.load %arg14[%c0_30, %c0_31] : memref<1x128xf32, #tpu.memory_space<vmem>>, vector<1x128xf32>
      tpu.vector_store %arg14[%c0_30, %c0_31], %40 {strides = array<i32>} : memref<1x128xf32, #tpu.memory_space<vmem>>, vector<1x128xf32>,
      %c0_32 = arith.constant 0 : index
      %c0_33 = arith.constant 0 : index
      %42 = vector.load %arg15[%c0_32, %c0_33] : memref<1x128xf32, #tpu.memory_space<vmem>>, vector<1x128xf32>
      %cst_34 = arith.constant 7.812500e-03 : f32
      %43 = vector.broadcast %cst_34 : f32 to vector<1x128xf32>
      %44 = arith.mulf %42, %43 : vector<1x128xf32>
      %c0_35 = arith.constant 0 : index
      %c0_36 = arith.constant 0 : index
      %45 = vector.load %arg16[%c0_35, %c0_36] : memref<1x128xf32, #tpu.memory_space<vmem>>, vector<1x128xf32>
      %cst_37 = arith.constant 7.812500e-03 : f32
      %46 = vector.broadcast %cst_37 : f32 to vector<1x128xf32>
      %47 = arith.mulf %45, %46 : vector<1x128xf32>
      %48 = arith.mulf %44, %44 : vector<1x128xf32>
      %49 = arith.subf %47, %48 : vector<1x128xf32>
      %cst_38 = arith.constant 0.000000e+00 : f32
      %50 = vector.broadcast %cst_38 : f32 to vector<1x128xf32>
      %51 = arith.maximumf %49, %50 : vector<1x128xf32>
      %c0_39 = arith.constant 0 : index
      %c0_40 = arith.constant 0 : index
      %52 = vector.load %arg8[%c0_39, %c0_40] : memref<1x128xf32, #tpu.memory_space<vmem>>, vector<1x128xf32>
      %cst_41 = arith.constant 9.99999974E-6 : f32
      %53 = vector.broadcast %cst_41 : f32 to vector<1x128xf32>
      %54 = arith.addf %51, %53 : vector<1x128xf32>
      %55 = math.rsqrt %54 : vector<1x128xf32>
      %56 = arith.mulf %52, %55 : vector<1x128xf32>
      %c0_42 = arith.constant 0 : index
      %c0_43 = arith.constant 0 : index
      %57 = vector.load %arg17[%c0_42, %c0_43] : memref<1x128xf32, #tpu.memory_space<vmem>>, vector<1x128xf32>
      tpu.vector_store %arg17[%c0_42, %c0_43], %56 {strides = array<i32>} : memref<1x128xf32, #tpu.memory_space<vmem>>, vector<1x128xf32>,
      %c0_44 = arith.constant 0 : index
      %c0_45 = arith.constant 0 : index
      %58 = vector.load %arg9[%c0_44, %c0_45] : memref<1x128xf32, #tpu.memory_space<vmem>>, vector<1x128xf32>
      %59 = arith.mulf %44, %56 : vector<1x128xf32>
      %60 = arith.subf %58, %59 : vector<1x128xf32>
      %c0_46 = arith.constant 0 : index
      %c0_47 = arith.constant 0 : index
      %61 = vector.load %arg18[%c0_46, %c0_47] : memref<1x128xf32, #tpu.memory_space<vmem>>, vector<1x128xf32>
      tpu.vector_store %arg18[%c0_46, %c0_47], %60 {strides = array<i32>} : memref<1x128xf32, #tpu.memory_space<vmem>>, vector<1x128xf32>,
    } else {
    }
    %c1_i32_14 = arith.constant 1 : i32
    %19 = arith.cmpi eq, %arg0, %c1_i32_14 : i32
    %20 = arith.extui %19 : i1 to i32
    %c0_i32_15 = arith.constant 0 : i32
    %21 = arith.cmpi ne, %20, %c0_i32_15 : i32
    scf.if %21 {
      %c0_16 = arith.constant 0 : index
      %c0_17 = arith.constant 0 : index
      %22 = vector.load %arg13[%c0_16, %c0_17] : memref<1x128xf32, #tpu.memory_space<vmem>>, vector<1x128xf32>
      %23 = vector.broadcast %22 : vector<1x128xf32> to vector<128x128xf32>
      %24 = arith.mulf %2, %23 : vector<128x128xf32>
      %c0_18 = arith.constant 0 : index
      %c0_19 = arith.constant 0 : index
      %25 = vector.load %arg14[%c0_18, %c0_19] : memref<1x128xf32, #tpu.memory_space<vmem>>, vector<1x128xf32>
      %26 = vector.broadcast %25 : vector<1x128xf32> to vector<128x128xf32>
      %27 = arith.addf %24, %26 : vector<128x128xf32>
      %c0_20 = arith.constant 0 : index
      %c0_21 = arith.constant 0 : index
      %28 = vector.load %arg17[%c0_20, %c0_21] : memref<1x128xf32, #tpu.memory_space<vmem>>, vector<1x128xf32>
      %29 = vector.broadcast %28 : vector<1x128xf32> to vector<128x128xf32>
      %30 = arith.mulf %5, %29 : vector<128x128xf32>
      %31 = arith.addf %27, %30 : vector<128x128xf32>
      %c0_22 = arith.constant 0 : index
      %c0_23 = arith.constant 0 : index
      %32 = vector.load %arg18[%c0_22, %c0_23] : memref<1x128xf32, #tpu.memory_space<vmem>>, vector<1x128xf32>
      %33 = vector.broadcast %32 : vector<1x128xf32> to vector<128x128xf32>
      %34 = arith.addf %31, %33 : vector<128x128xf32>
      %cst_24 = arith.constant 0.000000e+00 : f32
      %35 = vector.broadcast %cst_24 : f32 to vector<128x128xf32>
      %36 = arith.maximumf %34, %35 : vector<128x128xf32>
      %c0_25 = arith.constant 0 : index
      %c0_26 = arith.constant 0 : index
      %37 = vector.load %arg10[%c0_25, %c0_26] : memref<128x128xf32, #tpu.memory_space<vmem>>, vector<128x128xf32>
      tpu.vector_store %arg10[%c0_25, %c0_26], %36 {strides = array<i32>} : memref<128x128xf32, #tpu.memory_space<vmem>>, vector<128x128xf32>,
    } else {
    }
    return
  }
  func.func @transform_0(%arg0: i32, %arg1: i32) -> (i32, i32) {
    %c0_i32 = arith.constant 0 : i32
    %c0_i32_0 = arith.constant 0 : i32
    return %arg1, %c0_i32 : i32, i32
  }
  func.func @transform_1(%arg0: i32, %arg1: i32) -> (i32, i32) {
    %c0_i32 = arith.constant 0 : i32
    %c0_i32_0 = arith.constant 0 : i32
    %c0_i32_1 = arith.constant 0 : i32
    return %c0_i32, %c0_i32_0 : i32, i32
  }
  func.func @transform_2(%arg0: i32, %arg1: i32) -> (i32, i32) {
    %c0_i32 = arith.constant 0 : i32
    %c0_i32_0 = arith.constant 0 : i32
    %c0_i32_1 = arith.constant 0 : i32
    return %c0_i32, %c0_i32_0 : i32, i32
  }
  func.func @transform_3(%arg0: i32, %arg1: i32) -> (i32, i32) {
    %c0_i32 = arith.constant 0 : i32
    %c0_i32_0 = arith.constant 0 : i32
    %c0_i32_1 = arith.constant 0 : i32
    return %c0_i32, %c0_i32_0 : i32, i32
  }
  func.func @transform_4(%arg0: i32, %arg1: i32) -> (i32, i32) {
    %c0_i32 = arith.constant 0 : i32
    %c0_i32_0 = arith.constant 0 : i32
    return %arg1, %c0_i32 : i32, i32
  }
  func.func @transform_5(%arg0: i32, %arg1: i32) -> (i32, i32) {
    %c0_i32 = arith.constant 0 : i32
    %c0_i32_0 = arith.constant 0 : i32
    %c0_i32_1 = arith.constant 0 : i32
    return %c0_i32, %c0_i32_0 : i32, i32
  }
  func.func @transform_6(%arg0: i32, %arg1: i32) -> (i32, i32) {
    %c0_i32 = arith.constant 0 : i32
    %c0_i32_0 = arith.constant 0 : i32
    %c0_i32_1 = arith.constant 0 : i32
    return %c0_i32, %c0_i32_0 : i32, i32
  }
  func.func @transform_7(%arg0: i32, %arg1: i32) -> (i32, i32) {
    %c0_i32 = arith.constant 0 : i32
    %c0_i32_0 = arith.constant 0 : i32
    %c0_i32_1 = arith.constant 0 : i32
    return %c0_i32, %c0_i32_0 : i32, i32
  }
  func.func @transform_8(%arg0: i32, %arg1: i32) -> (i32, i32) {
    %0 = arith.muli %arg0, %arg1 : i32
    %c0_i32 = arith.constant 0 : i32
    %c0_i32_0 = arith.constant 0 : i32
    return %0, %c0_i32 : i32, i32
  }
}

</mosaic_0001>

<bundles_post_ra>
// kernel: tile.6
= control target key start
LH: loop header
LB: loop body
LE: loop exit
PB: predicated region body
PF: predicated region fallthrough
CT: control target
= control target key end

     0   :  { %s22_s0 = inlined_call_operand.vmem [shape: f32[9], index: 0, kind: input, shape index: {}]   ;;  %s23_s1 = inlined_call_operand.vmem [shape: f32[8,9], index: 1, kind: output, shape index: {}]  }
   0x1   :  { %v4_v0 = vld [vmem:[%s22_s0] ss:$0 sm:$0xff] }
   0x2   :  { %5 = vst [vmem:[%s23_s1] sm:$0xff] %v4_v0 }

// kernel: tile.0
= control target key start
LH: loop header
LB: loop body
LE: loop exit
PB: predicated region body
PF: predicated region fallthrough
CT: control target
= control target key end

     0   :  { %vm3_vm0 = vcmask 7168   ;;  %s141_s10 = smov 125   ;;  %s142_s11 = smov 127   ;;  %s300_s0 = inlined_call_operand.vmem [shape: f32[8,9], index: 0, kind: input, shape index: {}]   ;;  %s301_s1 = inlined_call_operand.vmem [shape: f32[72,1], index: 1, kind: output, shape index: {}]  }
   0x1   :  { %v29_v0 = vld.sshfl [vmem:[%s300_s0] sm:$0xff pattern:$0x36251407]   ;;  %s144_s16 = smov 124   ;;  %s145_s17 = smov 126  }
   0x2   :  { %v2_v1 = vld [vmem:[%s300_s0] sm:$0xff]   ;;  %30 = vrot.lane.b32.xlu1 %v29_v0, %s141_s10  ;;  %6 = vrot.lane.b32.xlu0 %v29_v0, %s142_s11  ;;  %s146_s18 = smov 122   ;;  %s147_s19 = smov 120  }
   0x3   :  { %4 = vst.msk [vmem:[%s301_s1] ss:$9 sm:$0xff] %vm3_vm0, %v2_v1   ;;  %v89_v2 = vld.sshfl [vmem:[%s300_s0] sm:$0xff pattern:$0x62514073]   ;;  %s143_s0 = smov 123  }
   0x4   :  { %54 = vrot.lane.b32.xlu2 %v89_v2, %s143_s0  ;;  %s148_s20 = smov 121  }
   0xa   :  { %42 = vrot.lane.b32.xlu1 %v29_v0, %s144_s16  ;;  %18 = vrot.lane.b32.xlu0 %v29_v0, %s145_s17 }
   0xc   :  { %66 = vrot.lane.b32.xlu2 %v89_v2, %s146_s18 }
  0x12   :  { %90 = vrot.lane.b32.xlu1 %v89_v2, %s147_s19  ;;  %78 = vrot.lane.b32.xlu0 %v89_v2, %s148_s20 }
  0x5e   :  { %v55_v3 = vpop.permute.xlu2 %54  }
  0x5f   :  { %117 = vst.msk [vmem:[%s301_s1 + $0x20] ss:$36 sm:$0x3] %vm3_vm0, %v55_v3  }
  0x60   :  { %118 = vst.msk [vmem:[%s301_s1 - $0x43] ss:$36 sm:$0xc] %vm3_vm0, %v55_v3  }
  0x61   :  { %119 = vst.msk [vmem:[%s301_s1 - $0x82] ss:$36 sm:$0x30] %vm3_vm0, %v55_v3  }
  0x62   :  { %120 = vst.msk [vmem:[%s301_s1 - $0xc1] ss:$36 sm:$0xc0] %vm3_vm0, %v55_v3  }
  0x66   :  { %v67_v4 = vpop.permute.xlu2 %66  }
  0x67   :  { %121 = vst.msk [vmem:[%s301_s1 + $0x21] ss:$36 sm:$0x3] %vm3_vm0, %v67_v4  }
  0x68   :  { %122 = vst.msk [vmem:[%s301_s1 - $0x42] ss:$36 sm:$0xc] %vm3_vm0, %v67_v4  }
  0x69   :  { %123 = vst.msk [vmem:[%s301_s1 - $0x81] ss:$36 sm:$0x30] %vm3_vm0, %v67_v4  }
  0x6a   :  { %124 = vst.msk [vmem:[%s301_s1 - $0xc0] ss:$36 sm:$0xc0] %vm3_vm0, %v67_v4  }
  0x74   :  { %v31_v5 = vpop.permute.xlu1 %30   ;;  %v7_v6 = vpop.permute.xlu0 %6  }
  0x75   :  { %109 = vst.msk [vmem:[%s301_s1 + $0x42] ss:$-63 sm:$0x3] %vm3_vm0, %v31_v5  }
  0x76   :  { %110 = vst.msk [vmem:[%s301_s1 + $0x5d] ss:$-27 sm:$0xc] %vm3_vm0, %v31_v5  }
  0x77   :  { %111 = vst.msk [vmem:[%s301_s1 + $0x9c] ss:$-27 sm:$0x30] %vm3_vm0, %v31_v5  }
  0x78   :  { %112 = vst.msk [vmem:[%s301_s1 + $0xdb] ss:$-27 sm:$0xc0] %vm3_vm0, %v31_v5  }
  0x79   :  { %101 = vst.msk [vmem:[%s301_s1 + $0x40] ss:$-63 sm:$0x3] %vm3_vm0, %v7_v6  }
  0x7a   :  { %102 = vst.msk [vmem:[%s301_s1 + $0x5b] ss:$-27 sm:$0xc] %vm3_vm0, %v7_v6  }
  0x7b   :  { %103 = vst.msk [vmem:[%s301_s1 + $0x9a] ss:$-27 sm:$0x30] %vm3_vm0, %v7_v6  }
  0x7c   :  { %104 = vst.msk [vmem:[%s301_s1 + $0xd9] ss:$-27 sm:$0xc0] %vm3_vm0, %v7_v6   ;;  %v43_v7 = vpop.permute.xlu1 %42   ;;  %v19_v8 = vpop.permute.xlu0 %18  }
  0x7d   :  { %113 = vst.msk [vmem:[%s301_s1 + $0x43] ss:$-63 sm:$0x3] %vm3_vm0, %v43_v7  }
  0x7e   :  { %114 = vst.msk [vmem:[%s301_s1 + $0x5e] ss:$-27 sm:$0xc] %vm3_vm0, %v43_v7  }
  0x7f   :  { %115 = vst.msk [vmem:[%s301_s1 + $0x9d] ss:$-27 sm:$0x30] %vm3_vm0, %v43_v7  }
  0x80   :  { %116 = vst.msk [vmem:[%s301_s1 + $0xdc] ss:$-27 sm:$0xc0] %vm3_vm0, %v43_v7  }
  0x81   :  { %105 = vst.msk [vmem:[%s301_s1 + $0x41] ss:$-63 sm:$0x3] %vm3_vm0, %v19_v8  }
  0x82   :  { %106 = vst.msk [vmem:[%s301_s1 + $0x5c] ss:$-27 sm:$0xc] %vm3_vm0, %v19_v8  }
  0x83   :  { %107 = vst.msk [vmem:[%s301_s1 + $0x9b] ss:$-27 sm:$0x30] %vm3_vm0, %v19_v8  }
  0x84   :  { %108 = vst.msk [vmem:[%s301_s1 + $0xda] ss:$-27 sm:$0xc0] %vm3_vm0, %v19_v8   ;;  %v91_v9 = vpop.permute.xlu1 %90   ;;  %v79_v10 = vpop.permute.xlu0 %78  }
  0x85   :  { %129 = vst.msk [vmem:[%s301_s1 + $0x23] ss:$36 sm:$0x3] %vm3_vm0, %v91_v9  }
  0x86   :  { %130 = vst.msk [vmem:[%s301_s1 - $0x40] ss:$36 sm:$0xc] %vm3_vm0, %v91_v9  }
  0x87   :  { %131 = vst.msk [vmem:[%s301_s1 - $0x7f] ss:$36 sm:$0x30] %vm3_vm0, %v91_v9  }
  0x88   :  { %132 = vst.msk [vmem:[%s301_s1 - $0xbe] ss:$36 sm:$0xc0] %vm3_vm0, %v91_v9  }
  0x89   :  { %125 = vst.msk [vmem:[%s301_s1 + $0x22] ss:$36 sm:$0x3] %vm3_vm0, %v79_v10  }
  0x8a   :  { %126 = vst.msk [vmem:[%s301_s1 - $0x41] ss:$36 sm:$0xc] %vm3_vm0, %v79_v10  }
  0x8b   :  { %127 = vst.msk [vmem:[%s301_s1 - $0x80] ss:$36 sm:$0x30] %vm3_vm0, %v79_v10  }
  0x8c   :  { %128 = vst.msk [vmem:[%s301_s1 - $0xbf] ss:$36 sm:$0xc0] %vm3_vm0, %v79_v10  }

// kernel: bottleneck_forward.3
= control target key start
LH: loop header
LB: loop body
LE: loop exit
PB: predicated region body
PF: predicated region fallthrough
CT: control target
= control target key end

     0   :  { %s1257_s15 = smov 0   ;;  %s1259_s16 = smov 0   ;;  %s1656_s0 = inlined_call_operand.vmem [shape: bf16[512,128], index: 0, kind: input, shape index: {}]   ;;  %s1657_s1 = inlined_call_operand.vmem [shape: bf16[128,128], index: 1, kind: input, shape index: {}]   ;;  %s1658_s2 = inlined_call_operand.vmem [shape: f32[1,128], index: 2, kind: input, shape index: {}]   ;;  %s1659_s3 = inlined_call_operand.vmem [shape: f32[1,128], index: 3, kind: input, shape index: {}]   ;;  %s1660_s4 = inlined_call_operand.vmem [shape: bf16[512,128], index: 4, kind: output, shape index: {}]  }
   0x1   :  { %s1261_s17 = smov 0   ;;  %s1263_s18 = smov 0  }
   0x2   :  { %s1265_s19 = smov 0  }
   0x3 LB: > { %s23_s20 = sadd.s32 1, %s1221_s17  ;;  %s26_s21 = sadd.s32 1, %s1225_s18  ;;  %s1229_s19 = sphi %s1265_s19, %s14_s19   ;;  %s1225_s18 = sphi %s1263_s18, %s1665_s18   ;;  %s1221_s17 = sphi %s1261_s17, %s1664_s17   ;;  %s1217_s16 = sphi %s1259_s16, %s1663_s16   ;;  %s1213_s15 = sphi %s1257_s15, %s1662_s15  }
   0x4   : > { %p24_p0 = scmp.ge.s32.totalorder %s23_s20, 2  ;;  %p898_p1 = scmp.ge.s32.totalorder %s1229_s19, 1 }
   0x5   : > { %p177_p2 = scmp.lt.s32.totalorder %s1229_s19, 5 }
   0x6   : > { %s1667_s20 = smov (%p24_p0, %s23_s20), 0  ;;  %s1669_s21 = smov (!%p24_p0, %s26_s21), %s1225_s18 }
   0x7   : > { %p178_p3 = pnand %p898_p1, %p177_p2  ;;  %p28_p4 = scmp.ge.s32.totalorder %s1669_s21, 2 }
   0x8   : > { %s210_s22 = smul.u32 (!%p178_p3), %s1213_s15, %s1217_s16  ;;  %s899_s10 = sshll.u32 (!%p178_p3), %s1213_s15, 5 }
   0x9   : > { %s1671_s21 = smov (%p28_p4, %s1669_s21), 0  ;;  %181 = sbr.rel (%p178_p3) target bundleno = 410 (0x19a), region = 36 }
   0xa   : > { %s901_s25 = sshll.u32 (!%p178_p3), %s210_s22, 5  ;;  %p205_p6 = scmp.lt.s32.totalorder (!%p178_p3), %s899_s10, 63 }
   0xb   : > { %p212_p5 = scmp.lt.s32.totalorder (!%p178_p3), %s901_s25, 63  ;;  %p499_p7 = scmp.eq.s32.totalorder (!%p178_p3), %s1217_s16, 0 }
   0xc   : > { %p500_p8 = scmp.eq.s32.totalorder (!%p178_p3), %s1213_s15, 0 }
   0xe   : > { %v1026_v0 = vld [vmem:[%s1657_s1 + $0x38] sm:$0xff]  ;;  %v1025_v1 = vld [vmem:[%s1657_s1 + $0x30] sm:$0xff]  ;;  %s1673_s25 = smov (!%p212_p5, %s901_s25), 63  ;;  %v1024_v2 = vld [vmem:[%s1657_s1 + $0x28] sm:$0xff]  ;;  %s1675_s10 = smov (!%p205_p6, %s899_s10), 63 }
   0xf   : > { %410 = vmatpush.bf16.msra.mxu0 %v1026_v0  ;;  %1122 = vmatpush.bf16.msra.mxu1 %v1026_v0  ;;  %s902_s30 = sshll.u32 %s1673_s25, 2  ;;  %v1023_v3 = vld [vmem:[%s1657_s1 + $0x20] sm:$0xff]  ;;  %v1022_v4 = vld [vmem:[%s1657_s1 + $0x18] sm:$0xff]  ;;  %v1021_v5 = vld [vmem:[%s1657_s1 + $0x10] sm:$0xff]  ;;  %s900_s24 = sshll.u32 %s1675_s10, 2 }
  0x10   : > { %1123 = vmatpush.bf16.msra.mxu2 %v1026_v0  ;;  %1124 = vmatpush.bf16.msra.mxu3 %v1026_v0  ;;  %s1305_s7 = scalar_lea.vmem %s1660_s4, %s902_s30  ;;  %v1020_v6 = vld [vmem:[%s1657_s1 + $0x8] sm:$0xff]  ;;  %v1019_v7 = vld [vmem:[%s1657_s1] sm:$0xff]  ;;  %s1326_s29 = scalar_lea.vmem %s1656_s0, %s900_s24 }
  0x11   : > { %v1003_v8 = vld [vmem:[%s1326_s29] sm:$0xff]  ;;  %v1004_v12 = vld [vmem:[%s1326_s29 + $0x8] sm:$0xff]  ;;  %v1005_v16 = vld [vmem:[%s1326_s29 + $0x10] sm:$0xff]  ;;  %p1348_p9 = pnand %p500_p8, %p499_p7 }
  0x12   : > { %v1007_v9 = vld [vmem:[%s1326_s29 + $0x20] sm:$0xff]  ;;  %v1008_v13 = vld [vmem:[%s1326_s29 + $0x28] sm:$0xff]  ;;  %v1009_v17 = vld [vmem:[%s1326_s29 + $0x30] sm:$0xff] }
  0x13   : > { %411 = vmatpush.bf16.msra.mxu0 %v1025_v1  ;;  %1125 = vmatpush.bf16.msra.mxu1 %v1025_v1  ;;  %v1011_v10 = vld [vmem:[%s1326_s29 + $0x40] sm:$0xff]  ;;  %v1012_v14 = vld [vmem:[%s1326_s29 + $0x48] sm:$0xff]  ;;  %v1013_v18 = vld [vmem:[%s1326_s29 + $0x50] sm:$0xff] }
  0x14   : > { %1126 = vmatpush.bf16.msra.mxu2 %v1025_v1  ;;  %1127 = vmatpush.bf16.msra.mxu3 %v1025_v1  ;;  %v1015_v11 = vld [vmem:[%s1326_s29 + $0x60] sm:$0xff]  ;;  %v1016_v15 = vld [vmem:[%s1326_s29 + $0x68] sm:$0xff]  ;;  %v1017_v19 = vld [vmem:[%s1326_s29 + $0x70] sm:$0xff] }
  0x15   : > { %v1006_v20 = vld [vmem:[%s1326_s29 + $0x18] sm:$0xff] }
  0x16   : > { %v1010_v21 = vld [vmem:[%s1326_s29 + $0x38] sm:$0xff] }
  0x17   : > { %412 = vmatpush.bf16.msra.mxu0 %v1024_v2  ;;  %1128 = vmatpush.bf16.msra.mxu1 %v1024_v2  ;;  %v1014_v22 = vld [vmem:[%s1326_s29 + $0x58] sm:$0xff] }
  0x18   : > { %1129 = vmatpush.bf16.msra.mxu2 %v1024_v2  ;;  %1130 = vmatpush.bf16.msra.mxu3 %v1024_v2  ;;  %v1018_v23 = vld [vmem:[%s1326_s29 + $0x78] sm:$0xff] }
  0x1b   : > { %413 = vmatpush.bf16.msra.mxu0 %v1023_v3  ;;  %1131 = vmatpush.bf16.msra.mxu1 %v1023_v3 }
  0x1c   : > { %1132 = vmatpush.bf16.msra.mxu2 %v1023_v3  ;;  %1133 = vmatpush.bf16.msra.mxu3 %v1023_v3 }
  0x1f   : > { %414 = vmatpush.bf16.msra.mxu0 %v1022_v4  ;;  %1134 = vmatpush.bf16.msra.mxu1 %v1022_v4 }
  0x20   : > { %1135 = vmatpush.bf16.msra.mxu2 %v1022_v4  ;;  %1136 = vmatpush.bf16.msra.mxu3 %v1022_v4 }
  0x23   : > { %415 = vmatpush.bf16.msra.mxu0 %v1021_v5  ;;  %1137 = vmatpush.bf16.msra.mxu1 %v1021_v5 }
  0x24   : > { %1138 = vmatpush.bf16.msra.mxu2 %v1021_v5  ;;  %1139 = vmatpush.bf16.msra.mxu3 %v1021_v5 }
  0x27   : > { %416 = vmatpush.bf16.msra.mxu0 %v1020_v6  ;;  %1140 = vmatpush.bf16.msra.mxu1 %v1020_v6 }
  0x28   : > { %1141 = vmatpush.bf16.msra.mxu2 %v1020_v6  ;;  %1142 = vmatpush.bf16.msra.mxu3 %v1020_v6 }
  0x2b   : > { %417 = vmatpush.bf16.msra.mxu0 %v1019_v7  ;;  %1143 = vmatpush.bf16.msra.mxu1 %v1019_v7 }
  0x2c   : > { %1144 = vmatpush.bf16.msra.mxu2 %v1019_v7  ;;  %1145 = vmatpush.bf16.msra.mxu3 %v1019_v7 }
  0x2e   : > { %418 = vmatmul.bf16.vlgmr.msra.gmra.mxu0 %v1003_v8  ;;  %438 = vmatmul.bf16.vlgmr.msra.gmra.mxu1 %v1007_v9 }
  0x2f   : > { %458 = vmatmul.bf16.vlgmr.msra.gmra.mxu2 %v1011_v10  ;;  %478 = vmatmul.bf16.vlgmr.msra.gmra.mxu3 %v1015_v11 }
  0x3e   : > { %423 = vmatmul.bf16.gmra.mxu0 %v1004_v12  ;;  %443 = vmatmul.bf16.gmra.mxu1 %v1008_v13 }
  0x3f   : > { %463 = vmatmul.bf16.gmra.mxu2 %v1012_v14  ;;  %483 = vmatmul.bf16.gmra.mxu3 %v1016_v15 }
  0x4e   : > { %428 = vmatmul.bf16.gmra.mxu0 %v1005_v16  ;;  %448 = vmatmul.bf16.gmra.mxu1 %v1009_v17 }
  0x4f   : > { %468 = vmatmul.bf16.gmra.mxu2 %v1013_v18  ;;  %488 = vmatmul.bf16.gmra.mxu3 %v1017_v19 }
  0x5e   : > { %433 = vmatmul.bf16.gmra.mxu0 %v1006_v20  ;;  %453 = vmatmul.bf16.gmra.mxu1 %v1010_v21 }
  0x5f   : > { %473 = vmatmul.bf16.gmra.mxu2 %v1014_v22  ;;  %493 = vmatmul.bf16.gmra.mxu3 %v1018_v23 }
  0xab   : > { %v1352_v24 = vpop.f32.mrf.mxu0  ;;  %v1354_v25 = vpop.f32.mrf.mxu1 }
  0xb2   : > { %v1356_v26 = vpop.f32.mrf.mxu2  ;;  %v1358_v27 = vpop.f32.mrf.mxu3 }
  0xb3   : > { %v1360_v28 = vpop.f32.mrf.mxu0  ;;  %v1362_v29 = vpop.f32.mrf.mxu1 }
  0xba   : > { %v1364_v30 = vpop.f32.mrf.mxu2  ;;  %v1366_v31 = vpop.f32.mrf.mxu3 }
  0xbb   : > { %v1368_v32 = vpop.f32.mrf.mxu0  ;;  %v1370_v33 = vpop.f32.mrf.mxu1 }
  0xc2   : > { %v1372_v34 = vpop.f32.mrf.mxu2  ;;  %v1374_v35 = vpop.f32.mrf.mxu3 }
  0xc3   : > { %v1376_v36 = vpop.f32.mrf.mxu0  ;;  %v1378_v37 = vpop.f32.mrf.mxu1 }
  0xca   : > { %v1380_v38 = vpop.f32.mrf.mxu2  ;;  %v1382_v39 = vpop.f32.mrf.mxu3 }
  0xcb   : > { %v1384_v40 = vpop.f32.mrf.mxu0  ;;  %v1386_v41 = vpop.f32.mrf.mxu1 }
  0xd2   : > { %v1388_v42 = vpop.f32.mrf.mxu2  ;;  %v1390_v43 = vpop.f32.mrf.mxu3 }
  0xd3   : > { %v1392_v44 = vpop.f32.mrf.mxu0  ;;  %v1394_v45 = vpop.f32.mrf.mxu1 }
  0xda   : > { %v1396_v46 = vpop.f32.mrf.mxu2  ;;  %v1398_v47 = vpop.f32.mrf.mxu3 }
  0xdb   : > { %v1400_v48 = vpop.f32.mrf.mxu0  ;;  %v1402_v49 = vpop.f32.mrf.mxu1 }
  0xe2   : > { %v1404_v50 = vpop.f32.mrf.mxu2  ;;  %v1406_v51 = vpop.f32.mrf.mxu3 }
  0xe3   : > { %v1408_v52 = vpop.f32.mrf.mxu0  ;;  %v1410_v53 = vpop.f32.mrf.mxu1 }
  0xe6   : > { %504 = sbr.rel (%p1348_p9) target bundleno = 238 (0xee), region = 40 }
  0xea   : > { %v1412_v54 = vpop.f32.mrf.mxu2  ;;  %v1414_v55 = vpop.f32.mrf.mxu3 }
  0xeb   : > { %v1231_v56 = vmov 0.0  }
  0xec   : > { %505 = vst [vmem:[#allocation2] sm:$0x1] %v1231_v56 }
  0xed   : > { %506 = vst [vmem:[#allocation3] sm:$0x1] %v1231_v56 }
  0xee PF: > { %p999_p10 = scmp.ne.s32.totalorder %s1217_s16, 0 }
  0xf0   : > { %509 = sbr.rel (%p999_p10) target bundleno = 324 (0x144), region = 44 }
  0xf5   : > { %v511_v57 = vadd.f32 %v1360_v28, %v1352_v24  ;;  %v551_v58 = vmul.f32 %v1352_v24, %v1352_v24  ;;  %v552_v59 = vmul.f32 %v1360_v28, %v1360_v28  ;;  %v553_v61 = vmul.f32 %v1368_v32, %v1368_v32 }
  0xf6   : > { %v554_v63 = vmul.f32 %v1376_v36, %v1376_v36  ;;  %v555_v2 = vmul.f32 %v1384_v40, %v1384_v40  ;;  %v556_v5 = vmul.f32 %v1392_v44, %v1392_v44  ;;  %v557_v8 = vmul.f32 %v1400_v48, %v1400_v48 }
  0xf7   : > { %v512_v60 = vadd.f32 %v511_v57, %v1368_v32  ;;  %v583_v0 = vadd.f32 %v552_v59, %v551_v58  ;;  %v558_v11 = vmul.f32 %v1408_v52, %v1408_v52  ;;  %v559_v14 = vmul.f32 %v1354_v25, %v1354_v25 }
  0xf8   : > { %v560_v17 = vmul.f32 %v1362_v29, %v1362_v29  ;;  %v561_v20 = vmul.f32 %v1370_v33, %v1370_v33  ;;  %v562_v23 = vmul.f32 %v1378_v37, %v1378_v37  ;;  %v563_v58 = vmul.f32 %v1386_v41, %v1386_v41 }
  0xf9   : > { %v513_v62 = vadd.f32 %v512_v60, %v1376_v36  ;;  %v584_v3 = vadd.f32 %v583_v0, %v553_v61  ;;  %v564_v61 = vmul.f32 %v1394_v45, %v1394_v45  ;;  %v565_v0 = vmul.f32 %v1402_v49, %v1402_v49 }
  0xfb   : > { %v514_v1 = vadd.f32 %v513_v62, %v1384_v40  ;;  %v585_v6 = vadd.f32 %v584_v3, %v554_v63  ;;  %v566_v3 = vmul.f32 %v1410_v53, %v1410_v53 }
  0xfd   : > { %v515_v4 = vadd.f32 %v514_v1, %v1392_v44  ;;  %v586_v9 = vadd.f32 %v585_v6, %v555_v2  ;;  %v567_v6 = vmul.f32 %v1356_v26, %v1356_v26 }
  0xff   : > { %v516_v7 = vadd.f32 %v515_v4, %v1400_v48  ;;  %v587_v12 = vadd.f32 %v586_v9, %v556_v5  ;;  %v568_v9 = vmul.f32 %v1364_v30, %v1364_v30 }
 0x101   : > { %v517_v10 = vadd.f32 %v516_v7, %v1408_v52  ;;  %v588_v15 = vadd.f32 %v587_v12, %v557_v8  ;;  %v569_v12 = vmul.f32 %v1372_v34, %v1372_v34 }
 0x103   : > { %v518_v13 = vadd.f32 %v517_v10, %v1354_v25  ;;  %v589_v18 = vadd.f32 %v588_v15, %v558_v11  ;;  %v570_v15 = vmul.f32 %v1380_v38, %v1380_v38 }
 0x105   : > { %v519_v16 = vadd.f32 %v518_v13, %v1362_v29  ;;  %v590_v21 = vadd.f32 %v589_v18, %v559_v14  ;;  %v571_v18 = vmul.f32 %v1388_v42, %v1388_v42 }
 0x107   : > { %v520_v19 = vadd.f32 %v519_v16, %v1370_v33  ;;  %v591_v56 = vadd.f32 %v590_v21, %v560_v17  ;;  %v572_v21 = vmul.f32 %v1396_v46, %v1396_v46 }
 0x109   : > { %v521_v22 = vadd.f32 %v520_v19, %v1378_v37  ;;  %v592_v59 = vadd.f32 %v591_v56, %v561_v20  ;;  %v573_v56 = vmul.f32 %v1404_v50, %v1404_v50 }
 0x10b   : > { %v522_v57 = vadd.f32 %v521_v22, %v1386_v41  ;;  %v593_v62 = vadd.f32 %v592_v59, %v562_v23  ;;  %v574_v59 = vmul.f32 %v1412_v54, %v1412_v54 }
 0x10d   : > { %v523_v60 = vadd.f32 %v522_v57, %v1394_v45  ;;  %v594_v1 = vadd.f32 %v593_v62, %v563_v58  ;;  %v575_v62 = vmul.f32 %v1358_v27, %v1358_v27 }
 0x10f   : > { %v524_v63 = vadd.f32 %v523_v60, %v1402_v49  ;;  %v595_v4 = vadd.f32 %v594_v1, %v564_v61  ;;  %v576_v1 = vmul.f32 %v1366_v31, %v1366_v31 }
 0x111   : > { %v525_v2 = vadd.f32 %v524_v63, %v1410_v53  ;;  %v596_v7 = vadd.f32 %v595_v4, %v565_v0  ;;  %v577_v4 = vmul.f32 %v1374_v35, %v1374_v35 }
 0x113   : > { %v526_v5 = vadd.f32 %v525_v2, %v1356_v26  ;;  %v597_v10 = vadd.f32 %v596_v7, %v566_v3  ;;  %v578_v7 = vmul.f32 %v1382_v39, %v1382_v39 }
 0x115   : > { %v527_v8 = vadd.f32 %v526_v5, %v1364_v30  ;;  %v598_v13 = vadd.f32 %v597_v10, %v567_v6  ;;  %v579_v10 = vmul.f32 %v1390_v43, %v1390_v43 }
 0x117   : > { %v528_v11 = vadd.f32 %v527_v8, %v1372_v34  ;;  %v599_v16 = vadd.f32 %v598_v13, %v568_v9  ;;  %v580_v13 = vmul.f32 %v1398_v47, %v1398_v47 }
 0x119   : > { %v529_v14 = vadd.f32 %v528_v11, %v1380_v38  ;;  %v600_v19 = vadd.f32 %v599_v16, %v569_v12  ;;  %v581_v16 = vmul.f32 %v1406_v51, %v1406_v51 }
 0x11b   : > { %v530_v17 = vadd.f32 %v529_v14, %v1388_v42  ;;  %v601_v22 = vadd.f32 %v600_v19, %v570_v15  ;;  %v582_v19 = vmul.f32 %v1414_v55, %v1414_v55 }
 0x11d   : > { %v531_v20 = vadd.f32 %v530_v17, %v1396_v46  ;;  %v602_v57 = vadd.f32 %v601_v22, %v571_v18 }
 0x11f   : > { %v532_v23 = vadd.f32 %v531_v20, %v1404_v50  ;;  %v603_v60 = vadd.f32 %v602_v57, %v572_v21 }
 0x121   : > { %v533_v58 = vadd.f32 %v532_v23, %v1412_v54  ;;  %v604_v63 = vadd.f32 %v603_v60, %v573_v56 }
 0x123   : > { %v534_v61 = vadd.f32 %v533_v58, %v1358_v27  ;;  %v605_v2 = vadd.f32 %v604_v63, %v574_v59 }
 0x125   : > { %v535_v0 = vadd.f32 %v534_v61, %v1366_v31  ;;  %v606_v5 = vadd.f32 %v605_v2, %v575_v62  ;;  %v510_v62 = vld [vmem:[#allocation2] sm:$0x1] }
 0x127   : > { %v536_v3 = vadd.f32 %v535_v0, %v1374_v35  ;;  %v607_v8 = vadd.f32 %v606_v5, %v576_v1 }
 0x129   : > { %v537_v6 = vadd.f32 %v536_v3, %v1382_v39  ;;  %v608_v11 = vadd.f32 %v607_v8, %v577_v4  ;;  %v550_v4 = vld [vmem:[#allocation3] sm:$0x1] }
 0x12b   : > { %v538_v9 = vadd.f32 %v537_v6, %v1390_v43  ;;  %v609_v14 = vadd.f32 %v608_v11, %v578_v7 }
 0x12d   : > { %v539_v12 = vadd.f32 %v538_v9, %v1398_v47  ;;  %v610_v17 = vadd.f32 %v609_v14, %v579_v10 }
 0x12f   : > { %v540_v15 = vadd.f32 %v539_v12, %v1406_v51  ;;  %v611_v20 = vadd.f32 %v610_v17, %v580_v13 }
 0x131   : > { %v541_v18 = vadd.f32 %v540_v15, %v1414_v55  ;;  %v612_v22 = vadd.f32 %v611_v20, %v581_v16 }
 0x133   : > { %v542_v21 = vrot.slane %v541_v18, 4  ;;  %v613_v56 = vadd.f32 %v612_v22, %v582_v19 }
 0x135   : > { %v543_v23 = vadd.f32 %v542_v21, %v541_v18  ;;  %v614_v58 = vrot.slane %v613_v56, 4 }
 0x137   : > { %v544_v57 = vrot.slane %v543_v23, 2  ;;  %v615_v60 = vadd.f32 %v614_v58, %v613_v56 }
 0x139   : > { %v545_v59 = vadd.f32 %v544_v57, %v543_v23  ;;  %v616_v63 = vrot.slane %v615_v60, 2 }
 0x13b   : > { %v546_v61 = vrot.slane %v545_v59, 1  ;;  %v617_v1 = vadd.f32 %v616_v63, %v615_v60 }
 0x13d   : > { %v547_v0 = vadd.f32 %v546_v61, %v545_v59  ;;  %v618_v3 = vrot.slane %v617_v1, 1 }
 0x13f   : > { %v548_v2 = vadd.f32 %v547_v0, %v510_v62  ;;  %v619_v5 = vadd.f32 %v618_v3, %v617_v1 }
 0x141   : > { %549 = vst [vmem:[#allocation2] sm:$0x1] %v548_v2  ;;  %v620_v6 = vadd.f32 %v619_v5, %v550_v4 }
 0x143   : > { %621 = vst [vmem:[#allocation3] sm:$0x1] %v620_v6 }
 0x144 PF: > { %p622_p11 = scmp.eq.s32.totalorder %s1217_s16, 1 }
 0x146   : > { %p623_p12 = pnand %p622_p11, %p500_p8 }
 0x148   : > { %626 = sbr.rel (%p623_p12) target bundleno = 369 (0x171), region = 48 }
 0x14d   : > { %v627_v7 = vld [vmem:[#allocation2] sm:$0x1]  ;;  %v629_v8 = vld [vmem:[#allocation3] sm:$0x1] }
 0x14e   : > { %v628_v9 = vmul.f32 0.001953125, %v627_v7  ;;  %v630_v10 = vmul.f32 0.001953125, %v629_v8  ;;  %v634_v20 = vld [vmem:[%s1658_s2] sm:$0x1] }
 0x14f   : > { %v648_v56 = vld [vmem:[%s1659_s3] sm:$0x1] }
 0x150   : > { %v631_v11 = vmul.f32 %v628_v9, %v628_v9 }
 0x152   : > { %v632_v12 = vsub.f32 %v630_v10, %v631_v11 }
 0x154   : > { %v633_v13 = vmax.f32 %v632_v12, 0.0 }
 0x156   : > { %v635_v14 = vadd.f32 1e-05, %v633_v13 }
 0x158   : > { %1187 = vrsqrt.f32 %v635_v14  ;;  %vm642_vm0 = vweird.f32 %v635_v14 }
 0x15e   : > { %v1188_v15 = vpop.eup %1187 }
 0x15f   : > { %v637_v16 = vmul.f32 %v1188_v15, %v635_v14  ;;  %vm643_vm1 = vweird.f32 %v1188_v15 }
 0x160   : > { %vm644_vm2 = vmor %vm642_vm0, %vm643_vm1 }
 0x161   : > { %v638_v17 = vmul.f32 %v1188_v15, %v637_v16 }
 0x163   : > { %v639_v18 = vmul.f32 0.5, %v638_v17 }
 0x165   : > { %v640_v19 = vsub.f32 1.5, %v639_v18 }
 0x167   : > { %v641_v21 = vmul.f32 %v1188_v15, %v640_v19 }
 0x169   : > { %v645_v22 = vsel %vm644_vm2, %v1188_v15, %v641_v21 }
 0x16a   : > { %v646_v23 = vmul.f32 %v645_v22, %v634_v20 }
 0x16c   : > { %647 = vst [vmem:[#allocation4] sm:$0x1] %v646_v23  ;;  %v649_v57 = vmul.f32 %v646_v23, %v628_v9 }
 0x16e   : > { %v650_v58 = vsub.f32 %v648_v56, %v649_v57 }
 0x170   : > { %651 = vst [vmem:[#allocation5] sm:$0x1] %v650_v58 }
 0x171 PF: > { %p1000_p13 = scmp.ne.s32.totalorder %s1217_s16, 1 }
 0x173   : > { %654 = sbr.rel (%p1000_p13) target bundleno = 410 (0x19a), region = 52 }
 0x178   : > { %v1525_v59 = vld [vmem:[#allocation4] ss:$0 sm:$0xff]  ;;  %v1527_v60 = vld [vmem:[#allocation5] ss:$0 sm:$0xff] }
 0x179   : > { %v659_v61 = vmul.f32 %v1525_v59, %v1352_v24  ;;  %v660_v62 = vmul.f32 %v1525_v59, %v1360_v28  ;;  %v661_v63 = vmul.f32 %v1525_v59, %v1368_v32  ;;  %v662_v0 = vmul.f32 %v1525_v59, %v1376_v36 }
 0x17a   : > { %v663_v1 = vmul.f32 %v1525_v59, %v1384_v40  ;;  %v664_v2 = vmul.f32 %v1525_v59, %v1392_v44  ;;  %v665_v3 = vmul.f32 %v1525_v59, %v1400_v48  ;;  %v666_v24 = vmul.f32 %v1525_v59, %v1408_v52 }
 0x17b   : > { %v695_v28 = vadd.f32 %v1527_v60, %v659_v61  ;;  %v696_v4 = vadd.f32 %v1527_v60, %v660_v62  ;;  %v697_v32 = vadd.f32 %v1527_v60, %v661_v63  ;;  %v698_v36 = vadd.f32 %v1527_v60, %v662_v0 }
 0x17c   : > { %v699_v5 = vadd.f32 %v1527_v60, %v663_v1  ;;  %v700_v40 = vadd.f32 %v1527_v60, %v664_v2  ;;  %v701_v44 = vadd.f32 %v1527_v60, %v665_v3  ;;  %v702_v6 = vadd.f32 %v1527_v60, %v666_v24 }
 0x17d   : > { %v727_v48 = vmax.f32 %v695_v28, 0.0  ;;  %v728_v7 = vmax.f32 %v696_v4, 0.0  ;;  %v729_v52 = vmax.f32 %v697_v32, 0.0  ;;  %v730_v8 = vmax.f32 %v698_v36, 0.0 }
 0x17e   : > { %v731_v9 = vmax.f32 %v699_v5, 0.0  ;;  %v732_v10 = vmax.f32 %v700_v40, 0.0  ;;  %v733_v11 = vmax.f32 %v701_v44, 0.0  ;;  %v734_v12 = vmax.f32 %v702_v6, 0.0 }
 0x17f   : > { %v1030_v13 = vpack.c.bf16 %v728_v7, %v727_v48  ;;  %v1035_v14 = vpack.c.bf16 %v730_v8, %v729_v52  ;;  %v667_v15 = vmul.f32 %v1525_v59, %v1354_v25  ;;  %v668_v16 = vmul.f32 %v1525_v59, %v1362_v29 }
 0x180   : > { %v1040_v17 = vpack.c.bf16 %v732_v10, %v731_v9  ;;  %v1045_v18 = vpack.c.bf16 %v734_v12, %v733_v11  ;;  %v669_v19 = vmul.f32 %v1525_v59, %v1370_v33  ;;  %v670_v20 = vmul.f32 %v1525_v59, %v1378_v37 }
 0x181   : > { %1031 = vst [vmem:[%s1305_s7] sm:$0xff] %v1030_v13   ;;  %v703_v21 = vadd.f32 %v1527_v60, %v667_v15  ;;  %v704_v22 = vadd.f32 %v1527_v60, %v668_v16  ;;  %v671_v25 = vmul.f32 %v1525_v59, %v1386_v41  ;;  %v672_v29 = vmul.f32 %v1525_v59, %v1394_v45 }
 0x182   : > { %1107 = vst [vmem:[%s1305_s7 + $0x8] sm:$0xff] %v1035_v14   ;;  %v705_v23 = vadd.f32 %v1527_v60, %v669_v19  ;;  %v706_v33 = vadd.f32 %v1527_v60, %v670_v20  ;;  %v673_v37 = vmul.f32 %v1525_v59, %v1402_v49  ;;  %v674_v56 = vmul.f32 %v1525_v59, %v1410_v53 }
 0x183   : > { %1108 = vst [vmem:[%s1305_s7 + $0x10] sm:$0xff] %v1040_v17   ;;  %v735_v57 = vmax.f32 %v703_v21, 0.0  ;;  %v736_v58 = vmax.f32 %v704_v22, 0.0  ;;  %v707_v41 = vadd.f32 %v1527_v60, %v671_v25  ;;  %v708_v61 = vadd.f32 %v1527_v60, %v672_v29 }
 0x184   : > { %1109 = vst [vmem:[%s1305_s7 + $0x18] sm:$0xff] %v1045_v18   ;;  %v737_v45 = vmax.f32 %v705_v23, 0.0  ;;  %v738_v62 = vmax.f32 %v706_v33, 0.0  ;;  %v709_v63 = vadd.f32 %v1527_v60, %v673_v37  ;;  %v710_v0 = vadd.f32 %v1527_v60, %v674_v56 }
 0x185   : > { %v1050_v49 = vpack.c.bf16 %v736_v58, %v735_v57  ;;  %v739_v1 = vmax.f32 %v707_v41, 0.0  ;;  %v740_v2 = vmax.f32 %v708_v61, 0.0  ;;  %v675_v53 = vmul.f32 %v1525_v59, %v1356_v26 }
 0x186   : > { %v1055_v3 = vpack.c.bf16 %v738_v62, %v737_v45  ;;  %v741_v24 = vmax.f32 %v709_v63, 0.0  ;;  %v742_v28 = vmax.f32 %v710_v0, 0.0  ;;  %v676_v4 = vmul.f32 %v1525_v59, %v1364_v30 }
 0x187   : > { %1110 = vst [vmem:[%s1305_s7 + $0x20] sm:$0xff] %v1050_v49   ;;  %v1060_v32 = vpack.c.bf16 %v740_v2, %v739_v1  ;;  %v711_v36 = vadd.f32 %v1527_v60, %v675_v53  ;;  %v677_v5 = vmul.f32 %v1525_v59, %v1372_v34  ;;  %v678_v40 = vmul.f32 %v1525_v59, %v1380_v38 }
 0x188   : > { %1111 = vst [vmem:[%s1305_s7 + $0x28] sm:$0xff] %v1055_v3   ;;  %v1065_v44 = vpack.c.bf16 %v742_v28, %v741_v24  ;;  %v712_v26 = vadd.f32 %v1527_v60, %v676_v4  ;;  %v679_v6 = vmul.f32 %v1525_v59, %v1388_v42  ;;  %v680_v30 = vmul.f32 %v1525_v59, %v1396_v46 }
 0x189   : > { %1112 = vst [vmem:[%s1305_s7 + $0x30] sm:$0xff] %v1060_v32   ;;  %v743_v48 = vmax.f32 %v711_v36, 0.0  ;;  %v713_v7 = vadd.f32 %v1527_v60, %v677_v5  ;;  %v714_v52 = vadd.f32 %v1527_v60, %v678_v40  ;;  %v681_v34 = vmul.f32 %v1525_v59, %v1404_v50 }
 0x18a   : > { %1113 = vst [vmem:[%s1305_s7 + $0x38] sm:$0xff] %v1065_v44   ;;  %v744_v38 = vmax.f32 %v712_v26, 0.0  ;;  %v715_v8 = vadd.f32 %v1527_v60, %v679_v6  ;;  %v716_v9 = vadd.f32 %v1527_v60, %v680_v30  ;;  %v682_v42 = vmul.f32 %v1525_v59, %v1412_v54 }
 0x18b   : > { %v745_v46 = vmax.f32 %v713_v7, 0.0  ;;  %v746_v10 = vmax.f32 %v714_v52, 0.0  ;;  %v717_v11 = vadd.f32 %v1527_v60, %v681_v34  ;;  %v683_v12 = vmul.f32 %v1525_v59, %v1358_v27 }
 0x18c   : > { %v1070_v13 = vpack.c.bf16 %v744_v38, %v743_v48  ;;  %v747_v50 = vmax.f32 %v715_v8, 0.0  ;;  %v748_v14 = vmax.f32 %v716_v9, 0.0  ;;  %v718_v15 = vadd.f32 %v1527_v60, %v682_v42 }
 0x18d   : > { %v1075_v16 = vpack.c.bf16 %v746_v10, %v745_v46  ;;  %v749_v17 = vmax.f32 %v717_v11, 0.0  ;;  %v684_v18 = vmul.f32 %v1525_v59, %v1366_v31  ;;  %v719_v54 = vadd.f32 %v1527_v60, %v683_v12 }
 0x18e   : > { %1114 = vst [vmem:[%s1305_s7 + $0x40] sm:$0xff] %v1070_v13   ;;  %v1080_v19 = vpack.c.bf16 %v748_v14, %v747_v50  ;;  %v750_v20 = vmax.f32 %v718_v15, 0.0  ;;  %v685_v21 = vmul.f32 %v1525_v59, %v1374_v35  ;;  %v686_v27 = vmul.f32 %v1525_v59, %v1382_v39 }
 0x18f   : > { %1115 = vst [vmem:[%s1305_s7 + $0x48] sm:$0xff] %v1075_v16   ;;  %v720_v22 = vadd.f32 %v1527_v60, %v684_v18  ;;  %v751_v25 = vmax.f32 %v719_v54, 0.0  ;;  %v687_v29 = vmul.f32 %v1525_v59, %v1390_v43  ;;  %v688_v31 = vmul.f32 %v1525_v59, %v1398_v47 }
 0x190   : > { %1116 = vst [vmem:[%s1305_s7 + $0x50] sm:$0xff] %v1080_v19   ;;  %v1085_v23 = vpack.c.bf16 %v750_v20, %v749_v17  ;;  %v721_v33 = vadd.f32 %v1527_v60, %v685_v21  ;;  %v722_v35 = vadd.f32 %v1527_v60, %v686_v27  ;;  %v689_v39 = vmul.f32 %v1525_v59, %v1406_v51 }
 0x191   : > { %v752_v37 = vmax.f32 %v720_v22, 0.0  ;;  %v723_v56 = vadd.f32 %v1527_v60, %v687_v29  ;;  %v724_v57 = vadd.f32 %v1527_v60, %v688_v31  ;;  %v690_v43 = vmul.f32 %v1525_v59, %v1414_v55 }
 0x192   : > { %1117 = vst [vmem:[%s1305_s7 + $0x58] sm:$0xff] %v1085_v23   ;;  %v753_v47 = vmax.f32 %v721_v33, 0.0  ;;  %v754_v58 = vmax.f32 %v722_v35, 0.0  ;;  %v725_v41 = vadd.f32 %v1527_v60, %v689_v39 }
 0x193   : > { %v1090_v61 = vpack.c.bf16 %v752_v37, %v751_v25  ;;  %v755_v45 = vmax.f32 %v723_v56, 0.0  ;;  %v756_v62 = vmax.f32 %v724_v57, 0.0  ;;  %v726_v51 = vadd.f32 %v1527_v60, %v690_v43 }
 0x194   : > { %v1095_v63 = vpack.c.bf16 %v754_v58, %v753_v47  ;;  %v757_v0 = vmax.f32 %v725_v41, 0.0 }
 0x195   : > { %1118 = vst [vmem:[%s1305_s7 + $0x60] sm:$0xff] %v1090_v61   ;;  %v1100_v49 = vpack.c.bf16 %v756_v62, %v755_v45  ;;  %v758_v1 = vmax.f32 %v726_v51, 0.0 }
 0x196   : > { %1119 = vst [vmem:[%s1305_s7 + $0x68] sm:$0xff] %v1095_v63  }
 0x197   : > { %1120 = vst [vmem:[%s1305_s7 + $0x70] sm:$0xff] %v1100_v49   ;;  %v1105_v2 = vpack.c.bf16 %v758_v1, %v757_v0 }
 0x199   : > { %1121 = vst [vmem:[%s1305_s7 + $0x78] sm:$0xff] %v1105_v2  }
 0x19a PF: > { %s14_s19 = sadd.s32 1, %s1229_s19   ;;  %s1662_s15 = smov %s1221_s17 }
 0x19b   : > { %p11_p0 = scmp.ge.s32.totalorder %s14_s19, 6   ;;  %s1663_s16 = smov %s1225_s18 }
 0x19c   : > { %s1664_s17 = smov %s1667_s20  ;;  %s1665_s18 = smov %s1671_s21 }
 0x19d   :  { %13 = sbr.rel (!%p11_p0) target bundleno = 3 (0x3), region = 82 }

// kernel: bottleneck_forward.5
= control target key start
LH: loop header
LB: loop body
LE: loop exit
PB: predicated region body
PF: predicated region fallthrough
CT: control target
= control target key end

     0   :  { %13 = vsyncpa [#allocation11], 0  ;;  %s1891_s0 = inlined_call_operand.vmem [shape: bf16[128,128], index: 0, kind: input, shape index: {}]   ;;  %s1892_s1 = inlined_call_operand.vmem [shape: bf16[128,128], index: 1, kind: input, shape index: {}]   ;;  %s1893_s2 = inlined_call_operand.vmem [shape: f32[1,128], index: 2, kind: input, shape index: {}]   ;;  %s1894_s3 = inlined_call_operand.vmem [shape: f32[1,128], index: 3, kind: input, shape index: {}]   ;;  %s1895_s4 = inlined_call_operand.vmem [shape: bf16[128,128], index: 4, kind: input, shape index: {}]   ;;  %s1896_s5 = inlined_call_operand.vmem [shape: bf16[128,128], index: 5, kind: input, shape index: {}]   ;;  %s1897_s6 = inlined_call_operand.vmem [shape: f32[1,128], index: 6, kind: input, shape index: {}]   ;;  %s1898_s7 = inlined_call_operand.vmem [shape: f32[1,128], index: 7, kind: input, shape index: {}]   ;;  %s1899_s8 = inlined_call_operand.hbm [shape: f32[128,128], index: 8, kind: output, shape index: {}]  }
   0x1   :  { %15 = vsyncpa [#allocation11 + $0x1], 0  ;;  %s1474_s27 = smov 0   ;;  %s1476_s28 = smov 0  }
   0x2   :  { %s1478_s29 = smov 0  }
   0x3 LB: > { %s1130_s30 = sadd.s32 4294967295, %s1423_s29   ;;  %s1131_s9 = sadd.s32 4294967294, %s1423_s29   ;;  %s1423_s29 = sphi %s1478_s29, %s21_s29   ;;  %s1419_s28 = sphi %s1476_s28, %s1901_s28   ;;  %s1415_s27 = sphi %s1474_s27, %s1900_s27  }
   0x4   : > { %s33_s10 = sadd.s32 1, %s1419_s28  ;;  %p1135_p0 = scmp.ge.s32.totalorder %s1423_s29, 1 }
   0x5   : > { %p35_p1 = scmp.ge.s32.totalorder %s33_s10, 2  ;;  %p291_p2 = scmp.lt.s32.totalorder %s1423_s29, 3 }
   0x7   : > { %s1903_s10 = smov (%p35_p1, %s33_s10), 0  ;;  %p292_p3 = pnand %p1135_p0, %p291_p2 }
   0x8   : > { %p698_p4 = scmp.eq.s32.totalorder (!%p292_p3), %s1415_s27, 0 }
   0x9   : > { %295 = sbr.rel (%p292_p3) target bundleno = 374 (0x176), region = 52 }
   0xe   : > { %v1287_v0 = vld [vmem:[%s1892_s1 + $0x38] sm:$0xff]  ;;  %v1286_v2 = vld [vmem:[%s1892_s1 + $0x30] sm:$0xff]  ;;  %v1285_v4 = vld [vmem:[%s1892_s1 + $0x28] sm:$0xff] }
   0xf   : > { %v1303_v1 = vld [vmem:[%s1896_s5 + $0x38] sm:$0xff]  ;;  %472 = vmatpush.bf16.msra.mxu0 %v1287_v0  ;;  %1306 = vmatpush.bf16.msra.mxu2 %v1287_v0  ;;  %v1302_v3 = vld [vmem:[%s1896_s5 + $0x30] sm:$0xff]  ;;  %v1301_v5 = vld [vmem:[%s1896_s5 + $0x28] sm:$0xff]  ;;  %v1425_v0 = vmov (%p698_p4), 0.0  }
  0x10   : > { %649 = vmatpush.bf16.msra.mxu1 %v1303_v1  ;;  %1314 = vmatpush.bf16.msra.mxu3 %v1303_v1  ;;  %v1284_v6 = vld [vmem:[%s1892_s1 + $0x20] sm:$0xff]  ;;  %v1283_v8 = vld [vmem:[%s1892_s1 + $0x18] sm:$0xff]  ;;  %v1282_v10 = vld [vmem:[%s1892_s1 + $0x10] sm:$0xff]  ;;  %704 = vst [vmem:[#allocation2] sm:$0x1] (%p698_p4), %v1425_v0 }
  0x11   : > { %v1300_v7 = vld [vmem:[%s1896_s5 + $0x20] sm:$0xff]  ;;  %v1299_v9 = vld [vmem:[%s1896_s5 + $0x18] sm:$0xff]  ;;  %v1298_v11 = vld [vmem:[%s1896_s5 + $0x10] sm:$0xff]  ;;  %705 = vst [vmem:[#allocation3] sm:$0x1] (%p698_p4), %v1425_v0 }
  0x12   : > { %v1281_v12 = vld [vmem:[%s1892_s1 + $0x8] sm:$0xff]  ;;  %v1280_v14 = vld [vmem:[%s1892_s1] sm:$0xff]  ;;  %v1274_v24 = vld [vmem:[%s1891_s0 + $0x10] sm:$0xff]  ;;  %706 = vst [vmem:[#allocation6] sm:$0x1] (%p698_p4), %v1425_v0 }
  0x13   : > { %473 = vmatpush.bf16.msra.mxu0 %v1286_v2  ;;  %1307 = vmatpush.bf16.msra.mxu2 %v1286_v2  ;;  %v1297_v13 = vld [vmem:[%s1896_s5 + $0x8] sm:$0xff]  ;;  %v1296_v15 = vld [vmem:[%s1896_s5] sm:$0xff]  ;;  %v1278_v25 = vld [vmem:[%s1891_s0 + $0x30] sm:$0xff]  ;;  %707 = vst [vmem:[#allocation7] sm:$0x1] (%p698_p4), %v1425_v0 }
  0x14   : > { %650 = vmatpush.bf16.msra.mxu1 %v1302_v3  ;;  %1315 = vmatpush.bf16.msra.mxu3 %v1302_v3  ;;  %v1272_v16 = vld [vmem:[%s1891_s0] sm:$0xff]  ;;  %v1273_v20 = vld [vmem:[%s1891_s0 + $0x8] sm:$0xff]  ;;  %v1290_v26 = vld [vmem:[%s1895_s4 + $0x10] sm:$0xff] }
  0x15   : > { %v1276_v17 = vld [vmem:[%s1891_s0 + $0x20] sm:$0xff]  ;;  %v1277_v21 = vld [vmem:[%s1891_s0 + $0x28] sm:$0xff]  ;;  %v1294_v27 = vld [vmem:[%s1895_s4 + $0x30] sm:$0xff] }
  0x16   : > { %v1288_v18 = vld [vmem:[%s1895_s4] sm:$0xff]  ;;  %v1289_v22 = vld [vmem:[%s1895_s4 + $0x8] sm:$0xff]  ;;  %v1275_v28 = vld [vmem:[%s1891_s0 + $0x18] sm:$0xff] }
  0x17   : > { %474 = vmatpush.bf16.msra.mxu0 %v1285_v4  ;;  %1308 = vmatpush.bf16.msra.mxu2 %v1285_v4  ;;  %v1292_v19 = vld [vmem:[%s1895_s4 + $0x20] sm:$0xff]  ;;  %v1293_v23 = vld [vmem:[%s1895_s4 + $0x28] sm:$0xff]  ;;  %v1279_v29 = vld [vmem:[%s1891_s0 + $0x38] sm:$0xff] }
  0x18   : > { %651 = vmatpush.bf16.msra.mxu1 %v1301_v5  ;;  %1316 = vmatpush.bf16.msra.mxu3 %v1301_v5  ;;  %v1291_v30 = vld [vmem:[%s1895_s4 + $0x18] sm:$0xff] }
  0x19   : > { %v1295_v31 = vld [vmem:[%s1895_s4 + $0x38] sm:$0xff] }
  0x1b   : > { %475 = vmatpush.bf16.msra.mxu0 %v1284_v6  ;;  %1309 = vmatpush.bf16.msra.mxu2 %v1284_v6 }
  0x1c   : > { %652 = vmatpush.bf16.msra.mxu1 %v1300_v7  ;;  %1317 = vmatpush.bf16.msra.mxu3 %v1300_v7 }
  0x1f   : > { %476 = vmatpush.bf16.msra.mxu0 %v1283_v8  ;;  %1310 = vmatpush.bf16.msra.mxu2 %v1283_v8 }
  0x20   : > { %653 = vmatpush.bf16.msra.mxu1 %v1299_v9  ;;  %1318 = vmatpush.bf16.msra.mxu3 %v1299_v9 }
  0x23   : > { %477 = vmatpush.bf16.msra.mxu0 %v1282_v10  ;;  %1311 = vmatpush.bf16.msra.mxu2 %v1282_v10 }
  0x24   : > { %654 = vmatpush.bf16.msra.mxu1 %v1298_v11  ;;  %1319 = vmatpush.bf16.msra.mxu3 %v1298_v11 }
  0x27   : > { %478 = vmatpush.bf16.msra.mxu0 %v1281_v12  ;;  %1312 = vmatpush.bf16.msra.mxu2 %v1281_v12 }
  0x28   : > { %655 = vmatpush.bf16.msra.mxu1 %v1297_v13  ;;  %1320 = vmatpush.bf16.msra.mxu3 %v1297_v13 }
  0x2b   : > { %479 = vmatpush.bf16.msra.mxu0 %v1280_v14  ;;  %1313 = vmatpush.bf16.msra.mxu2 %v1280_v14 }
  0x2c   : > { %656 = vmatpush.bf16.msra.mxu1 %v1296_v15  ;;  %1321 = vmatpush.bf16.msra.mxu3 %v1296_v15 }
  0x2e   : > { %480 = vmatmul.bf16.vlgmr.msra.gmra.mxu0 %v1272_v16  ;;  %500 = vmatmul.bf16.vlgmr.msra.gmra.mxu2 %v1276_v17 }
  0x2f   : > { %657 = vmatmul.bf16.vlgmr.msra.gmra.mxu1 %v1288_v18  ;;  %677 = vmatmul.bf16.vlgmr.msra.gmra.mxu3 %v1292_v19 }
  0x3e   : > { %485 = vmatmul.bf16.gmra.mxu0 %v1273_v20  ;;  %505 = vmatmul.bf16.gmra.mxu2 %v1277_v21 }
  0x3f   : > { %662 = vmatmul.bf16.gmra.mxu1 %v1289_v22  ;;  %682 = vmatmul.bf16.gmra.mxu3 %v1293_v23 }
  0x4e   : > { %490 = vmatmul.bf16.gmra.mxu0 %v1274_v24  ;;  %510 = vmatmul.bf16.gmra.mxu2 %v1278_v25 }
  0x4f   : > { %667 = vmatmul.bf16.gmra.mxu1 %v1290_v26  ;;  %687 = vmatmul.bf16.gmra.mxu3 %v1294_v27 }
  0x5e   : > { %495 = vmatmul.bf16.gmra.mxu0 %v1275_v28  ;;  %515 = vmatmul.bf16.gmra.mxu2 %v1279_v29 }
  0x5f   : > { %672 = vmatmul.bf16.gmra.mxu1 %v1291_v30  ;;  %692 = vmatmul.bf16.gmra.mxu3 %v1295_v31 }
  0xab   : > { %v1593_v32 = vpop.f32.mrf.mxu0 }
  0xac   : > { %v1595_v33 = vpop.f32.mrf.mxu1 }
  0xb1   : > { %v1597_v34 = vpop.f32.mrf.mxu2 }
  0xb2   : > { %v1599_v35 = vpop.f32.mrf.mxu3 }
  0xb3   : > { %v1601_v36 = vpop.f32.mrf.mxu0 }
  0xb4   : > { %v1603_v37 = vpop.f32.mrf.mxu1 }
  0xb9   : > { %v1605_v38 = vpop.f32.mrf.mxu2 }
  0xba   : > { %v1607_v39 = vpop.f32.mrf.mxu3 }
  0xbb   : > { %v1609_v40 = vpop.f32.mrf.mxu0 }
  0xbc   : > { %v1611_v41 = vpop.f32.mrf.mxu1 }
  0xc1   : > { %v1613_v42 = vpop.f32.mrf.mxu2 }
  0xc2   : > { %v1615_v43 = vpop.f32.mrf.mxu3 }
  0xc3   : > { %v1617_v44 = vpop.f32.mrf.mxu0 }
  0xc4   : > { %v1619_v45 = vpop.f32.mrf.mxu1 }
  0xc9   : > { %v1621_v46 = vpop.f32.mrf.mxu2 }
  0xca   : > { %v1623_v47 = vpop.f32.mrf.mxu3 }
  0xcb   : > { %v1625_v48 = vpop.f32.mrf.mxu0 }
  0xcc   : > { %v1627_v49 = vpop.f32.mrf.mxu1 }
  0xd1   : > { %v1629_v50 = vpop.f32.mrf.mxu2 }
  0xd2   : > { %v1631_v51 = vpop.f32.mrf.mxu3 }
  0xd3   : > { %v1633_v52 = vpop.f32.mrf.mxu0 }
  0xd4   : > { %v1635_v53 = vpop.f32.mrf.mxu1 }
  0xd9   : > { %v1637_v54 = vpop.f32.mrf.mxu2 }
  0xda   : > { %v1639_v55 = vpop.f32.mrf.mxu3 }
  0xdb   : > { %v1641_v56 = vpop.f32.mrf.mxu0 }
  0xdc   : > { %v1643_v57 = vpop.f32.mrf.mxu1 }
  0xe1   : > { %v1645_v58 = vpop.f32.mrf.mxu2 }
  0xe2   : > { %v1647_v59 = vpop.f32.mrf.mxu3 }
  0xe3   : > { %v1649_v60 = vpop.f32.mrf.mxu0 }
  0xe4   : > { %v1651_v61 = vpop.f32.mrf.mxu1 }
  0xe6   : > { %703 = sbr.rel (!%p698_p4) target bundleno = 235 (0xeb), region = 56 }
  0xe9   : > { %v1653_v62 = vpop.f32.mrf.mxu2 }
  0xea   : > { %v1655_v63 = vpop.f32.mrf.mxu3 }
  0xeb PF: > { %p1265_p5 = scmp.ne.s32.totalorder %s1415_s27, 0 }
  0xed   : > { %710 = sbr.rel (%p1265_p5) target bundleno = 291 (0x123), region = 60 }
  0xf2   : > { %v712_v1 = vadd.f32 %v1601_v36, %v1593_v32  ;;  %v736_v2 = vmul.f32 %v1593_v32, %v1593_v32  ;;  %v737_v3 = vmul.f32 %v1601_v36, %v1601_v36  ;;  %v738_v5 = vmul.f32 %v1609_v40, %v1609_v40 }
  0xf3   : > { %v739_v7 = vmul.f32 %v1617_v44, %v1617_v44  ;;  %v776_v9 = vadd.f32 %v1603_v37, %v1595_v33  ;;  %v740_v11 = vmul.f32 %v1625_v48, %v1625_v48  ;;  %v800_v14 = vmul.f32 %v1595_v33, %v1595_v33 }
  0xf4   : > { %v713_v4 = vadd.f32 %v712_v1, %v1609_v40  ;;  %v752_v8 = vadd.f32 %v737_v3, %v736_v2  ;;  %v801_v15 = vmul.f32 %v1603_v37, %v1603_v37  ;;  %v741_v17 = vmul.f32 %v1633_v52, %v1633_v52 }
  0xf5   : > { %v777_v13 = vadd.f32 %v776_v9, %v1611_v41  ;;  %v802_v20 = vmul.f32 %v1611_v41, %v1611_v41  ;;  %v742_v22 = vmul.f32 %v1641_v56, %v1641_v56  ;;  %v803_v25 = vmul.f32 %v1619_v45, %v1619_v45 }
  0xf6   : > { %v714_v6 = vadd.f32 %v713_v4, %v1617_v44  ;;  %v753_v12 = vadd.f32 %v752_v8, %v738_v5  ;;  %v816_v26 = vadd.f32 %v801_v15, %v800_v14  ;;  %v743_v28 = vmul.f32 %v1649_v60, %v1649_v60 }
  0xf7   : > { %v778_v19 = vadd.f32 %v777_v13, %v1619_v45  ;;  %v804_v31 = vmul.f32 %v1627_v49, %v1627_v49  ;;  %v744_v2 = vmul.f32 %v1597_v34, %v1597_v34  ;;  %v805_v5 = vmul.f32 %v1635_v53, %v1635_v53 }
  0xf8   : > { %v715_v10 = vadd.f32 %v714_v6, %v1625_v48  ;;  %v754_v18 = vadd.f32 %v753_v12, %v739_v7  ;;  %v817_v0 = vadd.f32 %v816_v26, %v802_v20  ;;  %v745_v8 = vmul.f32 %v1605_v38, %v1605_v38 }
  0xf9   : > { %v779_v24 = vadd.f32 %v778_v19, %v1627_v49  ;;  %v746_v14 = vmul.f32 %v1613_v42, %v1613_v42  ;;  %v747_v20 = vmul.f32 %v1621_v46, %v1621_v46  ;;  %v748_v26 = vmul.f32 %v1629_v50, %v1629_v50 }
  0xfa   : > { %v716_v16 = vadd.f32 %v715_v10, %v1633_v52  ;;  %v755_v23 = vadd.f32 %v754_v18, %v740_v11  ;;  %v818_v6 = vadd.f32 %v817_v0, %v803_v25  ;;  %v806_v11 = vmul.f32 %v1643_v57, %v1643_v57 }
  0xfb   : > { %v780_v30 = vadd.f32 %v779_v24, %v1635_v53  ;;  %v749_v0 = vmul.f32 %v1637_v54, %v1637_v54 }
  0xfc   : > { %v717_v21 = vadd.f32 %v716_v16, %v1641_v56  ;;  %v756_v29 = vadd.f32 %v755_v23, %v741_v17  ;;  %v819_v12 = vadd.f32 %v818_v6, %v804_v31  ;;  %v807_v17 = vmul.f32 %v1651_v61, %v1651_v61 }
  0xfd   : > { %v781_v4 = vadd.f32 %v780_v30, %v1643_v57  ;;  %v808_v23 = vmul.f32 %v1599_v35, %v1599_v35  ;;  %v750_v6 = vmul.f32 %v1645_v58, %v1645_v58 }
  0xfe   : > { %v718_v27 = vadd.f32 %v717_v21, %v1649_v60  ;;  %v757_v3 = vadd.f32 %v756_v29, %v742_v22  ;;  %v820_v18 = vadd.f32 %v819_v12, %v805_v5  ;;  %v809_v29 = vmul.f32 %v1607_v39, %v1607_v39 }
  0xff   : > { %v782_v10 = vadd.f32 %v781_v4, %v1651_v61  ;;  %v751_v12 = vmul.f32 %v1653_v62, %v1653_v62 }
 0x100   : > { %v719_v1 = vadd.f32 %v718_v27, %v1597_v34  ;;  %v758_v9 = vadd.f32 %v757_v3, %v743_v28  ;;  %v821_v24 = vadd.f32 %v820_v18, %v806_v11  ;;  %v810_v3 = vmul.f32 %v1615_v43, %v1615_v43 }
 0x101   : > { %v783_v16 = vadd.f32 %v782_v10, %v1599_v35 }
 0x102   : > { %v720_v7 = vadd.f32 %v719_v1, %v1605_v38  ;;  %v759_v15 = vadd.f32 %v758_v9, %v744_v2  ;;  %v822_v30 = vadd.f32 %v821_v24, %v807_v17  ;;  %v811_v9 = vmul.f32 %v1623_v47, %v1623_v47 }
 0x103   : > { %v784_v22 = vadd.f32 %v783_v16, %v1607_v39 }
 0x104   : > { %v721_v13 = vadd.f32 %v720_v7, %v1613_v42  ;;  %v760_v21 = vadd.f32 %v759_v15, %v745_v8  ;;  %v823_v4 = vadd.f32 %v822_v30, %v808_v23  ;;  %v812_v15 = vmul.f32 %v1631_v51, %v1631_v51 }
 0x105   : > { %v785_v28 = vadd.f32 %v784_v22, %v1615_v43  ;;  %v815_v30 = vmul.f32 %v1655_v63, %v1655_v63 }
 0x106   : > { %v722_v19 = vadd.f32 %v721_v13, %v1621_v46  ;;  %v761_v27 = vadd.f32 %v760_v21, %v746_v14  ;;  %v824_v10 = vadd.f32 %v823_v4, %v809_v29 }
 0x107   : > { %v786_v2 = vadd.f32 %v785_v28, %v1623_v47 }
 0x108   : > { %v723_v25 = vadd.f32 %v722_v19, %v1629_v50  ;;  %v762_v1 = vadd.f32 %v761_v27, %v747_v20  ;;  %v825_v16 = vadd.f32 %v824_v10, %v810_v3  ;;  %v813_v20 = vmul.f32 %v1639_v55, %v1639_v55 }
 0x109   : > { %v787_v8 = vadd.f32 %v786_v2, %v1631_v51 }
 0x10a   : > { %v724_v31 = vadd.f32 %v723_v25, %v1637_v54  ;;  %v763_v7 = vadd.f32 %v762_v1, %v748_v26  ;;  %v826_v21 = vadd.f32 %v825_v16, %v811_v9  ;;  %v814_v25 = vmul.f32 %v1647_v59, %v1647_v59 }
 0x10b   : > { %v788_v14 = vadd.f32 %v787_v8, %v1639_v55 }
 0x10c   : > { %v725_v5 = vadd.f32 %v724_v31, %v1645_v58  ;;  %v764_v13 = vadd.f32 %v763_v7, %v749_v0  ;;  %v827_v26 = vadd.f32 %v826_v21, %v812_v15  ;;  %v735_v15 = vld [vmem:[#allocation3] sm:$0x1] }
 0x10d   : > { %v789_v19 = vadd.f32 %v788_v14, %v1647_v59 }
 0x10e   : > { %v726_v11 = vadd.f32 %v725_v5, %v1653_v62  ;;  %v765_v18 = vadd.f32 %v764_v13, %v750_v6  ;;  %v828_v31 = vadd.f32 %v827_v26, %v813_v20  ;;  %v711_v6 = vld [vmem:[#allocation2] sm:$0x1]  ;;  %v799_v26 = vld [vmem:[#allocation7] sm:$0x1] }
 0x10f   : > { %v790_v24 = vadd.f32 %v789_v19, %v1655_v63  ;;  %v775_v19 = vld [vmem:[#allocation6] sm:$0x1] }
 0x110   : > { %v727_v17 = vrot.slane %v726_v11, 4  ;;  %v766_v23 = vadd.f32 %v765_v18, %v751_v12  ;;  %v829_v3 = vadd.f32 %v828_v31, %v814_v25 }
 0x111   : > { %v791_v29 = vrot.slane %v790_v24, 4 }
 0x112   : > { %v728_v22 = vadd.f32 %v727_v17, %v726_v11  ;;  %v767_v28 = vrot.slane %v766_v23, 4  ;;  %v830_v8 = vadd.f32 %v829_v3, %v815_v30 }
 0x113   : > { %v792_v2 = vadd.f32 %v791_v29, %v790_v24 }
 0x114   : > { %v729_v27 = vrot.slane %v728_v22, 2  ;;  %v768_v1 = vadd.f32 %v767_v28, %v766_v23  ;;  %v831_v12 = vrot.slane %v830_v8, 4 }
 0x115   : > { %v793_v7 = vrot.slane %v792_v2, 2 }
 0x116   : > { %v730_v0 = vadd.f32 %v729_v27, %v728_v22  ;;  %v769_v5 = vrot.slane %v768_v1, 2  ;;  %v832_v17 = vadd.f32 %v831_v12, %v830_v8 }
 0x117   : > { %v794_v11 = vadd.f32 %v793_v7, %v792_v2 }
 0x118   : > { %v731_v4 = vrot.slane %v730_v0, 1  ;;  %v770_v10 = vadd.f32 %v769_v5, %v768_v1  ;;  %v833_v21 = vrot.slane %v832_v17, 2 }
 0x119   : > { %v795_v16 = vrot.slane %v794_v11, 1 }
 0x11a   : > { %v732_v9 = vadd.f32 %v731_v4, %v730_v0  ;;  %v771_v14 = vrot.slane %v770_v10, 1  ;;  %v834_v24 = vadd.f32 %v833_v21, %v832_v17 }
 0x11b   : > { %v796_v20 = vadd.f32 %v795_v16, %v794_v11 }
 0x11c   : > { %v733_v13 = vadd.f32 %v732_v9, %v711_v6  ;;  %v772_v18 = vadd.f32 %v771_v14, %v770_v10  ;;  %v835_v25 = vrot.slane %v834_v24, 1 }
 0x11d   : > { %v797_v23 = vadd.f32 %v796_v20, %v775_v19 }
 0x11e   : > { %734 = vst [vmem:[#allocation2] sm:$0x1] %v733_v13  ;;  %v773_v22 = vadd.f32 %v772_v18, %v735_v15  ;;  %v836_v27 = vadd.f32 %v835_v25, %v834_v24 }
 0x11f   : > { %798 = vst [vmem:[#allocation6] sm:$0x1] %v797_v23 }
 0x120   : > { %774 = vst [vmem:[#allocation3] sm:$0x1] %v773_v22  ;;  %v837_v28 = vadd.f32 %v836_v27, %v799_v26 }
 0x122   : > { %838 = vst [vmem:[#allocation7] sm:$0x1] %v837_v28 }
 0x123 PF: > { %p839_p6 = scmp.eq.s32.totalorder %s1415_s27, 1 }
 0x124   : > { %v851_v23 = vld [vmem:[%s1893_s2] sm:$0x1] (%p839_p6) }
 0x125   : > { %843 = sbr.rel (!%p839_p6) target bundleno = 331 (0x14b), region = 64  ;;  %v844_v29 = vld [vmem:[#allocation2] sm:$0x1] (%p839_p6) }
 0x126   : > { %v845_v31 = vmul.f32 (%p839_p6), 0.0078125, %v844_v29  ;;  %v869_v1 = vld [vmem:[#allocation6] sm:$0x1] (%p839_p6)  ;;  %v876_v25 = vld [vmem:[%s1897_s6] sm:$0x1] (%p839_p6) }
 0x127   : > { %v846_v30 = vld [vmem:[#allocation3] sm:$0x1] (%p839_p6)  ;;  %v870_v2 = vmul.f32 (%p839_p6), 0.0078125, %v869_v1 }
 0x128   : > { %v847_v0 = vmul.f32 (%p839_p6), 0.0078125, %v846_v30  ;;  %v848_v4 = vmul.f32 (%p839_p6), %v845_v31, %v845_v31  ;;  %v865_v30 = vld [vmem:[%s1894_s3] sm:$0x1] (%p839_p6) }
 0x129   : > { %v871_v3 = vld [vmem:[#allocation7] sm:$0x1] (%p839_p6)  ;;  %v873_v6 = vmul.f32 (%p839_p6), %v870_v2, %v870_v2 }
 0x12a   : > { %v872_v5 = vmul.f32 0.0078125, %v871_v3  ;;  %v849_v7 = vsub.f32 %v847_v0, %v848_v4  ;;  %v890_v3 = vld [vmem:[%s1898_s7] sm:$0x1] }
 0x12c   : > { %v874_v8 = vsub.f32 %v872_v5, %v873_v6  ;;  %v850_v9 = vmax.f32 %v849_v7, 0.0 }
 0x12e   : > { %v875_v10 = vmax.f32 %v874_v8, 0.0  ;;  %v852_v11 = vadd.f32 1e-05, %v850_v9 }
 0x130   : > { %v877_v12 = vadd.f32 1e-05, %v875_v10  ;;  %1361 = vrsqrt.f32 %v852_v11  ;;  %vm859_vm0 = vweird.f32 %v852_v11 }
 0x132   : > { %1363 = vrsqrt.f32 %v877_v12  ;;  %vm884_vm2 = vweird.f32 %v877_v12 }
 0x136   : > { %v1362_v13 = vpop.eup %1361 }
 0x137   : > { %v854_v15 = vmul.f32 %v1362_v13, %v852_v11  ;;  %vm860_vm1 = vweird.f32 %v1362_v13 }
 0x138   : > { %v1364_v14 = vpop.eup %1363  ;;  %vm861_vm4 = vmor %vm859_vm0, %vm860_vm1 }
 0x139   : > { %v879_v16 = vmul.f32 %v1364_v14, %v877_v12  ;;  %v855_v17 = vmul.f32 %v1362_v13, %v854_v15  ;;  %vm885_vm3 = vweird.f32 %v1364_v14 }
 0x13a   : > { %vm886_vm5 = vmor %vm884_vm2, %vm885_vm3 }
 0x13b   : > { %v880_v18 = vmul.f32 %v1364_v14, %v879_v16  ;;  %v856_v19 = vmul.f32 0.5, %v855_v17 }
 0x13d   : > { %v881_v20 = vmul.f32 0.5, %v880_v18  ;;  %v857_v21 = vsub.f32 1.5, %v856_v19 }
 0x13f   : > { %v882_v22 = vsub.f32 1.5, %v881_v20  ;;  %v858_v24 = vmul.f32 %v1362_v13, %v857_v21 }
 0x141   : > { %v883_v26 = vmul.f32 %v1364_v14, %v882_v22  ;;  %v862_v27 = vsel %vm861_vm4, %v1362_v13, %v858_v24 }
 0x142   : > { %v863_v28 = vmul.f32 %v862_v27, %v851_v23 }
 0x143   : > { %v887_v29 = vsel %vm886_vm5, %v1364_v14, %v883_v26 }
 0x144   : > { %v888_v0 = vmul.f32 %v887_v29, %v876_v25  ;;  %864 = vst [vmem:[#allocation4] sm:$0x1] %v863_v28  ;;  %v866_v1 = vmul.f32 %v863_v28, %v845_v31 }
 0x146   : > { %889 = vst [vmem:[#allocation8] sm:$0x1] %v888_v0  ;;  %v891_v4 = vmul.f32 %v888_v0, %v870_v2  ;;  %v867_v5 = vsub.f32 %v865_v30, %v866_v1 }
 0x148   : > { %v892_v6 = vsub.f32 %v890_v3, %v891_v4  ;;  %868 = vst [vmem:[#allocation5] sm:$0x1] %v867_v5 }
 0x14a   : > { %893 = vst [vmem:[#allocation9] sm:$0x1] %v892_v6 }
 0x14b PF: > { %p1267_p7 = scmp.ne.s32.totalorder %s1415_s27, 1 }
 0x14d   : > { %896 = sbr.rel (%p1267_p7) target bundleno = 370 (0x172), region = 68 }
 0x152   : > { %v1770_v7 = vld [vmem:[#allocation4] ss:$0 sm:$0xff]  ;;  %v1772_v8 = vld [vmem:[#allocation5] ss:$0 sm:$0xff]  ;;  %v1774_v9 = vld [vmem:[#allocation8] ss:$0 sm:$0xff] }
 0x153   : > { %v901_v31 = vmul.f32 %v1770_v7, %v1593_v32  ;;  %v902_v2 = vmul.f32 %v1770_v7, %v1601_v36  ;;  %v903_v10 = vmul.f32 %v1770_v7, %v1609_v40  ;;  %v904_v11 = vmul.f32 %v1770_v7, %v1617_v44  ;;  %v1793_v15 = vld [vmem:[#allocation9] ss:$0 sm:$0xff] }
 0x154   : > { %v941_v12 = vmul.f32 %v1774_v9, %v1595_v33  ;;  %v942_v13 = vmul.f32 %v1774_v9, %v1603_v37  ;;  %v943_v14 = vmul.f32 %v1774_v9, %v1611_v41  ;;  %v944_v32 = vmul.f32 %v1774_v9, %v1619_v45 }
 0x155   : > { %v921_v36 = vadd.f32 %v1772_v8, %v901_v31  ;;  %v922_v40 = vadd.f32 %v1772_v8, %v902_v2  ;;  %v923_v44 = vadd.f32 %v1772_v8, %v903_v10  ;;  %v924_v16 = vadd.f32 %v1772_v8, %v904_v11 }
 0x156   : > { %v905_v33 = vmul.f32 %v1770_v7, %v1625_v48  ;;  %v945_v37 = vmul.f32 %v1774_v9, %v1627_v49  ;;  %v906_v41 = vmul.f32 %v1770_v7, %v1633_v52  ;;  %v946_v45 = vmul.f32 %v1774_v9, %v1635_v53 }
 0x157   : > { %v957_v17 = vadd.f32 %v941_v12, %v921_v36  ;;  %v958_v18 = vadd.f32 %v942_v13, %v922_v40  ;;  %v959_v19 = vadd.f32 %v943_v14, %v923_v44  ;;  %v960_v20 = vadd.f32 %v944_v32, %v924_v16 }
 0x158   : > { %v925_v21 = vadd.f32 %v1772_v8, %v905_v33  ;;  %v926_v22 = vadd.f32 %v1772_v8, %v906_v41  ;;  %v907_v48 = vmul.f32 %v1770_v7, %v1641_v56  ;;  %v947_v49 = vmul.f32 %v1774_v9, %v1643_v57 }
 0x159   : > { %v977_v23 = vadd.f32 %v1793_v15, %v957_v17  ;;  %v978_v52 = vadd.f32 %v1793_v15, %v958_v18  ;;  %v979_v53 = vadd.f32 %v1793_v15, %v959_v19  ;;  %v980_v24 = vadd.f32 %v1793_v15, %v960_v20 }
 0x15a   : > { %v961_v25 = vadd.f32 %v945_v37, %v925_v21  ;;  %v962_v26 = vadd.f32 %v946_v45, %v926_v22  ;;  %v927_v27 = vadd.f32 %v1772_v8, %v907_v48  ;;  %v908_v28 = vmul.f32 %v1770_v7, %v1649_v60 }
 0x15b   : > { %v993_v29 = vmax.f32 %v977_v23, 0.0  ;;  %v994_v56 = vmax.f32 %v978_v52, 0.0  ;;  %v995_v30 = vmax.f32 %v979_v53, 0.0  ;;  %v996_v0 = vmax.f32 %v980_v24, 0.0 }
 0x15c   : > { %v981_v57 = vadd.f32 %v1793_v15, %v961_v25  ;;  %v982_v1 = vadd.f32 %v1793_v15, %v962_v26  ;;  %v963_v3 = vadd.f32 %v947_v49, %v927_v27  ;;  %v928_v4 = vadd.f32 %v1772_v8, %v908_v28 }
 0x15d   : > { %1009 = vst [vmem:[#allocation10] sm:$0xff] %v993_v29  ;;  %v948_v5 = vmul.f32 %v1774_v9, %v1651_v61  ;;  %v909_v6 = vmul.f32 %v1770_v7, %v1597_v34  ;;  %v949_v60 = vmul.f32 %v1774_v9, %v1599_v35  ;;  %v910_v31 = vmul.f32 %v1770_v7, %v1605_v38 }
 0x15e   : > { %1010 = vst [vmem:[#allocation10 + $0x8] sm:$0xff] %v994_v56  ;;  %v997_v2 = vmax.f32 %v981_v57, 0.0  ;;  %v998_v10 = vmax.f32 %v982_v1, 0.0  ;;  %v983_v11 = vadd.f32 %v1793_v15, %v963_v3  ;;  %v950_v12 = vmul.f32 %v1774_v9, %v1607_v39 }
 0x15f   : > { %1011 = vst [vmem:[#allocation10 + $0x10] sm:$0xff] %v995_v30  ;;  %v964_v13 = vadd.f32 %v948_v5, %v928_v4  ;;  %v929_v61 = vadd.f32 %v1772_v8, %v909_v6  ;;  %v930_v34 = vadd.f32 %v1772_v8, %v910_v31  ;;  %v911_v35 = vmul.f32 %v1770_v7, %v1613_v42 }
 0x160   : > { %1012 = vst [vmem:[#allocation10 + $0x18] sm:$0xff] %v996_v0  ;;  %v999_v14 = vmax.f32 %v983_v11, 0.0  ;;  %v951_v38 = vmul.f32 %v1774_v9, %v1615_v43  ;;  %v912_v32 = vmul.f32 %v1770_v7, %v1621_v46  ;;  %v952_v39 = vmul.f32 %v1774_v9, %v1623_v47 }
 0x161   : > { %1013 = vst [vmem:[#allocation10 + $0x20] sm:$0xff] %v997_v2  ;;  %v984_v36 = vadd.f32 %v1793_v15, %v964_v13  ;;  %v965_v40 = vadd.f32 %v949_v60, %v929_v61  ;;  %v966_v44 = vadd.f32 %v950_v12, %v930_v34  ;;  %v931_v16 = vadd.f32 %v1772_v8, %v911_v35 }
 0x162   : > { %1014 = vst [vmem:[#allocation10 + $0x28] sm:$0xff] %v998_v10  ;;  %v932_v42 = vadd.f32 %v1772_v8, %v912_v32  ;;  %v913_v33 = vmul.f32 %v1770_v7, %v1629_v50  ;;  %v953_v43 = vmul.f32 %v1774_v9, %v1631_v51  ;;  %v914_v46 = vmul.f32 %v1770_v7, %v1637_v54 }
 0x163   : > { %1015 = vst [vmem:[#allocation10 + $0x30] sm:$0xff] %v999_v14  ;;  %v1000_v47 = vmax.f32 %v984_v36, 0.0  ;;  %v985_v37 = vadd.f32 %v1793_v15, %v965_v40  ;;  %v986_v41 = vadd.f32 %v1793_v15, %v966_v44  ;;  %v967_v45 = vadd.f32 %v951_v38, %v931_v16 }
 0x164   : > { %v968_v17 = vadd.f32 %v952_v39, %v932_v42  ;;  %v933_v18 = vadd.f32 %v1772_v8, %v913_v33  ;;  %v934_v19 = vadd.f32 %v1772_v8, %v914_v46  ;;  %v954_v50 = vmul.f32 %v1774_v9, %v1639_v55 }
 0x165   : > { %1016 = vst [vmem:[#allocation10 + $0x38] sm:$0xff] %v1000_v47  ;;  %v1001_v51 = vmax.f32 %v985_v37, 0.0  ;;  %v1002_v20 = vmax.f32 %v986_v41, 0.0  ;;  %v987_v54 = vadd.f32 %v1793_v15, %v967_v45  ;;  %v915_v21 = vmul.f32 %v1770_v7, %v1645_v58 }
 0x166   : > { %v988_v22 = vadd.f32 %v1793_v15, %v968_v17  ;;  %v969_v48 = vadd.f32 %v953_v43, %v933_v18  ;;  %v970_v49 = vadd.f32 %v954_v50, %v934_v19  ;;  %v955_v23 = vmul.f32 %v1774_v9, %v1647_v59 }
 0x167   : > { %1017 = vst [vmem:[#allocation10 + $0x40] sm:$0xff] %v1001_v51  ;;  %v1003_v52 = vmax.f32 %v987_v54, 0.0  ;;  %v935_v53 = vadd.f32 %v1772_v8, %v915_v21  ;;  %v916_v55 = vmul.f32 %v1770_v7, %v1653_v62  ;;  %v956_v24 = vmul.f32 %v1774_v9, %v1655_v63 }
 0x168   : > { %1018 = vst [vmem:[#allocation10 + $0x48] sm:$0xff] %v1002_v20  ;;  %v1004_v25 = vmax.f32 %v988_v22, 0.0  ;;  %v989_v58 = vadd.f32 %v1793_v15, %v969_v48  ;;  %v990_v26 = vadd.f32 %v1793_v15, %v970_v49 }
 0x169   : > { %1019 = vst [vmem:[#allocation10 + $0x50] sm:$0xff] %v1003_v52  ;;  %v971_v27 = vadd.f32 %v955_v23, %v935_v53  ;;  %v936_v59 = vadd.f32 %v1772_v8, %v916_v55 }
 0x16a   : > { %1020 = vst [vmem:[#allocation10 + $0x58] sm:$0xff] %v1004_v25  ;;  %v1005_v28 = vmax.f32 %v989_v58, 0.0  ;;  %v1006_v29 = vmax.f32 %v990_v26, 0.0 }
 0x16b   : > { %v991_v56 = vadd.f32 %v1793_v15, %v971_v27  ;;  %v972_v30 = vadd.f32 %v956_v24, %v936_v59 }
 0x16c   : > { %1021 = vst [vmem:[#allocation10 + $0x60] sm:$0xff] %v1005_v28 }
 0x16d   : > { %1022 = vst [vmem:[#allocation10 + $0x68] sm:$0xff] %v1006_v29  ;;  %v1007_v62 = vmax.f32 %v991_v56, 0.0  ;;  %v992_v63 = vadd.f32 %v1793_v15, %v972_v30 }
 0x16f   : > { %1023 = vst [vmem:[#allocation10 + $0x70] sm:$0xff] %v1007_v62  ;;  %v1008_v7 = vmax.f32 %v992_v63, 0.0 }
 0x171   : > { %1024 = vst [vmem:[#allocation10 + $0x78] sm:$0xff] %v1008_v7 }
 0x172 PF: > { %p1330_p8 = scmp.eq.s32.totalorder %s1130_s30, 1  ;;  %s1041_s20 = sshll.u32 %s1899_s8, 4  ;;  %s1042_s20 = int_to_ptr.hbm [resolvable:$true] %s1041_s20 }
 0x173   : > { %s1426_s21 = smov [#allocation10]   ;;  %s1427_s23 = smov 128  }
 0x174   : > { %s1039_s22 = sshll.u32 %s1426_s21, 4  ;;  %s1428_s24 = smov 8   ;;  %s1040_s22 = int_to_ptr.vmem [resolvable:$true] %s1039_s22 }
 0x175   : > { %1323 = dma.vmem_to_hbm [thread:$0]  (%p1330_p8), %s1040_s22, 2048, %s1042_s20, [#allocation11], %s1427_s23, %s1427_s23, %s1428_s24  }
 0x176 PF: > { %p1331_p9 = scmp.ge.s32.totalorder %s1423_s29, 2  ;;  %p1332_p10 = scmp.eq.s32.totalorder %s1131_s9, 1 }
 0x178   : > { %p1327_p11 = pnand %p1332_p10, %p1331_p9 }
 0x17a   : > { %p1328_p12 = pneg %p1327_p11 }
 0x17c   : > { %1410 = dma.done.wait (%p1328_p12), [#allocation11], 2048  }
 0x17d   : > { %1412 = vsyncadd (%p1328_p12), [#allocation11], 4294965248  ;;  %s21_s29 = sadd.s32 1, %s1423_s29   ;;  %s1900_s27 = smov %s1419_s28 }
 0x17e   : > { %p18_p13 = scmp.ge.s32.totalorder %s21_s29, 4   ;;  %s1901_s28 = smov %s1903_s10 }
 0x180   :  { %20 = sbr.rel (!%p18_p13) target bundleno = 3 (0x3), region = 106 }
 0x185   :  { %1063 = vsyncpa [#allocation11], 1 }
 0x186   :  { %1065 = vsyncpa [#allocation11 + $0x1], 1 }

// kernel: bottleneck_forward.4
= control target key start
LH: loop header
LB: loop body
LE: loop exit
PB: predicated region body
PF: predicated region fallthrough
CT: control target
= control target key end

     0   :  { %s3088_s18 = smov 0   ;;  %s3090_s19 = smov 0   ;;  %s3659_s0 = inlined_call_operand.vmem [shape: bf16[4,2,88,128], index: 0, kind: input, shape index: {}]   ;;  %s3660_s1 = inlined_call_operand.vmem [shape: bf16[9,128,128], index: 1, kind: input, shape index: {}]   ;;  %s3661_s2 = inlined_call_operand.vmem [shape: f32[1,128], index: 2, kind: input, shape index: {}]   ;;  %s3662_s3 = inlined_call_operand.vmem [shape: f32[1,128], index: 3, kind: input, shape index: {}]   ;;  %s3663_s4 = inlined_call_operand.vmem [shape: f32[72,1], index: 4, kind: input, shape index: {}]   ;;  %s3664_s5 = inlined_call_operand.vmem [shape: bf16[2,72,128], index: 5, kind: output, shape index: {}]  }
   0x1   :  { %s3092_s20 = smov 0   ;;  %s3094_s21 = smov 0  }
   0x2   :  { %s3096_s22 = smov 0   ;;  %s3098_s23 = smov 0  }
   0x3   :  { %s3100_s24 = smov 0  }
   0x4 LB: > { %s24_s25 = sadd.s32 1, %s3046_s22  ;;  %s27_s26 = sadd.s32 1, %s3050_s23  ;;  %s3054_s24 = sphi %s3100_s24, %s15_s24   ;;  %s3050_s23 = sphi %s3098_s23, %s3671_s23   ;;  %s3046_s22 = sphi %s3096_s22, %s3670_s22   ;;  %s3042_s21 = sphi %s3094_s21, %s3669_s21   ;;  %s3038_s20 = sphi %s3092_s20, %s3668_s20   ;;  %s3034_s19 = sphi %s3090_s19, %s3667_s19   ;;  %s3030_s18 = sphi %s3088_s18, %s3666_s18  }
   0x5   : > { %p25_p0 = scmp.ge.s32.totalorder %s24_s25, 2  ;;  %s34_s27 = sadd.s32 1, %s3034_s19 }
   0x6   : > { %p41_p1 = scmp.ne.s32.totalorder %s3034_s19, %s3030_s18  ;;  %p42_p2 = scmp.eq.s32.totalorder %s3054_s24, 0 }
   0x7   : > { %s3673_s25 = smov (%p25_p0, %s24_s25), 0  ;;  %s3675_s26 = smov (!%p25_p0, %s27_s26), %s3050_s23 }
   0x8   : > { %s31_s28 = ssub.s32 %s3046_s22, %s3673_s25  ;;  %p43_p3 = por %p42_p2, %p41_p1 }
   0x9   : > { %p29_p4 = scmp.ge.s32.totalorder %s3675_s26, 2  ;;  %p32_p5 = scmp.eq.s32.totalorder %s31_s28, 0 }
   0xa   : > { %p2171_p6 = scmp.ge.s32.totalorder %s3054_s24, 4 }
   0xb   : > { %s3677_s26 = smov (%p29_p4, %s3675_s26), 0 }
   0xc   : > { %s3137_s29 = scalar_select %p32_p5, %s3034_s19, %s34_s27  }
   0xd   : > { %191 = sbr.rel (%p2171_p6) target bundleno = 47 (0x2f), region = 32 }
  0x12   : > { %194 = sbr.rel (!%p43_p3) target bundleno = 47 (0x2f), region = 36  ;;  %s196_s30 = sand.u32 (%p43_p3), 1, %s3034_s19  }
  0x13   : > { %s2929_s6 = smul.u32 (%p43_p3), 44, %s3046_s22 }
  0x14   : > { %s2928_s7 = smul.u32 (%p43_p3), 176, %s196_s30 }
  0x15   : > { %s3145_s10 = scalar_lea.vmem (%p43_p3), %s3659_s0, %s2929_s6 }
  0x16   : > { %v218_v0 = vld [vmem:[%s3145_s10] sm:$0xff] (%p43_p3)   ;;  %v222_v1 = vld [vmem:[%s3145_s10 + $0x8] sm:$0xff] (%p43_p3)   ;;  %v226_v2 = vld [vmem:[%s3145_s10 + $0x10] sm:$0xff] (%p43_p3)   ;;  %s3150_s11 = scalar_lea.vmem (%p43_p3), [#allocation6], %s2928_s7 }
  0x17   : > { %219 = vst [vmem:[%s3150_s11] sm:$0xff] %v218_v0   ;;  %v230_v3 = vld [vmem:[%s3145_s10 + $0x18] sm:$0xff]   ;;  %v234_v4 = vld [vmem:[%s3145_s10 + $0x20] sm:$0xff]   ;;  %v238_v5 = vld [vmem:[%s3145_s10 + $0x28] sm:$0xf] }
  0x18   : > { %223 = vst [vmem:[%s3150_s11 + $0x8] sm:$0xff] %v222_v1   ;;  %v240_v6 = vld [vmem:[%s3145_s10 + $0x58] sm:$0xff]   ;;  %v244_v7 = vld [vmem:[%s3145_s10 + $0x60] sm:$0xff]   ;;  %v248_v8 = vld [vmem:[%s3145_s10 + $0x68] sm:$0xff]  }
  0x19   : > { %227 = vst [vmem:[%s3150_s11 + $0x10] sm:$0xff] %v226_v2   ;;  %v252_v9 = vld [vmem:[%s3145_s10 + $0x70] sm:$0xff]   ;;  %v256_v10 = vld [vmem:[%s3145_s10 + $0x78] sm:$0xff]   ;;  %v260_v11 = vld [vmem:[%s3145_s10 + $0x80] sm:$0xf] }
  0x1a   : > { %231 = vst [vmem:[%s3150_s11 + $0x18] sm:$0xff] %v230_v3   ;;  %v262_v12 = vld [vmem:[%s3145_s10 + $0xb0] sm:$0xff]   ;;  %v266_v13 = vld [vmem:[%s3145_s10 + $0xb8] sm:$0xff]   ;;  %v270_v14 = vld [vmem:[%s3145_s10 + $0xc0] sm:$0xff]  }
  0x1b   : > { %235 = vst [vmem:[%s3150_s11 + $0x20] sm:$0xff] %v234_v4   ;;  %v274_v15 = vld [vmem:[%s3145_s10 + $0xc8] sm:$0xff]   ;;  %v278_v16 = vld [vmem:[%s3145_s10 + $0xd0] sm:$0xff]   ;;  %v282_v17 = vld [vmem:[%s3145_s10 + $0xd8] sm:$0xf] }
  0x1c   : > { %239 = vst [vmem:[%s3150_s11 + $0x28] sm:$0xf] %v238_v5  ;;  %v284_v18 = vld [vmem:[%s3145_s10 + $0x108] sm:$0xff]   ;;  %v288_v19 = vld [vmem:[%s3145_s10 + $0x110] sm:$0xff]   ;;  %v292_v20 = vld [vmem:[%s3145_s10 + $0x118] sm:$0xff]  }
  0x1d   : > { %241 = vst [vmem:[%s3150_s11 + $0x2c] sm:$0xff] %v240_v6   ;;  %v296_v21 = vld [vmem:[%s3145_s10 + $0x120] sm:$0xff]   ;;  %v300_v22 = vld [vmem:[%s3145_s10 + $0x128] sm:$0xff]   ;;  %v304_v23 = vld [vmem:[%s3145_s10 + $0x130] sm:$0xf] }
  0x1e   : > { %245 = vst [vmem:[%s3150_s11 + $0x34] sm:$0xff] %v244_v7  }
  0x1f   : > { %249 = vst [vmem:[%s3150_s11 + $0x3c] sm:$0xff] %v248_v8  }
  0x20   : > { %253 = vst [vmem:[%s3150_s11 + $0x44] sm:$0xff] %v252_v9  }
  0x21   : > { %257 = vst [vmem:[%s3150_s11 + $0x4c] sm:$0xff] %v256_v10  }
  0x22   : > { %261 = vst [vmem:[%s3150_s11 + $0x54] sm:$0xf] %v260_v11 }
  0x23   : > { %263 = vst [vmem:[%s3150_s11 + $0x58] sm:$0xff] %v262_v12  }
  0x24   : > { %267 = vst [vmem:[%s3150_s11 + $0x60] sm:$0xff] %v266_v13  }
  0x25   : > { %271 = vst [vmem:[%s3150_s11 + $0x68] sm:$0xff] %v270_v14  }
  0x26   : > { %275 = vst [vmem:[%s3150_s11 + $0x70] sm:$0xff] %v274_v15  }
  0x27   : > { %279 = vst [vmem:[%s3150_s11 + $0x78] sm:$0xff] %v278_v16  }
  0x28   : > { %283 = vst [vmem:[%s3150_s11 + $0x80] sm:$0xf] %v282_v17 }
  0x29   : > { %285 = vst [vmem:[%s3150_s11 + $0x84] sm:$0xff] %v284_v18  }
  0x2a   : > { %289 = vst [vmem:[%s3150_s11 + $0x8c] sm:$0xff] %v288_v19  }
  0x2b   : > { %293 = vst [vmem:[%s3150_s11 + $0x94] sm:$0xff] %v292_v20  }
  0x2c   : > { %297 = vst [vmem:[%s3150_s11 + $0x9c] sm:$0xff] %v296_v21  }
  0x2d   : > { %301 = vst [vmem:[%s3150_s11 + $0xa4] sm:$0xff] %v300_v22  }
  0x2e   : > { %305 = vst [vmem:[%s3150_s11 + $0xac] sm:$0xf] %v304_v23 }
  0x2f PF: > { %p2173_p7 = scmp.ge.s32.totalorder %s3054_s24, 1  ;;  %p416_p8 = scmp.lt.s32.totalorder %s3054_s24, 5 }
  0x31   : > { %p417_p9 = pnand %p2173_p7, %p416_p8 }
  0x32   : > { %s451_s12 = smul.u32 (!%p417_p9), %s3038_s20, %s3042_s21  ;;  %s423_s30 = sand.u32 (!%p417_p9), 1, %s3030_s18  }
  0x33   : > { %420 = sbr.rel (%p417_p9) target bundleno = 645 (0x285), region = 77  ;;  %p1889_p11 = scmp.eq.s32.totalorder (!%p417_p9), %s3042_s21, 0 }
  0x34   : > { %p452_p10 = scmp.lt.s32.totalorder (!%p417_p9), %s451_s12, 1  ;;  %s2930_s10 = smul.u32 (!%p417_p9), 176, %s423_s30 }
  0x35   : > { %p1890_p12 = scmp.eq.s32.totalorder (!%p417_p9), %s3038_s20, 0 }
  0x36   : > { %s3246_s15 = scalar_lea.vmem (!%p417_p9), [#allocation6], %s2930_s10 }
  0x37   : > { %p3518_p13 = pnand (!%p417_p9), %p1890_p12, %p1889_p11 }
  0x38   : > { %v2805_v24 = vld [vmem:[%s3660_s1 + $0x78] sm:$0xff]  ;;  %v2804_v25 = vld [vmem:[%s3660_s1 + $0x70] sm:$0xff]  ;;  %s3679_s12 = smov (!%p452_p10, %s451_s12), 1  ;;  %v2803_v28 = vld [vmem:[%s3660_s1 + $0x68] sm:$0xff]  ;;  %vm780_vm0 = vsmask.f32 7424 }
  0x39   : > { %586 = vmatpush.bf16.msra.mxu0 %v2805_v24  ;;  %2912 = vmatpush.bf16.msra.mxu1 %v2805_v24  ;;  %v2830_v26 = vld [vmem:[%s3660_s1 + $0xf8] sm:$0xff]  ;;  %v2829_v27 = vld [vmem:[%s3660_s1 + $0xf0] sm:$0xff]  ;;  %s2931_s6 = smul.u32 36, %s3679_s12  ;;  %v2828_v29 = vld [vmem:[%s3660_s1 + $0xe8] sm:$0xff]  ;;  %vm1784_vm1 = vcmask 1046528  }
  0x3a   : > { %2913 = vmatpush.bf16.msra.mxu2 %v2805_v24  ;;  %1018 = vmatpush.bf16.msra.mxu3 %v2830_v26  ;;  %v2802_v30 = vld [vmem:[%s3660_s1 + $0x60] sm:$0xff]  ;;  %v2801_v32 = vld [vmem:[%s3660_s1 + $0x58] sm:$0xff]  ;;  %v2800_v34 = vld [vmem:[%s3660_s1 + $0x50] sm:$0xff] }
  0x3b   : > { %s3219_s11 = scalar_lea.vmem %s3664_s5, %s2931_s6  ;;  %v2827_v31 = vld [vmem:[%s3660_s1 + $0xe0] sm:$0xff]  ;;  %v2826_v33 = vld [vmem:[%s3660_s1 + $0xd8] sm:$0xff]  ;;  %v2825_v35 = vld [vmem:[%s3660_s1 + $0xd0] sm:$0xff] }
  0x3c   : > { %v2799_v36 = vld [vmem:[%s3660_s1 + $0x48] sm:$0xff]  ;;  %v2183_v37 = vld [vmem:[%s3246_s15 + $0x4c] sm:$0xf]  ;;  %v2793_v41 = vld [vmem:[%s3660_s1 + $0x38] sm:$0xff] }
  0x3d   : > { %587 = vmatpush.bf16.msra.mxu0 %v2804_v25  ;;  %2914 = vmatpush.bf16.msra.mxu1 %v2804_v25  ;;  %v2824_v38 = vld [vmem:[%s3660_s1 + $0xc8] sm:$0xff]  ;;  %v2798_v39 = vld [vmem:[%s3660_s1 + $0x40] sm:$0xff]  ;;  %v527_v40 = vunpack.c.l.b16 %v2183_v37  ;;  %v2818_v42 = vld [vmem:[%s3660_s1 + $0xb8] sm:$0xff] }
  0x3e   : > { %2915 = vmatpush.bf16.msra.mxu2 %v2804_v25  ;;  %1019 = vmatpush.bf16.msra.mxu3 %v2829_v27  ;;  %v2842_v43 = vld [vmem:[%s3660_s1 + $0x138] sm:$0xff]  ;;  %v2794_v44 = vld [vmem:[%s3246_s15 + $0x2c] sm:$0xff]  ;;  %v2796_v45 = vld [vmem:[%s3246_s15 + $0x3c] sm:$0xff] }
  0x3f   : > { %v532_v46 = vpack.c.b16 %v527_v40, %v527_v40  ;;  %v2823_v47 = vld [vmem:[%s3660_s1 + $0xc0] sm:$0xff]  ;;  %v2792_v48 = vld [vmem:[%s3660_s1 + $0x30] sm:$0xff]  ;;  %v2880_v49 = vld [vmem:[%s3660_s1 + $0x1f8] sm:$0xff] }
  0x40   : > { %v2817_v50 = vld [vmem:[%s3660_s1 + $0xb0] sm:$0xff]  ;;  %v2791_v53 = vld [vmem:[%s3660_s1 + $0x28] sm:$0xff]  ;;  %v2790_v57 = vld [vmem:[%s3660_s1 + $0x20] sm:$0xff] }
  0x41   : > { %588 = vmatpush.bf16.msra.mxu0 %v2803_v28  ;;  %2916 = vmatpush.bf16.msra.mxu1 %v2803_v28  ;;  %v2841_v51 = vld [vmem:[%s3660_s1 + $0x130] sm:$0xff]  ;;  %v2816_v55 = vld [vmem:[%s3660_s1 + $0xa8] sm:$0xff]  ;;  %v2815_v58 = vld [vmem:[%s3660_s1 + $0xa0] sm:$0xff] }
  0x42   : > { %2917 = vmatpush.bf16.msra.mxu2 %v2803_v28  ;;  %1020 = vmatpush.bf16.msra.mxu3 %v2828_v29  ;;  %v2819_v52 = vld [vmem:[%s3246_s15 + $0x58] sm:$0xff]  ;;  %v2806_v63 = vld [vmem:[%s3246_s15] sm:$0xff]  ;;  %v3325_v5 = vld [vmem:[%s3246_s15 + $0x8] sm:$0xff] }
  0x43   : > { %v2879_v54 = vld [vmem:[%s3660_s1 + $0x1f0] sm:$0xff]  ;;  %v2840_v56 = vld [vmem:[%s3660_s1 + $0x128] sm:$0xff]  ;;  %v2839_v59 = vld [vmem:[%s3660_s1 + $0x120] sm:$0xff]  ;;  %v784_v6 = vshll.u32 %v2806_v63, 16  ;;  %v782_v13 = vshrl.u32 %v2806_v63, 16  ;;  %v789_v15 = vshll.u32 %v3325_v5, 16 }
  0x44   : > { %v2789_v60 = vld [vmem:[%s3660_s1 + $0x18] sm:$0xff]  ;;  %v2788_v2 = vld [vmem:[%s3660_s1 + $0x10] sm:$0xff]  ;;  %v2878_v8 = vld [vmem:[%s3660_s1 + $0x1e8] sm:$0xff] }
  0x45   : > { %589 = vmatpush.bf16.msra.mxu0 %v2802_v30  ;;  %2918 = vmatpush.bf16.msra.mxu1 %v2802_v30  ;;  %v2814_v61 = vld [vmem:[%s3660_s1 + $0x98] sm:$0xff]  ;;  %v2813_v3 = vld [vmem:[%s3660_s1 + $0x90] sm:$0xff]  ;;  %v2787_v9 = vld [vmem:[%s3660_s1 + $0x8] sm:$0xff]  ;;  %v786_v14 = vrot.slane %v784_v6, 1  ;;  %v791_v19 = vrot.slane %v789_v15, 1 }
  0x46   : > { %2919 = vmatpush.bf16.msra.mxu2 %v2802_v30  ;;  %1021 = vmatpush.bf16.msra.mxu3 %v2827_v31  ;;  %v2838_v62 = vld [vmem:[%s3660_s1 + $0x118] sm:$0xff]  ;;  %v2837_v4 = vld [vmem:[%s3660_s1 + $0x110] sm:$0xff]  ;;  %v2877_v10 = vld [vmem:[%s3660_s1 + $0x1e0] sm:$0xff] }
  0x47   : > { %v2795_v0 = vld [vmem:[%s3246_s15 + $0x34] sm:$0xff]  ;;  %v2797_v1 = vld [vmem:[%s3246_s15 + $0x44] sm:$0xff]  ;;  %v2786_v16 = vld [vmem:[%s3660_s1] sm:$0xff]  ;;  %v787_v18 = vor.u32 %v786_v14, %v782_v13 }
  0x48   : > { %v2820_v7 = vld [vmem:[%s3246_s15 + $0x60] sm:$0xff]  ;;  %v2808_v30 = vld [vmem:[%s3246_s15 + $0x10] sm:$0xff]  ;;  %v2821_v31 = vld [vmem:[%s3246_s15 + $0x68] sm:$0xff] }
  0x49   : > { %590 = vmatpush.bf16.msra.mxu0 %v2801_v32  ;;  %2920 = vmatpush.bf16.msra.mxu1 %v2801_v32  ;;  %v2812_v11 = vld [vmem:[%s3660_s1 + $0x88] sm:$0xff]  ;;  %v2811_v17 = vld [vmem:[%s3660_s1 + $0x80] sm:$0xff]  ;;  %v2867_v21 = vld [vmem:[%s3660_s1 + $0x1b8] sm:$0xff]  ;;  %v792_v24 = vsel %vm780_vm0, %v787_v18, %v791_v19  ;;  %v797_v37 = vshll.u32 %v2808_v30, 16 }
  0x4a   : > { %2921 = vmatpush.bf16.msra.mxu2 %v2801_v32  ;;  %1022 = vmatpush.bf16.msra.mxu3 %v2826_v33  ;;  %v2836_v12 = vld [vmem:[%s3660_s1 + $0x108] sm:$0xff]  ;;  %v2835_v20 = vld [vmem:[%s3660_s1 + $0x100] sm:$0xff]  ;;  %v2855_v22 = vld [vmem:[%s3660_s1 + $0x178] sm:$0xff] }
  0x4b   : > { %v2888_v23 = vld [vmem:[%s3660_s1 + $0x238] sm:$0xff]  ;;  %v2866_v27 = vld [vmem:[%s3660_s1 + $0x1b0] sm:$0xff]  ;;  %v2865_v32 = vld [vmem:[%s3660_s1 + $0x1a8] sm:$0xff] }
  0x4c   : > { %v2782_v25 = vld [vmem:[%s3246_s15] sm:$0xff]  ;;  %v2784_v63 = vld [vmem:[%s3246_s15 + $0x10] sm:$0xff]  ;;  %v2869_v15 = vld [vmem:[%s3246_s15 + $0x38] sm:$0xff] }
  0x4d   : > { %591 = vmatpush.bf16.msra.mxu0 %v2800_v34  ;;  %2922 = vmatpush.bf16.msra.mxu1 %v2800_v34  ;;  %v2831_v26 = vld [vmem:[%s3246_s15 + $0x84] sm:$0xff]  ;;  %v2854_v28 = vld [vmem:[%s3660_s1 + $0x170] sm:$0xff]  ;;  %v2885_v40 = vld [vmem:[%s3660_s1 + $0x220] sm:$0xff] }
  0x4e   : > { %2923 = vmatpush.bf16.msra.mxu2 %v2800_v34  ;;  %1023 = vmatpush.bf16.msra.mxu3 %v2825_v35  ;;  %v2887_v29 = vld [vmem:[%s3660_s1 + $0x230] sm:$0xff]  ;;  %v2853_v33 = vld [vmem:[%s3660_s1 + $0x168] sm:$0xff]  ;;  %v2876_v34 = vld [vmem:[%s3660_s1 + $0x1d8] sm:$0xff] }
  0x4f   : > { %v2886_v35 = vld [vmem:[%s3660_s1 + $0x228] sm:$0xff] }
  0x51   : > { %592 = vmatpush.bf16.msra.mxu0 %v2799_v36  ;;  %2924 = vmatpush.bf16.msra.mxu1 %v2799_v36 }
  0x52   : > { %2925 = vmatpush.bf16.msra.mxu2 %v2799_v36  ;;  %1024 = vmatpush.bf16.msra.mxu3 %v2824_v38  ;;  %v793_v36 = vshrl.u32 %v3325_v5, 16  ;;  %v2864_v38 = vld [vmem:[%s3660_s1 + $0x1a0] sm:$0xff]  ;;  %v2882_v5 = vld [vmem:[%s3660_s1 + $0x208] sm:$0xff] }
  0x55   : > { %593 = vmatpush.bf16.msra.mxu0 %v2798_v39  ;;  %2926 = vmatpush.bf16.msra.mxu1 %v2798_v39 }
  0x56   : > { %2927 = vmatpush.bf16.msra.mxu2 %v2798_v39  ;;  %1025 = vmatpush.bf16.msra.mxu3 %v2823_v47  ;;  %v2852_v39 = vld [vmem:[%s3660_s1 + $0x160] sm:$0xff] }
  0x57   : > { %v2783_v47 = vld [vmem:[%s3246_s15 + $0x8] sm:$0xff] }
  0x58   : > { %594 = vmatmul.bf16.vlgmr.msra.gmra.mxu0 %v2794_v44  ;;  %604 = vmatmul.bf16.vlgmr.msra.gmra.mxu1 %v2796_v45  ;;  %v2851_v44 = vld [vmem:[%s3660_s1 + $0x158] sm:$0xff] }
  0x59   : > { %695 = vmatpush.bf16.msrb.mxu1 %v2793_v41  ;;  %1163 = vmatpush.bf16.msrb.mxu0 %v2842_v43  ;;  %v795_v41 = vor.u32 %v793_v36, %v791_v19  ;;  %v2863_v43 = vld [vmem:[%s3660_s1 + $0x198] sm:$0xff]  ;;  %v1641_v36 = vshrl.u32 %v2869_v15, 16 }
  0x5a   : > { %873 = vmatpush.bf16.msrb.mxu2 %v2818_v42  ;;  %1721 = vmatpush.bf16.msrb.mxu3 %v2880_v49  ;;  %v799_v42 = vrot.slane %v797_v37, 1  ;;  %v2884_v45 = vld [vmem:[%s3660_s1 + $0x218] sm:$0xff]  ;;  %v2862_v49 = vld [vmem:[%s3660_s1 + $0x190] sm:$0xff] }
  0x5b   : > { %614 = vmatmul.bf16.vlgmr.msra.gmra.mxu2 %v532_v46  ;;  %1026 = vmatmul.bf16.vlgmr.msra.gmra.mxu3 %v2819_v52  ;;  %v2822_v52 = vld [vmem:[%s3246_s15 + $0x70] sm:$0xff] }
  0x5c   : > { %v800_v46 = vsel %vm780_vm0, %v795_v41, %v799_v42  ;;  %v2843_v41 = vld [vmem:[%s3246_s15 + $0x58] sm:$0xff] }
  0x5d   : > { %696 = vmatpush.bf16.msrb.mxu1 %v2792_v48  ;;  %1164 = vmatpush.bf16.msrb.mxu0 %v2841_v51  ;;  %v2832_v48 = vld [vmem:[%s3246_s15 + $0x8c] sm:$0xff]  ;;  %v2809_v51 = vld [vmem:[%s3246_s15 + $0x18] sm:$0xff] }
  0x5e   : > { %874 = vmatpush.bf16.msrb.mxu2 %v2817_v50  ;;  %1722 = vmatpush.bf16.msrb.mxu3 %v2879_v54  ;;  %v2875_v50 = vld [vmem:[%s3660_s1 + $0x1d0] sm:$0xff]  ;;  %v809_v13 = vshrl.u32 %v2809_v51, 16 }
  0x5f   : > { %v2883_v54 = vld [vmem:[%s3660_s1 + $0x210] sm:$0xff] }
  0x61   : > { %697 = vmatpush.bf16.msrb.mxu1 %v2791_v53  ;;  %1165 = vmatpush.bf16.msrb.mxu0 %v2840_v56  ;;  %v2850_v53 = vld [vmem:[%s3660_s1 + $0x150] sm:$0xff]  ;;  %v2874_v56 = vld [vmem:[%s3660_s1 + $0x1c8] sm:$0xff] }
  0x62   : > { %875 = vmatpush.bf16.msrb.mxu2 %v2816_v55  ;;  %1723 = vmatpush.bf16.msrb.mxu3 %v2878_v8  ;;  %v2861_v55 = vld [vmem:[%s3660_s1 + $0x188] sm:$0xff]  ;;  %v2873_v8 = vld [vmem:[%s3660_s1 + $0x1c0] sm:$0xff] }
  0x65   : > { %698 = vmatpush.bf16.msrb.mxu1 %v2790_v57  ;;  %1166 = vmatpush.bf16.msrb.mxu0 %v2839_v59  ;;  %v801_v57 = vshrl.u32 %v2808_v30, 16  ;;  %v466_v30 = vld [vmem:[%s3246_s15 + $0x20] sm:$0xf] }
  0x66   : > { %876 = vmatpush.bf16.msrb.mxu2 %v2815_v58  ;;  %1724 = vmatpush.bf16.msrb.mxu3 %v2877_v10  ;;  %v805_v58 = vshll.u32 %v2809_v51, 16  ;;  %v2868_v10 = vld [vmem:[%s3246_s15 + $0x30] sm:$0xff] }
  0x67   : > { %v803_v59 = vor.u32 %v801_v57, %v799_v42  ;;  %v1630_v19 = vshrl.u32 %v2868_v10, 16  ;;  %v2871_v57 = vld [vmem:[%s3246_s15 + $0x48] sm:$0xff] }
  0x68   : > { %599 = vmatmul.bf16.gmra.mxu0 %v2795_v0  ;;  %609 = vmatmul.bf16.gmra.mxu1 %v2797_v1  ;;  %v2833_v0 = vld [vmem:[%s3246_s15 + $0x94] sm:$0xff]  ;;  %v2330_v1 = vld [vmem:[%s3246_s15 + $0x20] sm:$0xf] }
  0x69   : > { %699 = vmatpush.bf16.msrb.mxu1 %v2789_v60  ;;  %1167 = vmatpush.bf16.msrb.mxu0 %v2838_v62  ;;  %v807_v60 = vrot.slane %v805_v58, 1 }
  0x6a   : > { %877 = vmatpush.bf16.msrb.mxu2 %v2814_v61  ;;  %1725 = vmatpush.bf16.msrb.mxu3 %v2876_v34  ;;  %v2372_v61 = vld [vmem:[%s3246_s15 + $0x78] sm:$0xf]  ;;  %v636_v34 = vunpack.c.l.b16 %v466_v30 }
  0x6b   : > { %1031 = vmatmul.bf16.gmra.mxu3 %v2820_v7  ;;  %v808_v62 = vsel %vm780_vm0, %v803_v59, %v807_v60 }
  0x6d   : > { %700 = vmatpush.bf16.msrb.mxu1 %v2788_v2  ;;  %1168 = vmatpush.bf16.msrb.mxu0 %v2837_v4  ;;  %v2810_v2 = vld [vmem:[%s3246_s15 + $0x20] sm:$0x10] }
  0x6e   : > { %878 = vmatpush.bf16.msrb.mxu2 %v2813_v3  ;;  %1726 = vmatpush.bf16.msrb.mxu3 %v2875_v50  ;;  %v959_v3 = vunpack.c.l.b16 %v2372_v61  ;;  %v2849_v4 = vld [vmem:[%s3660_s1 + $0x148] sm:$0xff]  ;;  %v2331_v6 = vor.u32 %v2810_v2, %v2330_v1  ;;  %v1653_v1 = vshll.u32 %v2871_v57, 16 }
  0x70   : > { %v964_v7 = vpack.c.b16 %v959_v3, %v959_v3  ;;  %v813_v14 = vshll.u32 %v2331_v6, 16 }
  0x71   : > { %701 = vmatpush.bf16.msrb.mxu1 %v2787_v9  ;;  %1169 = vmatpush.bf16.msrb.mxu0 %v2836_v12  ;;  %v2860_v9 = vld [vmem:[%s3660_s1 + $0x180] sm:$0xff] }
  0x72   : > { %879 = vmatpush.bf16.msrb.mxu2 %v2812_v11  ;;  %1727 = vmatpush.bf16.msrb.mxu3 %v2874_v56  ;;  %v2848_v11 = vld [vmem:[%s3660_s1 + $0x140] sm:$0xff]  ;;  %v815_v18 = vrot.slane %v813_v14, 1 }
  0x73   : > { %v2881_v12 = vld [vmem:[%s3660_s1 + $0x200] sm:$0xff] }
  0x75   : > { %702 = vmatpush.bf16.msrb.mxu1 %v2786_v16  ;;  %1170 = vmatpush.bf16.msrb.mxu0 %v2835_v20  ;;  %v1632_v16 = vshll.u32 %v2868_v10, 16  ;;  %v2696_v10 = vld [vmem:[%s3246_s15 + $0x50] sm:$0xf] }
  0x76   : > { %880 = vmatpush.bf16.msrb.mxu2 %v2811_v17  ;;  %1728 = vmatpush.bf16.msrb.mxu3 %v2873_v8  ;;  %v811_v17 = vor.u32 %v809_v13, %v807_v60  ;;  %v2845_v8 = vld [vmem:[%s3246_s15 + $0x68] sm:$0xff] }
  0x77   : > { %v1634_v20 = vrot.slane %v1632_v16, 1 }
  0x78   : > { %703 = vmatmul.bf16.vlgmr.msrb.gmra.mxu1 %v2782_v25  ;;  %1171 = vmatmul.bf16.vlgmr.msrb.gmra.mxu0 %v2831_v26 }
  0x79   : > { %1349 = vmatpush.bf16.msra.mxu1 %v2855_v22  ;;  %1847 = vmatpush.bf16.msra.mxu0 %v2888_v23  ;;  %v816_v22 = vsel %vm780_vm0, %v811_v17, %v815_v18  ;;  %v2785_v23 = vld [vmem:[%s3246_s15 + $0x18] sm:$0xff]  ;;  %v1635_v25 = vor.u32 %v1634_v20, %v1630_v19 }
  0x7a   : > { %1535 = vmatpush.bf16.msra.mxu2 %v2867_v21  ;;  %v1637_v21 = vshll.u32 %v2869_v15, 16  ;;  %v1273_v15 = vshll.u32 %v2845_v8, 16 }
  0x7b   : > { %881 = vmatmul.bf16.vlgmr.msrb.gmra.mxu2 %v792_v24  ;;  %1036 = vmatmul.bf16.gmra.mxu3 %v2821_v31  ;;  %v2834_v24 = vld [vmem:[%s3246_s15 + $0x9c] sm:$0xff]  ;;  %v2445_v31 = vld [vmem:[%s3246_s15 + $0xa4] sm:$0xf] }
  0x7c   : > { %v1639_v26 = vrot.slane %v1637_v21, 1  ;;  %v1275_v20 = vrot.slane %v1273_v15, 1 }
  0x7d   : > { %1350 = vmatpush.bf16.msra.mxu1 %v2854_v28  ;;  %1848 = vmatpush.bf16.msra.mxu0 %v2887_v29  ;;  %v1391_v28 = vld [vmem:[%s3246_s15 + $0x4] sm:$0xff]  }
  0x7e   : > { %1536 = vmatpush.bf16.msra.mxu2 %v2866_v27  ;;  %v1640_v27 = vsel %vm780_vm0, %v1635_v25, %v1639_v26  ;;  %v2997_v29 = vld [vmem:[%s3246_s15 + $0x4] sm:$0xf0]  ;;  %v1643_v42 = vor.u32 %v1641_v36, %v1639_v26  ;;  %v1444_v50 = vshrl.u32 %v1391_v28, 16 }
  0x81   : > { %1351 = vmatpush.bf16.msra.mxu1 %v2853_v33  ;;  %1849 = vmatpush.bf16.msra.mxu0 %v2886_v35  ;;  %v817_v33 = vshrl.u32 %v2331_v6, 16  ;;  %v1104_v35 = vunpack.c.l.b16 %v2445_v31  ;;  %v1655_v6 = vrot.slane %v1653_v1, 1  ;;  %v2858_v31 = vld [vmem:[%s3246_s15 + $0x1c] sm:$0xff] }
  0x82   : > { %1537 = vmatpush.bf16.msra.mxu2 %v2865_v32  ;;  %v2870_v32 = vld [vmem:[%s3246_s15 + $0x40] sm:$0xff] }
  0x83   : > { %v1645_v37 = vshll.u32 %v2870_v32, 16 }
  0x85   : > { %1352 = vmatpush.bf16.msra.mxu1 %v2852_v39  ;;  %1850 = vmatpush.bf16.msra.mxu0 %v2885_v40  ;;  %v641_v39 = vpack.c.b16 %v636_v34, %v636_v34  ;;  %v1109_v40 = vpack.c.b16 %v1104_v35, %v1104_v35  ;;  %v1467_v35 = vshll.u32 %v2858_v31, 16 }
  0x86   : > { %1538 = vmatpush.bf16.msra.mxu2 %v2864_v38  ;;  %v819_v38 = vor.u32 %v817_v33, %v815_v18 }
  0x88   : > { %708 = vmatmul.bf16.gmra.mxu1 %v2783_v47  ;;  %1176 = vmatmul.bf16.gmra.mxu0 %v2832_v48  ;;  %v2844_v47 = vld [vmem:[%s3246_s15 + $0x60] sm:$0xff]  ;;  %v1260_v48 = vshll.u32 %v2843_v41, 16 }
  0x89   : > { %1353 = vmatpush.bf16.msra.mxu1 %v2851_v44  ;;  %1851 = vmatpush.bf16.msra.mxu0 %v2884_v45  ;;  %v2998_v44 = vld [vmem:[%s3246_s15 + $0x4] sm:$0xe]  ;;  %v2856_v45 = vld [vmem:[%s3246_s15 + $0xc] sm:$0xff]  ;;  %v1269_v14 = vshrl.u32 %v2844_v47, 16 }
  0x8a   : > { %1539 = vmatpush.bf16.msra.mxu2 %v2863_v43  ;;  %v1647_v43 = vrot.slane %v1645_v37, 1  ;;  %v2999_v56 = vor.u32 %v2998_v44, %v2997_v29 }
  0x8b   : > { %886 = vmatmul.bf16.gmra.mxu2 %v800_v46  ;;  %1041 = vmatmul.bf16.gmra.mxu3 %v2822_v52  ;;  %v1446_v46 = vshll.u32 %v1391_v28, 16  ;;  %v1451_v52 = vshll.u32 %v2856_v45, 16 }
  0x8d   : > { %1354 = vmatpush.bf16.msra.mxu1 %v2850_v53  ;;  %1852 = vmatpush.bf16.msra.mxu0 %v2883_v54  ;;  %v1448_v51 = vrot.slane %v1446_v46, 1  ;;  %v1258_v53 = vshrl.u32 %v2843_v41, 16  ;;  %v1262_v54 = vrot.slane %v1260_v48, 1  ;;  %v1453_v59 = vrot.slane %v1451_v52, 1 }
  0x8e   : > { %1540 = vmatpush.bf16.msra.mxu2 %v2862_v49  ;;  %v1648_v49 = vsel %vm780_vm0, %v1643_v42, %v1647_v43  ;;  %v1469_v42 = vrot.slane %v1467_v35, 1  ;;  %v1790_v46 = vrot.slane %v2858_v31, 1 }
  0x8f   : > { %v1449_v58 = vor.u32 %v1448_v51, %v1444_v50  ;;  %v1263_v60 = vor.u32 %v1262_v54, %v1258_v53  ;;  %v2859_v50 = vld [vmem:[%s3246_s15 + $0x24] sm:$0x10] }
  0x91   : > { %1355 = vmatpush.bf16.msra.mxu1 %v2849_v4  ;;  %1853 = vmatpush.bf16.msra.mxu0 %v2882_v5  ;;  %v1454_v2 = vsel %vm780_vm0, %v1449_v58, %v1453_v59 }
  0x92   : > { %1541 = vmatpush.bf16.msra.mxu2 %v2861_v55  ;;  %v1265_v55 = vshll.u32 %v2844_v47, 16 }
  0x94   : > { %v1267_v61 = vrot.slane %v1265_v55, 1 }
  0x95   : > { %1356 = vmatpush.bf16.msra.mxu1 %v2848_v11  ;;  %1854 = vmatpush.bf16.msra.mxu0 %v2881_v12  ;;  %v2872_v11 = vld [vmem:[%s3246_s15 + $0x50] sm:$0x10]  ;;  %v1455_v12 = vshrl.u32 %v2856_v45, 16 }
  0x96   : > { %1542 = vmatpush.bf16.msra.mxu2 %v2860_v9  ;;  %v1268_v3 = vsel %vm780_vm0, %v1263_v60, %v1267_v61  ;;  %v2697_v16 = vor.u32 %v2872_v11, %v2696_v10  ;;  %v1271_v19 = vor.u32 %v1269_v14, %v1267_v61 }
  0x97   : > { %v1457_v17 = vor.u32 %v1455_v12, %v1453_v59 }
  0x98   : > { %713 = vmatmul.bf16.gmra.mxu1 %v2784_v63  ;;  %1181 = vmatmul.bf16.gmra.mxu0 %v2833_v0  ;;  %v1786_v63 = vrot.slane %v2856_v45, 1  ;;  %v1649_v0 = vshrl.u32 %v2870_v32, 16  ;;  %v2846_v32 = vld [vmem:[%s3246_s15 + $0x70] sm:$0xff]  ;;  %v1665_v51 = vshrl.u32 %v2697_v16, 16 }
  0x9a   : > { %v1651_v5 = vor.u32 %v1649_v0, %v1647_v43 }
  0x9b   : > { %891 = vmatmul.bf16.gmra.mxu2 %v808_v62  ;;  %1046 = vmatmul.bf16.gmra.mxu3 %v964_v7  ;;  %v1785_v62 = vrot.slane %v2999_v56, 1  ;;  %v2857_v7 = vld [vmem:[%s3246_s15 + $0x14] sm:$0xff] }
  0x9c   : > { %v1656_v9 = vsel %vm780_vm0, %v1651_v5, %v1655_v6  ;;  %v1459_v13 = vshll.u32 %v2857_v7, 16  ;;  %v1788_v21 = vrot.slane %v2857_v7, 1  ;;  %v1463_v34 = vshrl.u32 %v2857_v7, 16  ;;  %v2554_v56 = vld [vmem:[%s3246_s15 + $0x78] sm:$0xf] }
  0x9d   : > { %v1787_v4 = vsel %vm1784_vm1, %v1785_v62, %v1786_v63  ;;  %v1471_v62 = vshrl.u32 %v2858_v31, 16 }
  0x9e   : > { %v1461_v18 = vrot.slane %v1459_v13, 1  ;;  %v1789_v28 = vsel %vm1784_vm1, %v1786_v63, %v1788_v21  ;;  %v1791_v55 = vsel %vm1784_vm1, %v1788_v21, %v1790_v46 }
  0xa0   : > { %v1465_v41 = vor.u32 %v1463_v34, %v1461_v18 }
  0xa2   : > { %v1470_v47 = vsel %vm780_vm0, %v1465_v41, %v1469_v42 }
  0xa8   : > { %718 = vmatmul.bf16.gmra.mxu1 %v2785_v23  ;;  %1186 = vmatmul.bf16.gmra.mxu0 %v2834_v24  ;;  %v1661_v23 = vshll.u32 %v2697_v16, 16  ;;  %v1462_v24 = vsel %vm780_vm0, %v1457_v17, %v1461_v18 }
  0xaa   : > { %v1663_v30 = vrot.slane %v1661_v23, 1 }
  0xab   : > { %896 = vmatmul.bf16.gmra.mxu2 %v816_v22  ;;  %1729 = vmatmul.bf16.vlgmr.msrb.gmra.mxu3 %v1640_v27  ;;  %v1657_v22 = vshrl.u32 %v2871_v57, 16  ;;  %v1276_v27 = vsel %vm780_vm0, %v1271_v19, %v1275_v20  ;;  %v2847_v57 = vld [vmem:[%s3246_s15 + $0x78] sm:$0x10] }
  0xac   : > { %v1667_v60 = vor.u32 %v1665_v51, %v1663_v30  ;;  %v2555_v61 = vor.u32 %v2847_v57, %v2554_v56 }
  0xad   : > { %v1659_v29 = vor.u32 %v1657_v22, %v1655_v6 }
  0xaf   : > { %v1664_v33 = vsel %vm780_vm0, %v1659_v29, %v1663_v30 }
  0xb8   : > { %723 = vmatmul.bf16.gmra.mxu1 %v641_v39  ;;  %1191 = vmatmul.bf16.gmra.mxu0 %v1109_v40  ;;  %v1277_v39 = vshrl.u32 %v2845_v8, 16  ;;  %v1281_v40 = vshll.u32 %v2846_v32, 16 }
  0xba   : > { %v1279_v44 = vor.u32 %v1277_v39, %v1275_v20  ;;  %v1283_v45 = vrot.slane %v1281_v40, 1 }
  0xbb   : > { %901 = vmatmul.bf16.gmra.mxu2 %v819_v38  ;;  %1734 = vmatmul.bf16.gmra.mxu3 %v1648_v49  ;;  %v2618_v49 = vld [vmem:[%s3246_s15 + $0x24] sm:$0xf] }
  0xbc   : > { %v1284_v54 = vsel %vm780_vm0, %v1279_v44, %v1283_v45  ;;  %v2619_v58 = vor.u32 %v2859_v50, %v2618_v49 }
  0xbe   : > { %v1475_v63 = vshll.u32 %v2619_v58, 16  ;;  %v1479_v23 = vshrl.u32 %v2619_v58, 16 }
  0xc0   : > { %v1477_v5 = vrot.slane %v1475_v63, 1 }
  0xc2   : > { %v1481_v31 = vor.u32 %v1479_v23, %v1477_v5 }
  0xc8   : > { %1357 = vmatmul.bf16.vlgmr.msra.gmra.mxu1 %v1268_v3  ;;  %1855 = vmatmul.bf16.vlgmr.msra.gmra.mxu0 %v1787_v4  ;;  %v1289_v3 = vshll.u32 %v2555_v61, 16  ;;  %v1473_v4 = vor.u32 %v1471_v62, %v1469_v42 }
  0xca   : > { %v1291_v8 = vrot.slane %v1289_v3, 1  ;;  %v1478_v10 = vsel %vm780_vm0, %v1473_v4, %v1477_v5 }
  0xcb   : > { %1543 = vmatmul.bf16.vlgmr.msra.gmra.mxu2 %v1454_v2  ;;  %1739 = vmatmul.bf16.gmra.mxu3 %v1656_v9  ;;  %v1285_v2 = vshrl.u32 %v2846_v32, 16  ;;  %v1792_v9 = vrot.slane %v2619_v58, 1 }
  0xcd   : > { %v1287_v7 = vor.u32 %v1285_v2, %v1283_v45  ;;  %v1793_v14 = vsel %vm1784_vm1, %v1790_v46, %v1792_v9 }
  0xcf   : > { %v1292_v13 = vsel %vm780_vm0, %v1287_v7, %v1291_v8 }
  0xd5   : > { %v3480_v25 = vpop.f32.mrf.mxu0  ;;  %v3482_v26 = vpop.f32.mrf.mxu1 }
  0xd8   : > { %1362 = vmatmul.bf16.gmra.mxu1 %v1276_v27  ;;  %1860 = vmatmul.bf16.gmra.mxu0 %v1789_v28  ;;  %v1293_v28 = vshrl.u32 %v2555_v61, 16 }
  0xdb   : > { %1548 = vmatmul.bf16.gmra.mxu2 %v1462_v24  ;;  %1744 = vmatmul.bf16.gmra.mxu3 %v1664_v33 }
  0xdd   : > { %v597_v37 = vpop.f32.mrf.mxu0  ;;  %v3491_v38 = vpop.f32.mrf.mxu1 }
  0xde   : > { %v3489_v36 = vpop.f32.mrf.mxu2  ;;  %v1027_v43 = vpop.f32.mrf.mxu3 }
  0xe5   : > { %v600_v52 = vpop.f32.mrf.mxu0  ;;  %v3496_v53 = vpop.f32.mrf.mxu1 }
  0xe6   : > { %v617_v48 = vpop.f32.mrf.mxu2  ;;  %v1029_v59 = vpop.f32.mrf.mxu3 }
  0xe8   : > { %1367 = vmatmul.bf16.gmra.mxu1 %v1284_v54  ;;  %1865 = vmatmul.bf16.gmra.mxu0 %v1791_v55 }
  0xeb   : > { %1553 = vmatmul.bf16.gmra.mxu2 %v1470_v47  ;;  %1749 = vmatmul.bf16.gmra.mxu3 %v1667_v60 }
  0xed   : > { %v602_v0 = vpop.f32.mrf.mxu0  ;;  %v3502_v1 = vpop.f32.mrf.mxu1 }
  0xee   : > { %v1032_v6 = vpop.f32.mrf.mxu3 }
  0xf5   : > { %v704_v11 = vpop.f32.mrf.mxu1  ;;  %v1172_v12 = vpop.f32.mrf.mxu0 }
  0xf6   : > { %v705_v15 = vadd.f32 %v704_v11, %v3480_v25  ;;  %v1034_v16 = vpop.f32.mrf.mxu3  ;;  %v1295_v25 = vor.u32 %v1293_v28, %v1291_v8 }
  0xf8   : > { %1372 = vmatmul.bf16.gmra.mxu1 %v1292_v13  ;;  %1870 = vmatmul.bf16.gmra.mxu0 %v1793_v14 }
  0xfb   : > { %1558 = vmatmul.bf16.gmra.mxu2 %v1478_v10 }
  0xfd   : > { %v706_v20 = vpop.f32.mrf.mxu1  ;;  %v1174_v21 = vpop.f32.mrf.mxu0 }
  0xfe   : > { %v882_v17 = vpop.f32.mrf.mxu2  ;;  %v707_v22 = vadd.f32 %v706_v20, %v597_v37  ;;  %v1037_v27 = vpop.f32.mrf.mxu3 }
  0xff   : > { %v906_v18 = vadd.f32 %v882_v17, %v705_v15 }
 0x101   : > { %v1051_v19 = vadd.f32 %v1027_v43, %v906_v18 }
 0x103   : > { %v3508_v24 = vadd.f32 %v1172_v12, %v1051_v19 }
 0x105   : > { %v709_v33 = vpop.f32.mrf.mxu1  ;;  %v1177_v34 = vpop.f32.mrf.mxu0 }
 0x106   : > { %v884_v29 = vpop.f32.mrf.mxu2  ;;  %v710_v35 = vadd.f32 %v709_v33, %v600_v52  ;;  %v1039_v37 = vpop.f32.mrf.mxu3 }
 0x107   : > { %v907_v30 = vadd.f32 %v884_v29, %v707_v22 }
 0x108   : > { %1377 = vmatmul.bf16.gmra.mxu1 %v1295_v25  ;;  %1875 = vmatmul.bf16.gmra.mxu0 %v1792_v9 }
 0x109   : > { %v1052_v32 = vadd.f32 %v1029_v59, %v907_v30 }
 0x10b   : > { %1563 = vmatmul.bf16.gmra.mxu2 %v1481_v31  ;;  %v3510_v39 = vadd.f32 %v1174_v21, %v1052_v32 }
 0x10d   : > { %v711_v43 = vpop.f32.mrf.mxu1  ;;  %v1179_v44 = vpop.f32.mrf.mxu0 }
 0x10e   : > { %v887_v40 = vpop.f32.mrf.mxu2  ;;  %v712_v45 = vadd.f32 %v711_v43, %v602_v0  ;;  %v1042_v47 = vpop.f32.mrf.mxu3 }
 0x10f   : > { %v908_v41 = vadd.f32 %v887_v40, %v710_v35 }
 0x111   : > { %v1053_v42 = vadd.f32 %v1032_v6, %v908_v41 }
 0x113   : > { %v3512_v46 = vadd.f32 %v1177_v34, %v1053_v42 }
 0x115   : > { %v714_v51 = vpop.f32.mrf.mxu1  ;;  %v1182_v52 = vpop.f32.mrf.mxu0 }
 0x116   : > { %v889_v48 = vpop.f32.mrf.mxu2  ;;  %v715_v54 = vadd.f32 %v714_v51, %v3482_v26  ;;  %v1044_v56 = vpop.f32.mrf.mxu3 }
 0x117   : > { %v909_v49 = vadd.f32 %v889_v48, %v712_v45 }
 0x119   : > { %v1054_v50 = vadd.f32 %v1034_v16, %v909_v49 }
 0x11b   : > { %v3523_v55 = vadd.f32 %v1179_v44, %v1054_v50 }
 0x11d   : > { %v716_v60 = vpop.f32.mrf.mxu1  ;;  %v1184_v61 = vpop.f32.mrf.mxu0 }
 0x11e   : > { %v892_v57 = vpop.f32.mrf.mxu2  ;;  %v717_v62 = vadd.f32 %v716_v60, %v3491_v38  ;;  %v1047_v0 = vpop.f32.mrf.mxu3 }
 0x11f   : > { %v910_v58 = vadd.f32 %v892_v57, %v715_v54 }
 0x121   : > { %v1055_v59 = vadd.f32 %v1037_v27, %v910_v58 }
 0x123   : > { %v3526_v63 = vadd.f32 %v1182_v52, %v1055_v59 }
 0x125   : > { %v719_v5 = vpop.f32.mrf.mxu1  ;;  %v1187_v6 = vpop.f32.mrf.mxu0 }
 0x126   : > { %v894_v2 = vpop.f32.mrf.mxu2  ;;  %v720_v26 = vadd.f32 %v719_v5, %v3496_v53  ;;  %v1049_v8 = vpop.f32.mrf.mxu3 }
 0x127   : > { %v911_v3 = vadd.f32 %v894_v2, %v717_v62 }
 0x129   : > { %v1056_v4 = vadd.f32 %v1039_v37, %v911_v3 }
 0x12b   : > { %v3529_v7 = vadd.f32 %v1184_v61, %v1056_v4 }
 0x12d   : > { %v721_v12 = vpop.f32.mrf.mxu1  ;;  %v1189_v13 = vpop.f32.mrf.mxu0 }
 0x12e   : > { %v897_v9 = vpop.f32.mrf.mxu2  ;;  %v722_v38 = vadd.f32 %v721_v12, %v3502_v1  ;;  %v1730_v15 = vpop.f32.mrf.mxu3 }
 0x12f   : > { %v912_v10 = vadd.f32 %v897_v9, %v720_v26 }
 0x131   : > { %v1057_v11 = vadd.f32 %v1042_v47, %v912_v10 }
 0x133   : > { %v3532_v14 = vadd.f32 %v1187_v6, %v1057_v11 }
 0x135   : > { %v724_v19 = vpop.f32.mrf.mxu1  ;;  %v1192_v20 = vpop.f32.mrf.mxu0 }
 0x136   : > { %v899_v16 = vpop.f32.mrf.mxu2  ;;  %v725_v53 = vadd.f32 %v724_v19, %v3489_v36  ;;  %v1732_v22 = vpop.f32.mrf.mxu3 }
 0x137   : > { %v913_v17 = vadd.f32 %v899_v16, %v722_v38 }
 0x139   : > { %v1058_v18 = vadd.f32 %v1044_v56, %v913_v17 }
 0x13b   : > { %v3535_v21 = vadd.f32 %v1189_v13, %v1058_v18 }
 0x13d   : > { %v726_v29 = vpop.f32.mrf.mxu1  ;;  %v1194_v30 = vpop.f32.mrf.mxu0 }
 0x13e   : > { %v902_v23 = vpop.f32.mrf.mxu2  ;;  %v1735_v1 = vpop.f32.mrf.mxu3 }
 0x13f   : > { %v914_v27 = vadd.f32 %v902_v23, %v725_v53 }
 0x141   : > { %v1059_v28 = vadd.f32 %v1047_v0, %v914_v27 }
 0x143   : > { %v3537_v31 = vadd.f32 %v1192_v20, %v1059_v28 }
 0x145   : > { %v1358_v25 = vpop.f32.mrf.mxu1  ;;  %v1856_v33 = vpop.f32.mrf.mxu0 }
 0x146   : > { %v904_v32 = vpop.f32.mrf.mxu2  ;;  %v1382_v34 = vadd.f32 %v1358_v25, %v3508_v24  ;;  %v1737_v35 = vpop.f32.mrf.mxu3 }
 0x14d   : > { %v1360_v41 = vpop.f32.mrf.mxu1  ;;  %v1858_v42 = vpop.f32.mrf.mxu0 }
 0x14e   : > { %v1544_v37 = vpop.f32.mrf.mxu2  ;;  %v1383_v44 = vadd.f32 %v1360_v41, %v3510_v39  ;;  %v1740_v45 = vpop.f32.mrf.mxu3 }
 0x14f   : > { %v1568_v40 = vadd.f32 %v1544_v37, %v1382_v34 }
 0x151   : > { %v1754_v36 = vadd.f32 %v1730_v15, %v1568_v40 }
 0x153   : > { %v3540_v43 = vadd.f32 %v1856_v33, %v1754_v36 }
 0x155   : > { %v1363_v50 = vpop.f32.mrf.mxu1  ;;  %v1861_v51 = vpop.f32.mrf.mxu0 }
 0x156   : > { %v1546_v47 = vpop.f32.mrf.mxu2  ;;  %v1384_v24 = vadd.f32 %v1363_v50, %v3512_v46  ;;  %v1742_v54 = vpop.f32.mrf.mxu3 }
 0x157   : > { %v1569_v48 = vadd.f32 %v1546_v47, %v1383_v44 }
 0x159   : > { %v1755_v49 = vadd.f32 %v1732_v22, %v1569_v48 }
 0x15b   : > { %v3543_v52 = vadd.f32 %v1858_v42, %v1755_v49 }
 0x15d   : > { %v1365_v59 = vpop.f32.mrf.mxu1  ;;  %v1863_v60 = vpop.f32.mrf.mxu0 }
 0x15e   : > { %v1549_v56 = vpop.f32.mrf.mxu2  ;;  %v1385_v39 = vadd.f32 %v1365_v59, %v3523_v55  ;;  %v1745_v62 = vpop.f32.mrf.mxu3 }
 0x15f   : > { %v1570_v57 = vadd.f32 %v1549_v56, %v1384_v24 }
 0x161   : > { %v1756_v58 = vadd.f32 %v1735_v1, %v1570_v57 }
 0x163   : > { %v3546_v61 = vadd.f32 %v1861_v51, %v1756_v58 }
 0x165   : > { %v1368_v4 = vpop.f32.mrf.mxu1  ;;  %v1866_v5 = vpop.f32.mrf.mxu0 }
 0x166   : > { %v1551_v0 = vpop.f32.mrf.mxu2  ;;  %v1386_v46 = vadd.f32 %v1368_v4, %v3526_v63  ;;  %v1747_v26 = vpop.f32.mrf.mxu3 }
 0x167   : > { %v1571_v2 = vadd.f32 %v1551_v0, %v1385_v39 }
 0x169   : > { %v1757_v3 = vadd.f32 %v1737_v35, %v1571_v2 }
 0x16b   : > { %v3549_v6 = vadd.f32 %v1863_v60, %v1757_v3 }
 0x16d   : > { %v1370_v11 = vpop.f32.mrf.mxu1  ;;  %v1868_v12 = vpop.f32.mrf.mxu0 }
 0x16e   : > { %v1554_v8 = vpop.f32.mrf.mxu2  ;;  %v1387_v55 = vadd.f32 %v1370_v11, %v3529_v7  ;;  %v1750_v38 = vpop.f32.mrf.mxu3 }
 0x16f   : > { %v1572_v9 = vadd.f32 %v1554_v8, %v1386_v46 }
 0x171   : > { %v1758_v10 = vadd.f32 %v1740_v45, %v1572_v9 }
 0x173   : > { %v3552_v13 = vadd.f32 %v1866_v5, %v1758_v10 }
 0x175   : > { %v1373_v18 = vpop.f32.mrf.mxu1  ;;  %v1871_v19 = vpop.f32.mrf.mxu0 }
 0x176   : > { %v1556_v15 = vpop.f32.mrf.mxu2  ;;  %v1388_v63 = vadd.f32 %v1373_v18, %v3532_v14  ;;  %v1752_v53 = vpop.f32.mrf.mxu3 }
 0x177   : > { %v1573_v16 = vadd.f32 %v1556_v15, %v1387_v55 }
 0x179   : > { %v1759_v17 = vadd.f32 %v1742_v54, %v1573_v16 }
 0x17b   : > { %v3555_v20 = vadd.f32 %v1868_v12, %v1759_v17 }
 0x17d   : > { %v1375_v28 = vpop.f32.mrf.mxu1  ;;  %v1873_v29 = vpop.f32.mrf.mxu0 }
 0x17e   : > { %v1559_v22 = vpop.f32.mrf.mxu2  ;;  %v1389_v7 = vadd.f32 %v1375_v28, %v3535_v21 }
 0x17f   : > { %v1574_v23 = vadd.f32 %v1559_v22, %v1388_v63 }
 0x181   : > { %v1760_v27 = vadd.f32 %v1745_v62, %v1574_v23 }
 0x183   : > { %v3558_v30 = vadd.f32 %v1871_v19, %v1760_v27 }
 0x185   : > { %v1378_v33 = vpop.f32.mrf.mxu1  ;;  %v1876_v34 = vpop.f32.mrf.mxu0 }
 0x186   : > { %v1561_v1 = vpop.f32.mrf.mxu2  ;;  %v1390_v37 = vadd.f32 %v1378_v33, %v3537_v31 }
 0x187   : > { %v1575_v32 = vadd.f32 %v1561_v1, %v1389_v7 }
 0x189   : > { %v1761_v25 = vadd.f32 %v1747_v26, %v1575_v32 }
 0x18b   : > { %v3561_v35 = vadd.f32 %v1873_v29, %v1761_v25 }
 0x18d   : > { %v1380_v41 = vpop.f32.mrf.mxu1  ;;  %v1878_v42 = vpop.f32.mrf.mxu0 }
 0x18e   : > { %v1564_v14 = vpop.f32.mrf.mxu2 }
 0x18f   : > { %v1576_v40 = vadd.f32 %v1564_v14, %v1390_v37 }
 0x191   : > { %v1762_v36 = vadd.f32 %v1750_v38, %v1576_v40 }
 0x192   : > { %1894 = sbr.rel (%p3518_p13) target bundleno = 410 (0x19a), region = 85 }
 0x193   : > { %v3564_v44 = vadd.f32 %v1876_v34, %v1762_v36 }
 0x196   : > { %v1566_v45 = vpop.f32.mrf.mxu2 }
 0x197   : > { %v3056_v21 = vmov 0.0  }
 0x198   : > { %1895 = vst [vmem:[#allocation2] sm:$0x1] %v3056_v21 }
 0x199   : > { %1896 = vst [vmem:[#allocation3] sm:$0x1] %v3056_v21 }
 0x19a PF: > { %p2778_p0 = scmp.ne.s32.totalorder %s3042_s21, 0 }
 0x19c   : > { %1899 = sbr.rel (%p2778_p0) target bundleno = 577 (0x241), region = 89 }
 0x1a1   : > { %v1902_v31 = vld [vmem:[%s3663_s4 + $0x10] sm:$0xff]  ;;  %v1900_v47 = vld [vmem:[%s3663_s4] sm:$0xff]  ;;  %v3057_v48 = vmov 0   ;;  %v1903_v50 = vld [vmem:[%s3663_s4 + $0x18] sm:$0xff] }
 0x1a2   : > { %2991 = vset.pattern.permute.xlu1 %v3057_v48  ;;  %2990 = vset.pattern.permute.xlu0 %v3057_v48  ;;  %v1904_v49 = vld [vmem:[%s3663_s4 + $0x20] sm:$0xff]  ;;  %v1901_v51 = vld [vmem:[%s3663_s4 + $0x8] sm:$0xff]  ;;  %v1907_v54 = vld [vmem:[%s3663_s4 + $0x38] sm:$0xff] }
 0x1a3   : > { %1921 = vperm.xlu1 %2991, %v1902_v31   ;;  %1911 = vperm.xlu0 %2990, %v1900_v47   ;;  %v1905_v24 = vld [vmem:[%s3663_s4 + $0x28] sm:$0xff]  ;;  %v1906_v56 = vld [vmem:[%s3663_s4 + $0x30] sm:$0xff]  ;;  %v1908_v57 = vld [vmem:[%s3663_s4 + $0x40] sm:$0xff] }
 0x1a4   : > { %2992 = vset.pattern.permute.xlu2 %v3057_v48 }
 0x1a5   : > { %1931 = vperm.xlu2 %2992, %v1904_v49  }
 0x1ab   : > { %1926 = vperm.xlu1 %2991, %v1903_v50   ;;  %1916 = vperm.xlu0 %2990, %v1901_v51  }
 0x1ad   : > { %1936 = vperm.xlu2 %2992, %v1905_v24  }
 0x1b3   : > { %1946 = vperm.xlu1 %2991, %v1907_v54   ;;  %1941 = vperm.xlu0 %2990, %v1906_v56   ;;  %v1963_v54 = vld [vmem:[#allocation2] sm:$0x1] }
 0x1b5   : > { %1951 = vperm.xlu2 %2992, %v1908_v57  }
 0x1ff   : > { %v1932_v58 = vpop.permute.xlu2 %1931 }
 0x200   : > { %v1958_v9 = vmul.f32 %v1932_v58, %v3552_v13  ;;  %v1980_v58 = vld [vmem:[#allocation3] sm:$0x1] }
 0x202   : > { %v1985_v19 = vmul.f32 %v1958_v9, %v3552_v13 }
 0x207   : > { %v1937_v39 = vpop.permute.xlu2 %1936 }
 0x208   : > { %v1959_v55 = vmul.f32 %v1937_v39, %v3555_v20 }
 0x20a   : > { %v1986_v27 = vmul.f32 %v1959_v55, %v3555_v20 }
 0x20f   : > { %v1952_v23 = vpop.permute.xlu2 %1951 }
 0x210   : > { %v1962_v1 = vmul.f32 %v1952_v23, %v3564_v44 }
 0x212   : > { %v1989_v40 = vmul.f32 %v1962_v1, %v3564_v44 }
 0x215   : > { %v1922_v59 = vpop.permute.xlu1 %1921  ;;  %v1912_v60 = vpop.permute.xlu0 %1911 }
 0x216   : > { %v1954_v62 = vmul.f32 %v1912_v60, %v3540_v43  ;;  %v1956_v3 = vmul.f32 %v1922_v59, %v3546_v61 }
 0x218   : > { %v1981_v5 = vmul.f32 %v1954_v62, %v3540_v43  ;;  %v1983_v10 = vmul.f32 %v1956_v3, %v3546_v61 }
 0x21d   : > { %v1927_v0 = vpop.permute.xlu1 %1926  ;;  %v1917_v2 = vpop.permute.xlu0 %1916 }
 0x21e   : > { %v1955_v4 = vmul.f32 %v1917_v2, %v3543_v52  ;;  %v1957_v46 = vmul.f32 %v1927_v0, %v3549_v6 }
 0x220   : > { %v1964_v26 = vadd.f32 %v1955_v4, %v1954_v62  ;;  %v1982_v8 = vmul.f32 %v1955_v4, %v3543_v52  ;;  %v1984_v38 = vmul.f32 %v1957_v46, %v3549_v6 }
 0x222   : > { %v1965_v11 = vadd.f32 %v1964_v26, %v1956_v3  ;;  %v1990_v12 = vadd.f32 %v1982_v8, %v1981_v5 }
 0x224   : > { %v1966_v15 = vadd.f32 %v1965_v11, %v1957_v46  ;;  %v1991_v16 = vadd.f32 %v1990_v12, %v1983_v10 }
 0x225   : > { %v1947_v17 = vpop.permute.xlu1 %1946  ;;  %v1942_v18 = vpop.permute.xlu0 %1941 }
 0x226   : > { %v1992_v63 = vadd.f32 %v1991_v16, %v1984_v38  ;;  %v1967_v53 = vadd.f32 %v1966_v15, %v1958_v9  ;;  %v1960_v22 = vmul.f32 %v1942_v18, %v3558_v30  ;;  %v1961_v28 = vmul.f32 %v1947_v17, %v3561_v35 }
 0x228   : > { %v1968_v29 = vadd.f32 %v1967_v53, %v1959_v55  ;;  %v1993_v7 = vadd.f32 %v1992_v63, %v1985_v19  ;;  %v1987_v33 = vmul.f32 %v1960_v22, %v3558_v30  ;;  %v1988_v34 = vmul.f32 %v1961_v28, %v3561_v35 }
 0x22a   : > { %v1994_v32 = vadd.f32 %v1993_v7, %v1986_v27  ;;  %v1969_v25 = vadd.f32 %v1968_v29, %v1960_v22 }
 0x22c   : > { %v1970_v37 = vadd.f32 %v1969_v25, %v1961_v28  ;;  %v1995_v14 = vadd.f32 %v1994_v32, %v1987_v33 }
 0x22e   : > { %v1971_v36 = vadd.f32 %v1970_v37, %v1962_v1  ;;  %v1996_v41 = vadd.f32 %v1995_v14, %v1988_v34 }
 0x230   : > { %v1972_v42 = vrot.slane %v1971_v36, 4  ;;  %v1997_v45 = vadd.f32 %v1996_v41, %v1989_v40 }
 0x232   : > { %v1973_v21 = vadd.f32 %v1972_v42, %v1971_v36  ;;  %v1998_v31 = vrot.slane %v1997_v45, 4 }
 0x234   : > { %v1974_v47 = vrot.slane %v1973_v21, 2  ;;  %v1999_v48 = vadd.f32 %v1998_v31, %v1997_v45 }
 0x236   : > { %v1975_v49 = vadd.f32 %v1974_v47, %v1973_v21  ;;  %v2000_v50 = vrot.slane %v1999_v48, 2 }
 0x238   : > { %v1976_v51 = vrot.slane %v1975_v49, 1  ;;  %v2001_v24 = vadd.f32 %v2000_v50, %v1999_v48 }
 0x23a   : > { %v1977_v56 = vadd.f32 %v1976_v51, %v1975_v49  ;;  %v2002_v57 = vrot.slane %v2001_v24, 1 }
 0x23c   : > { %v1978_v59 = vadd.f32 %v1977_v56, %v1963_v54  ;;  %v2003_v60 = vadd.f32 %v2002_v57, %v2001_v24 }
 0x23e   : > { %1979 = vst [vmem:[#allocation2] sm:$0x1] %v1978_v59  ;;  %v2004_v39 = vadd.f32 %v2003_v60, %v1980_v58 }
 0x240   : > { %2005 = vst [vmem:[#allocation3] sm:$0x1] %v2004_v39 }
 0x241 PF: > { %p2006_p1 = scmp.eq.s32.totalorder %s3042_s21, 1 }
 0x243   : > { %p2007_p2 = pnand %p2006_p1, %p1890_p12 }
 0x245   : > { %2010 = sbr.rel (%p2007_p2) target bundleno = 622 (0x26e), region = 93 }
 0x24a   : > { %v2011_v62 = vld [vmem:[#allocation2] sm:$0x1]  ;;  %v2013_v0 = vld [vmem:[#allocation3] sm:$0x1] }
 0x24b   : > { %v2012_v2 = vmul.f32 0.0078125, %v2011_v62  ;;  %v2014_v3 = vmul.f32 0.0078125, %v2013_v0  ;;  %v2018_v55 = vld [vmem:[%s3661_s2] sm:$0x1] }
 0x24c   : > { %v2032_v17 = vld [vmem:[%s3662_s3] sm:$0x1] }
 0x24d   : > { %v2015_v4 = vmul.f32 %v2012_v2, %v2012_v2 }
 0x24f   : > { %v2016_v5 = vsub.f32 %v2014_v3, %v2015_v4 }
 0x251   : > { %v2017_v46 = vmax.f32 %v2016_v5, 0.0 }
 0x253   : > { %v2019_v26 = vadd.f32 1e-05, %v2017_v46 }
 0x255   : > { %2993 = vrsqrt.f32 %v2019_v26  ;;  %vm2026_vm2 = vweird.f32 %v2019_v26 }
 0x25b   : > { %v2994_v8 = vpop.eup %2993 }
 0x25c   : > { %v2021_v9 = vmul.f32 %v2994_v8, %v2019_v26  ;;  %vm2027_vm3 = vweird.f32 %v2994_v8 }
 0x25d   : > { %vm2028_vm4 = vmor %vm2026_vm2, %vm2027_vm3 }
 0x25e   : > { %v2022_v10 = vmul.f32 %v2994_v8, %v2021_v9 }
 0x260   : > { %v2023_v11 = vmul.f32 0.5, %v2022_v10 }
 0x262   : > { %v2024_v12 = vsub.f32 1.5, %v2023_v11 }
 0x264   : > { %v2025_v38 = vmul.f32 %v2994_v8, %v2024_v12 }
 0x266   : > { %v2029_v15 = vsel %vm2028_vm4, %v2994_v8, %v2025_v38 }
 0x267   : > { %v2030_v16 = vmul.f32 %v2029_v15, %v2018_v55 }
 0x269   : > { %2031 = vst [vmem:[#allocation4] sm:$0x1] %v2030_v16  ;;  %v2033_v18 = vmul.f32 %v2030_v16, %v2012_v2 }
 0x26b   : > { %v2034_v19 = vsub.f32 %v2032_v17, %v2033_v18 }
 0x26d   : > { %2035 = vst [vmem:[#allocation5] sm:$0x1] %v2034_v19 }
 0x26e PF: > { %p2779_p3 = scmp.ne.s32.totalorder %s3042_s21, 1 }
 0x270   : > { %2038 = sbr.rel (%p2779_p3) target bundleno = 645 (0x285), region = 97 }
 0x275   : > { %v2995_v63 = vld [vmem:[#allocation4] ss:$0 sm:$0xff]  ;;  %v2996_v53 = vld [vmem:[#allocation5] ss:$0 sm:$0xff] }
 0x276   : > { %v2043_v22 = vmul.f32 %v2995_v63, %v3540_v43  ;;  %v2044_v23 = vmul.f32 %v2995_v63, %v3543_v52  ;;  %v2045_v27 = vmul.f32 %v2995_v63, %v3546_v61  ;;  %v2046_v28 = vmul.f32 %v2995_v63, %v3549_v6 }
 0x277   : > { %v2047_v29 = vmul.f32 %v2995_v63, %v3552_v13  ;;  %v2048_v7 = vmul.f32 %v2995_v63, %v3555_v20  ;;  %v2049_v1 = vmul.f32 %v2995_v63, %v3558_v30  ;;  %v2050_v32 = vmul.f32 %v2995_v63, %v3561_v35 }
 0x278   : > { %v2056_v25 = vadd.f32 %v2996_v53, %v2043_v22  ;;  %v2057_v33 = vadd.f32 %v2996_v53, %v2044_v23  ;;  %v2058_v34 = vadd.f32 %v2996_v53, %v2045_v27  ;;  %v2059_v37 = vadd.f32 %v2996_v53, %v2046_v28 }
 0x279   : > { %v2060_v14 = vadd.f32 %v2996_v53, %v2047_v29  ;;  %v2061_v43 = vadd.f32 %v2996_v53, %v2048_v7  ;;  %v2062_v52 = vadd.f32 %v2996_v53, %v2049_v1  ;;  %v2063_v40 = vadd.f32 %v2996_v53, %v2050_v32 }
 0x27a   : > { %v2065_v61 = vmax.f32 %v2056_v25, 0.0  ;;  %v2066_v6 = vmax.f32 %v2057_v33, 0.0  ;;  %v2067_v13 = vmax.f32 %v2058_v34, 0.0  ;;  %v2068_v20 = vmax.f32 %v2059_v37, 0.0 }
 0x27b   : > { %v2069_v36 = vmax.f32 %v2060_v14, 0.0  ;;  %v2070_v30 = vmax.f32 %v2061_v43, 0.0  ;;  %v2071_v35 = vmax.f32 %v2062_v52, 0.0  ;;  %v2072_v41 = vmax.f32 %v2063_v40, 0.0 }
 0x27c   : > { %v2892_v42 = vpack.c.bf16 %v2066_v6, %v2065_v61  ;;  %v2897_v45 = vpack.c.bf16 %v2068_v20, %v2067_v13  ;;  %v2051_v21 = vmul.f32 %v2995_v63, %v3564_v44 }
 0x27d   : > { %v2902_v31 = vpack.c.bf16 %v2070_v30, %v2069_v36  ;;  %v2907_v47 = vpack.c.bf16 %v2072_v41, %v2071_v35 }
 0x27e   : > { %2893 = vst [vmem:[%s3219_s11] sm:$0xff] %v2892_v42   ;;  %v2064_v48 = vadd.f32 %v2996_v53, %v2051_v21 }
 0x27f   : > { %2909 = vst [vmem:[%s3219_s11 + $0x8] sm:$0xff] %v2897_v45  }
 0x280   : > { %2910 = vst [vmem:[%s3219_s11 + $0x10] sm:$0xff] %v2902_v31   ;;  %v2073_v49 = vmax.f32 %v2064_v48, 0.0 }
 0x281   : > { %2911 = vst [vmem:[%s3219_s11 + $0x18] sm:$0xff] %v2907_v47  }
 0x282   : > { %v2082_v50 = vpack.c.bf16 %v2073_v49, %v2073_v49 }
 0x284   : > { %2091 = vst [vmem:[%s3219_s11 + $0x20] sm:$0xf] %v2082_v50 }
 0x285 PF: > { %s15_s24 = sadd.s32 1, %s3054_s24   ;;  %s3666_s18 = smov %s3034_s19 }
 0x286   : > { %p12_p4 = scmp.ge.s32.totalorder %s15_s24, 6   ;;  %s3667_s19 = smov %s3137_s29 }
 0x287   : > { %s3668_s20 = smov %s3046_s22  ;;  %s3669_s21 = smov %s3050_s23 }
 0x288   : > { %s3670_s22 = smov %s3673_s25  ;;  %s3671_s23 = smov %s3677_s26 }
 0x289   :  { %14 = sbr.rel (!%p12_p4) target bundleno = 4 (0x4), region = 143 }

</bundles_post_ra>
